<compile_context>
chip_gen: v7x
topology: tpu7x:2x2x1
jax: 0.10.0
libtpu: 0.0.40
codegen_flags: <defaults>
</compile_context>

<pallas_src>
import functools

import jax
import jax.numpy as jnp
from jax.experimental import pallas as pl
from jax.experimental.pallas import tpu as pltpu

# (in_features, out_features) for fc1 .. fc10, exactly as in the PyTorch module.
LAYER_DIMS = [
    (3 * 32 * 32, 100),
    (100, 200),
    (200, 300),
    (300, 300),
    (300, 200),
    (200, 300),
    (300, 50),
    (50, 75),
    (75, 100),
    (100, 10),
]
NUM_LAYERS = len(LAYER_DIMS)
NUM_CLASSES = LAYER_DIMS[-1][1]


def _round_up(x, m):
    return ((x + m - 1) // m) * m


# Lane-padded (128-aligned) layer dims used inside the kernel.
PADDED_DIMS = [(_round_up(i, 128), _round_up(o, 128)) for (i, o) in LAYER_DIMS]
IN_FEATURES = LAYER_DIMS[0][0]          # 3072, already a multiple of 128
OUT_PADDED = PADDED_DIMS[-1][1]         # 128 (true output width is 10)


def dnn7_kernel(x_ref, *refs):
    """Fused MLP forward for one batch tile.

    refs = (w1, b1, w2, b2, ..., w10, b10, out_ref).
    x_ref is f32 (TB, 3072): the f32->bf16 cast happens on the VPU in-kernel so
    the wrapper never makes an extra HBM pass over the input.  Weights are
    (pad_in, pad_out) bf16, biases (1, pad_out) f32; both use a constant block
    index so they stay VMEM-resident across the batch grid.
    """
    out_ref = refs[-1]
    param_refs = refs[:-1]

    h = x_ref[...].astype(jnp.bfloat16)              # cast fused into the kernel
    for layer in range(NUM_LAYERS):
        w_ref = param_refs[2 * layer]
        b_ref = param_refs[2 * layer + 1]
        acc = jnp.dot(h, w_ref[...], preferred_element_type=jnp.float32)
        acc = acc + b_ref[...]                       # f32 bias add (VPU)
        if layer < NUM_LAYERS - 1:
            # ReLU, then keep the live inter-layer activation in bf16 to halve
            # vld/vst + spill traffic between the 10 dependent matmuls.
            h = jnp.maximum(acc, 0.0).astype(jnp.bfloat16)
        else:
            out_ref[...] = acc                       # (TB, 128) f32


def _device_tile_cap():
    try:
        kind = jax.devices()[0].device_kind.lower()
    except Exception:
        return 256
    if "v5 lite" in kind or "v5e" in kind or "v5lite" in kind:
        return 256          # v5e: 16 MiB scoped-VMEM default, compute-bound anyway
    return 512              # v6e / v7x: amortize per-step overhead + MXU drain


def _pick_batch_tile(batch):
    if batch <= 8:
        return 8
    # Aim for >=2 grid tiles (keeps both v7x TensorCores busy) while keeping the
    # ragged last tile small; cap by the per-generation VMEM-friendly size.
    tb = _round_up(pl.cdiv(batch, 2), 8)
    return max(8, min(_device_tile_cap(), tb))


@functools.lru_cache(maxsize=None)
def _build_forward(batch, tb, single_buffer_params):
    num_tiles = pl.cdiv(batch, tb)

    spec_kwargs = {"pipeline_mode": pl.Buffered(1)} if single_buffer_params else {}

    x_spec = pl.BlockSpec((tb, IN_FEATURES), lambda i: (i, 0))
    param_specs = []
    for (pi, po) in PADDED_DIMS:
        param_specs.append(pl.BlockSpec((pi, po), lambda i: (0, 0), **spec_kwargs))
        param_specs.append(pl.BlockSpec((1, po), lambda i: (0, 0), **spec_kwargs))
    out_spec = pl.BlockSpec((tb, OUT_PADDED), lambda i: (i, 0))

    # Advisory cost estimate for the XLA scheduler.
    flops = 2 * batch * sum(pi * po for (pi, po) in PADDED_DIMS)
    weight_bytes = sum(pi * po * 2 + po * 4 for (pi, po) in PADDED_DIMS)
    bytes_accessed = (weight_bytes
                      + batch * IN_FEATURES * 4     # f32 input streamed once
                      + batch * OUT_PADDED * 4)
    cost = pl.CostEstimate(flops=flops, transcendentals=0,
                           bytes_accessed=bytes_accessed)

    call = pl.pallas_call(
        dnn7_kernel,
        out_shape=jax.ShapeDtypeStruct((batch, OUT_PADDED), jnp.float32),
        grid=(num_tiles,),
        in_specs=[x_spec] + param_specs,
        out_specs=out_spec,
        compiler_params=pltpu.CompilerParams(
            dimension_semantics=("parallel",)),
        cost_estimate=cost,
    )

    def fwd(x_nchw, *flat_params):
        # Flatten (bitcast under jit) == torch.flatten(x, 1); stays f32.
        x_flat = jnp.reshape(x_nchw, (x_nchw.shape[0], IN_FEATURES))
        out_padded = call(x_flat, *flat_params)
        return out_padded[:, :NUM_CLASSES]          # (B, 10)

    return jax.jit(fwd)


_SINGLE_BUFFER_OK = None   # resolved on first call; falls back if unsupported


def dnn7_forward(x_nchw, packed_params):
    """x_nchw: (B, 3, 32, 32) f32.  packed_params: list of (W_t bf16, b_row f32)."""
    global _SINGLE_BUFFER_OK
    batch = x_nchw.shape[0]
    flat_params = [arr for pair in packed_params for arr in pair]
    tb = _pick_batch_tile(batch)

    if _SINGLE_BUFFER_OK is None:
        try:
            fn = _build_forward(batch, tb, True)
            out = jax.block_until_ready(fn(x_nchw, *flat_params))
            _SINGLE_BUFFER_OK = True
            return out
        except Exception:
            # pipeline_mode=pl.Buffered(1) unsupported in this build; params fall
            # back to default double-buffering (still only ~4 MB of VMEM).
            _SINGLE_BUFFER_OK = False

    fn = _build_forward(batch, tb, _SINGLE_BUFFER_OK)
    return fn(x_nchw, *flat_params)


def init_params(key):
    """PyTorch-style init: U(-1/sqrt(fan_in), 1/sqrt(fan_in)); raw (out,in) layout."""
    params = []
    for (fan_in, fan_out) in LAYER_DIMS:
        key, kw, kb = jax.random.split(key, 3)
        bound = 1.0 / jnp.sqrt(jnp.float32(fan_in))
        w = jax.random.uniform(kw, (fan_out, fan_in), jnp.float32, -bound, bound)
        b = jax.random.uniform(kb, (fan_out,), jnp.float32, -bound, bound)
        params.append((w, b))
    return params


def pack_params(raw_params):
    """Transpose to (in, out), zero-pad to 128-aligned widths, cast weights to bf16."""
    packed = []
    for (w, b), (fi, fo), (pi, po) in zip(raw_params, LAYER_DIMS, PADDED_DIMS):
        w_t = jnp.zeros((pi, po), jnp.bfloat16)
        w_t = w_t.at[:fi, :fo].set(jnp.transpose(w).astype(jnp.bfloat16))
        b_row = jnp.zeros((1, po), jnp.float32)
        b_row = b_row.at[0, :fo].set(b)
        packed.append((w_t, b_row))
    return packed


def reference_forward_bf16(x_nchw, packed_params):
    """Plain-JAX reference matching the kernel's bf16/padded arithmetic."""
    h = jnp.reshape(x_nchw, (x_nchw.shape[0], -1)).astype(jnp.bfloat16)
    for i, (w_t, b_row) in enumerate(packed_params):
        acc = jnp.dot(h.astype(jnp.bfloat16), w_t,
                      preferred_element_type=jnp.float32) + b_row
        if i < NUM_LAYERS - 1:
            h = jnp.maximum(acc, 0.0).astype(jnp.bfloat16)
        else:
            h = acc
    return h[:, :NUM_CLASSES]


def reference_forward_f32(x_nchw, raw_params):
    """Full-precision reference matching the original PyTorch semantics."""
    h = jnp.reshape(x_nchw, (x_nchw.shape[0], -1))
    for i, (w, b) in enumerate(raw_params):
        h = h @ jnp.transpose(w) + b
        if i < NUM_LAYERS - 1:
            h = jnp.maximum(h, 0.0)
    return h


if __name__ == "__main__":
    key = jax.random.PRNGKey(0)
    key, k_x = jax.random.split(key)

    batch = 2
    x = jax.random.normal(k_x, (batch, 3, 32, 32), jnp.float32)   # NCHW like PyTorch
    raw_params = init_params(key)
    packed = pack_params(raw_params)

    out = dnn7_forward(x, packed)
    out = jax.block_until_ready(out)
    assert out.shape == (batch, NUM_CLASSES), out.shape

    # Tight check vs. a plain-JAX model with identical bf16/padded arithmetic.
    ref_bf16 = reference_forward_bf16(x, packed)
    assert jnp.allclose(out, ref_bf16, atol=1e-3, rtol=1e-3), "mismatch vs bf16 reference"

    # Loose check vs. the original f32 PyTorch-semantics forward (bf16 quant error only).
    ref_f32 = reference_forward_f32(x, raw_params)
    assert jnp.allclose(out, ref_f32, atol=1e-1, rtol=1e-1), "mismatch vs f32 reference"

    print("KERNEL_OK")
</pallas_src>

<mosaic_0001>
module attributes {stable_mosaic.version = 11 : i64} {
  func.func @dnn7_kernel(%arg0: i32, %arg1: memref<8x3072xf32, #tpu.memory_space<vmem>>, %arg2: memref<3072x128xbf16, #tpu.memory_space<vmem>>, %arg3: memref<1x128xf32, #tpu.memory_space<vmem>>, %arg4: memref<128x256xbf16, #tpu.memory_space<vmem>>, %arg5: memref<1x256xf32, #tpu.memory_space<vmem>>, %arg6: memref<256x384xbf16, #tpu.memory_space<vmem>>, %arg7: memref<1x384xf32, #tpu.memory_space<vmem>>, %arg8: memref<384x384xbf16, #tpu.memory_space<vmem>>, %arg9: memref<1x384xf32, #tpu.memory_space<vmem>>, %arg10: memref<384x256xbf16, #tpu.memory_space<vmem>>, %arg11: memref<1x256xf32, #tpu.memory_space<vmem>>, %arg12: memref<256x384xbf16, #tpu.memory_space<vmem>>, %arg13: memref<1x384xf32, #tpu.memory_space<vmem>>, %arg14: memref<384x128xbf16, #tpu.memory_space<vmem>>, %arg15: memref<1x128xf32, #tpu.memory_space<vmem>>, %arg16: memref<128x128xbf16, #tpu.memory_space<vmem>>, %arg17: memref<1x128xf32, #tpu.memory_space<vmem>>, %arg18: memref<128x128xbf16, #tpu.memory_space<vmem>>, %arg19: memref<1x128xf32, #tpu.memory_space<vmem>>, %arg20: memref<128x128xbf16, #tpu.memory_space<vmem>>, %arg21: memref<1x128xf32, #tpu.memory_space<vmem>>, %arg22: memref<8x128xf32, #tpu.memory_space<vmem>>) attributes {dimension_semantics = [#tpu.dimension_semantics<parallel>], iteration_bounds = array<i64: 1>, scalar_prefetch = 0 : i64, scratch_operands = 0 : i64, tpu.core_type = #tpu.core_type<tc>, window_params = [{transform_indices = @transform_0, window_bounds = array<i64: 8, 3072>}, {pipeline_mode = #tpu.pipeline_mode<synchronous>, transform_indices = @transform_1, window_bounds = array<i64: 3072, 128>}, {pipeline_mode = #tpu.pipeline_mode<synchronous>, transform_indices = @transform_2, window_bounds = array<i64: 1, 128>}, {pipeline_mode = #tpu.pipeline_mode<synchronous>, transform_indices = @transform_3, window_bounds = array<i64: 128, 256>}, {pipeline_mode = #tpu.pipeline_mode<synchronous>, transform_indices = @transform_4, window_bounds = array<i64: 1, 256>}, {pipeline_mode = #tpu.pipeline_mode<synchronous>, transform_indices = @transform_5, window_bounds = array<i64: 256, 384>}, {pipeline_mode = #tpu.pipeline_mode<synchronous>, transform_indices = @transform_6, window_bounds = array<i64: 1, 384>}, {pipeline_mode = #tpu.pipeline_mode<synchronous>, transform_indices = @transform_7, window_bounds = array<i64: 384, 384>}, {pipeline_mode = #tpu.pipeline_mode<synchronous>, transform_indices = @transform_8, window_bounds = array<i64: 1, 384>}, {pipeline_mode = #tpu.pipeline_mode<synchronous>, transform_indices = @transform_9, window_bounds = array<i64: 384, 256>}, {pipeline_mode = #tpu.pipeline_mode<synchronous>, transform_indices = @transform_10, window_bounds = array<i64: 1, 256>}, {pipeline_mode = #tpu.pipeline_mode<synchronous>, transform_indices = @transform_11, window_bounds = array<i64: 256, 384>}, {pipeline_mode = #tpu.pipeline_mode<synchronous>, transform_indices = @transform_12, window_bounds = array<i64: 1, 384>}, {pipeline_mode = #tpu.pipeline_mode<synchronous>, transform_indices = @transform_13, window_bounds = array<i64: 384, 128>}, {pipeline_mode = #tpu.pipeline_mode<synchronous>, transform_indices = @transform_14, window_bounds = array<i64: 1, 128>}, {pipeline_mode = #tpu.pipeline_mode<synchronous>, transform_indices = @transform_15, window_bounds = array<i64: 128, 128>}, {pipeline_mode = #tpu.pipeline_mode<synchronous>, transform_indices = @transform_16, window_bounds = array<i64: 1, 128>}, {pipeline_mode = #tpu.pipeline_mode<synchronous>, transform_indices = @transform_17, window_bounds = array<i64: 128, 128>}, {pipeline_mode = #tpu.pipeline_mode<synchronous>, transform_indices = @transform_18, window_bounds = array<i64: 1, 128>}, {pipeline_mode = #tpu.pipeline_mode<synchronous>, transform_indices = @transform_19, window_bounds = array<i64: 128, 128>}, {pipeline_mode = #tpu.pipeline_mode<synchronous>, transform_indices = @transform_20, window_bounds = array<i64: 1, 128>}, {transform_indices = @transform_21, window_bounds = array<i64: 8, 128>}]} {
    %c0 = arith.constant 0 : index
    %c0_0 = arith.constant 0 : index
    %0 = vector.load %arg1[%c0, %c0_0] : memref<8x3072xf32, #tpu.memory_space<vmem>>, vector<8x3072xf32>
    %1 = arith.truncf %0 : vector<8x3072xf32> to vector<8x3072xbf16>
    %c0_1 = arith.constant 0 : index
    %c0_2 = arith.constant 0 : index
    %2 = vector.load %arg2[%c0_1, %c0_2] : memref<3072x128xbf16, #tpu.memory_space<vmem>>, vector<3072x128xbf16>
    %cst = arith.constant dense<0.000000e+00> : vector<8x128xf32>
    %3 = tpu.matmul %1, %2, %cst {dimension_numbers = #tpu.dot_dimension_numbers<[1], [0], [0], [1], [0, 0, 1, 1], [], []>} : vector<8x3072xbf16>, vector<3072x128xbf16>, vector<8x128xf32> -> vector<8x128xf32>
    %c0_3 = arith.constant 0 : index
    %c0_4 = arith.constant 0 : index
    %4 = vector.load %arg3[%c0_3, %c0_4] : memref<1x128xf32, #tpu.memory_space<vmem>>, vector<1x128xf32>
    %5 = vector.broadcast %4 : vector<1x128xf32> to vector<8x128xf32>
    %6 = arith.addf %3, %5 : vector<8x128xf32>
    %cst_5 = arith.constant 0.000000e+00 : f32
    %7 = vector.broadcast %cst_5 : f32 to vector<8x128xf32>
    %8 = arith.maximumf %6, %7 : vector<8x128xf32>
    %9 = arith.truncf %8 : vector<8x128xf32> to vector<8x128xbf16>
    %c0_6 = arith.constant 0 : index
    %c0_7 = arith.constant 0 : index
    %10 = vector.load %arg4[%c0_6, %c0_7] : memref<128x256xbf16, #tpu.memory_space<vmem>>, vector<128x256xbf16>
    %cst_8 = arith.constant dense<0.000000e+00> : vector<8x256xf32>
    %11 = tpu.matmul %9, %10, %cst_8 {dimension_numbers = #tpu.dot_dimension_numbers<[1], [0], [0], [1], [0, 0, 1, 1], [], []>} : vector<8x128xbf16>, vector<128x256xbf16>, vector<8x256xf32> -> vector<8x256xf32>
    %c0_9 = arith.constant 0 : index
    %c0_10 = arith.constant 0 : index
    %12 = vector.load %arg5[%c0_9, %c0_10] : memref<1x256xf32, #tpu.memory_space<vmem>>, vector<1x256xf32>
    %13 = vector.broadcast %12 : vector<1x256xf32> to vector<8x256xf32>
    %14 = arith.addf %11, %13 : vector<8x256xf32>
    %cst_11 = arith.constant 0.000000e+00 : f32
    %15 = vector.broadcast %cst_11 : f32 to vector<8x256xf32>
    %16 = arith.maximumf %14, %15 : vector<8x256xf32>
    %17 = arith.truncf %16 : vector<8x256xf32> to vector<8x256xbf16>
    %c0_12 = arith.constant 0 : index
    %c0_13 = arith.constant 0 : index
    %18 = vector.load %arg6[%c0_12, %c0_13] : memref<256x384xbf16, #tpu.memory_space<vmem>>, vector<256x384xbf16>
    %cst_14 = arith.constant dense<0.000000e+00> : vector<8x384xf32>
    %19 = tpu.matmul %17, %18, %cst_14 {dimension_numbers = #tpu.dot_dimension_numbers<[1], [0], [0], [1], [0, 0, 1, 1], [], []>} : vector<8x256xbf16>, vector<256x384xbf16>, vector<8x384xf32> -> vector<8x384xf32>
    %c0_15 = arith.constant 0 : index
    %c0_16 = arith.constant 0 : index
    %20 = vector.load %arg7[%c0_15, %c0_16] : memref<1x384xf32, #tpu.memory_space<vmem>>, vector<1x384xf32>
    %21 = vector.broadcast %20 : vector<1x384xf32> to vector<8x384xf32>
    %22 = arith.addf %19, %21 : vector<8x384xf32>
    %cst_17 = arith.constant 0.000000e+00 : f32
    %23 = vector.broadcast %cst_17 : f32 to vector<8x384xf32>
    %24 = arith.maximumf %22, %23 : vector<8x384xf32>
    %25 = arith.truncf %24 : vector<8x384xf32> to vector<8x384xbf16>
    %c0_18 = arith.constant 0 : index
    %c0_19 = arith.constant 0 : index
    %26 = vector.load %arg8[%c0_18, %c0_19] : memref<384x384xbf16, #tpu.memory_space<vmem>>, vector<384x384xbf16>
    %cst_20 = arith.constant dense<0.000000e+00> : vector<8x384xf32>
    %27 = tpu.matmul %25, %26, %cst_20 {dimension_numbers = #tpu.dot_dimension_numbers<[1], [0], [0], [1], [0, 0, 1, 1], [], []>} : vector<8x384xbf16>, vector<384x384xbf16>, vector<8x384xf32> -> vector<8x384xf32>
    %c0_21 = arith.constant 0 : index
    %c0_22 = arith.constant 0 : index
    %28 = vector.load %arg9[%c0_21, %c0_22] : memref<1x384xf32, #tpu.memory_space<vmem>>, vector<1x384xf32>
    %29 = vector.broadcast %28 : vector<1x384xf32> to vector<8x384xf32>
    %30 = arith.addf %27, %29 : vector<8x384xf32>
    %cst_23 = arith.constant 0.000000e+00 : f32
    %31 = vector.broadcast %cst_23 : f32 to vector<8x384xf32>
    %32 = arith.maximumf %30, %31 : vector<8x384xf32>
    %33 = arith.truncf %32 : vector<8x384xf32> to vector<8x384xbf16>
    %c0_24 = arith.constant 0 : index
    %c0_25 = arith.constant 0 : index
    %34 = vector.load %arg10[%c0_24, %c0_25] : memref<384x256xbf16, #tpu.memory_space<vmem>>, vector<384x256xbf16>
    %cst_26 = arith.constant dense<0.000000e+00> : vector<8x256xf32>
    %35 = tpu.matmul %33, %34, %cst_26 {dimension_numbers = #tpu.dot_dimension_numbers<[1], [0], [0], [1], [0, 0, 1, 1], [], []>} : vector<8x384xbf16>, vector<384x256xbf16>, vector<8x256xf32> -> vector<8x256xf32>
    %c0_27 = arith.constant 0 : index
    %c0_28 = arith.constant 0 : index
    %36 = vector.load %arg11[%c0_27, %c0_28] : memref<1x256xf32, #tpu.memory_space<vmem>>, vector<1x256xf32>
    %37 = vector.broadcast %36 : vector<1x256xf32> to vector<8x256xf32>
    %38 = arith.addf %35, %37 : vector<8x256xf32>
    %cst_29 = arith.constant 0.000000e+00 : f32
    %39 = vector.broadcast %cst_29 : f32 to vector<8x256xf32>
    %40 = arith.maximumf %38, %39 : vector<8x256xf32>
    %41 = arith.truncf %40 : vector<8x256xf32> to vector<8x256xbf16>
    %c0_30 = arith.constant 0 : index
    %c0_31 = arith.constant 0 : index
    %42 = vector.load %arg12[%c0_30, %c0_31] : memref<256x384xbf16, #tpu.memory_space<vmem>>, vector<256x384xbf16>
    %cst_32 = arith.constant dense<0.000000e+00> : vector<8x384xf32>
    %43 = tpu.matmul %41, %42, %cst_32 {dimension_numbers = #tpu.dot_dimension_numbers<[1], [0], [0], [1], [0, 0, 1, 1], [], []>} : vector<8x256xbf16>, vector<256x384xbf16>, vector<8x384xf32> -> vector<8x384xf32>
    %c0_33 = arith.constant 0 : index
    %c0_34 = arith.constant 0 : index
    %44 = vector.load %arg13[%c0_33, %c0_34] : memref<1x384xf32, #tpu.memory_space<vmem>>, vector<1x384xf32>
    %45 = vector.broadcast %44 : vector<1x384xf32> to vector<8x384xf32>
    %46 = arith.addf %43, %45 : vector<8x384xf32>
    %cst_35 = arith.constant 0.000000e+00 : f32
    %47 = vector.broadcast %cst_35 : f32 to vector<8x384xf32>
    %48 = arith.maximumf %46, %47 : vector<8x384xf32>
    %49 = arith.truncf %48 : vector<8x384xf32> to vector<8x384xbf16>
    %c0_36 = arith.constant 0 : index
    %c0_37 = arith.constant 0 : index
    %50 = vector.load %arg14[%c0_36, %c0_37] : memref<384x128xbf16, #tpu.memory_space<vmem>>, vector<384x128xbf16>
    %cst_38 = arith.constant dense<0.000000e+00> : vector<8x128xf32>
    %51 = tpu.matmul %49, %50, %cst_38 {dimension_numbers = #tpu.dot_dimension_numbers<[1], [0], [0], [1], [0, 0, 1, 1], [], []>} : vector<8x384xbf16>, vector<384x128xbf16>, vector<8x128xf32> -> vector<8x128xf32>
    %c0_39 = arith.constant 0 : index
    %c0_40 = arith.constant 0 : index
    %52 = vector.load %arg15[%c0_39, %c0_40] : memref<1x128xf32, #tpu.memory_space<vmem>>, vector<1x128xf32>
    %53 = vector.broadcast %52 : vector<1x128xf32> to vector<8x128xf32>
    %54 = arith.addf %51, %53 : vector<8x128xf32>
    %cst_41 = arith.constant 0.000000e+00 : f32
    %55 = vector.broadcast %cst_41 : f32 to vector<8x128xf32>
    %56 = arith.maximumf %54, %55 : vector<8x128xf32>
    %57 = arith.truncf %56 : vector<8x128xf32> to vector<8x128xbf16>
    %c0_42 = arith.constant 0 : index
    %c0_43 = arith.constant 0 : index
    %58 = vector.load %arg16[%c0_42, %c0_43] : memref<128x128xbf16, #tpu.memory_space<vmem>>, vector<128x128xbf16>
    %cst_44 = arith.constant dense<0.000000e+00> : vector<8x128xf32>
    %59 = tpu.matmul %57, %58, %cst_44 {dimension_numbers = #tpu.dot_dimension_numbers<[1], [0], [0], [1], [0, 0, 1, 1], [], []>} : vector<8x128xbf16>, vector<128x128xbf16>, vector<8x128xf32> -> vector<8x128xf32>
    %c0_45 = arith.constant 0 : index
    %c0_46 = arith.constant 0 : index
    %60 = vector.load %arg17[%c0_45, %c0_46] : memref<1x128xf32, #tpu.memory_space<vmem>>, vector<1x128xf32>
    %61 = vector.broadcast %60 : vector<1x128xf32> to vector<8x128xf32>
    %62 = arith.addf %59, %61 : vector<8x128xf32>
    %cst_47 = arith.constant 0.000000e+00 : f32
    %63 = vector.broadcast %cst_47 : f32 to vector<8x128xf32>
    %64 = arith.maximumf %62, %63 : vector<8x128xf32>
    %65 = arith.truncf %64 : vector<8x128xf32> to vector<8x128xbf16>
    %c0_48 = arith.constant 0 : index
    %c0_49 = arith.constant 0 : index
    %66 = vector.load %arg18[%c0_48, %c0_49] : memref<128x128xbf16, #tpu.memory_space<vmem>>, vector<128x128xbf16>
    %cst_50 = arith.constant dense<0.000000e+00> : vector<8x128xf32>
    %67 = tpu.matmul %65, %66, %cst_50 {dimension_numbers = #tpu.dot_dimension_numbers<[1], [0], [0], [1], [0, 0, 1, 1], [], []>} : vector<8x128xbf16>, vector<128x128xbf16>, vector<8x128xf32> -> vector<8x128xf32>
    %c0_51 = arith.constant 0 : index
    %c0_52 = arith.constant 0 : index
    %68 = vector.load %arg19[%c0_51, %c0_52] : memref<1x128xf32, #tpu.memory_space<vmem>>, vector<1x128xf32>
    %69 = vector.broadcast %68 : vector<1x128xf32> to vector<8x128xf32>
    %70 = arith.addf %67, %69 : vector<8x128xf32>
    %cst_53 = arith.constant 0.000000e+00 : f32
    %71 = vector.broadcast %cst_53 : f32 to vector<8x128xf32>
    %72 = arith.maximumf %70, %71 : vector<8x128xf32>
    %73 = arith.truncf %72 : vector<8x128xf32> to vector<8x128xbf16>
    %c0_54 = arith.constant 0 : index
    %c0_55 = arith.constant 0 : index
    %74 = vector.load %arg20[%c0_54, %c0_55] : memref<128x128xbf16, #tpu.memory_space<vmem>>, vector<128x128xbf16>
    %cst_56 = arith.constant dense<0.000000e+00> : vector<8x128xf32>
    %75 = tpu.matmul %73, %74, %cst_56 {dimension_numbers = #tpu.dot_dimension_numbers<[1], [0], [0], [1], [0, 0, 1, 1], [], []>} : vector<8x128xbf16>, vector<128x128xbf16>, vector<8x128xf32> -> vector<8x128xf32>
    %c0_57 = arith.constant 0 : index
    %c0_58 = arith.constant 0 : index
    %76 = vector.load %arg21[%c0_57, %c0_58] : memref<1x128xf32, #tpu.memory_space<vmem>>, vector<1x128xf32>
    %77 = vector.broadcast %76 : vector<1x128xf32> to vector<8x128xf32>
    %78 = arith.addf %75, %77 : vector<8x128xf32>
    %c0_59 = arith.constant 0 : index
    %c0_60 = arith.constant 0 : index
    %79 = vector.load %arg22[%c0_59, %c0_60] : memref<8x128xf32, #tpu.memory_space<vmem>>, vector<8x128xf32>
    tpu.vector_store %arg22[%c0_59, %c0_60], %78 {strides = array<i32>} : memref<8x128xf32, #tpu.memory_space<vmem>>, vector<8x128xf32>,
    return
  }
  func.func @transform_0(%arg0: i32) -> (i32, i32) {
    %c0_i32 = arith.constant 0 : i32
    %c0_i32_0 = arith.constant 0 : i32
    return %arg0, %c0_i32 : i32, i32
  }
  func.func @transform_1(%arg0: i32) -> (i32, i32) {
    %c0_i32 = arith.constant 0 : i32
    %c0_i32_0 = arith.constant 0 : i32
    %c0_i32_1 = arith.constant 0 : i32
    return %c0_i32, %c0_i32_0 : i32, i32
  }
  func.func @transform_2(%arg0: i32) -> (i32, i32) {
    %c0_i32 = arith.constant 0 : i32
    %c0_i32_0 = arith.constant 0 : i32
    %c0_i32_1 = arith.constant 0 : i32
    return %c0_i32, %c0_i32_0 : i32, i32
  }
  func.func @transform_3(%arg0: i32) -> (i32, i32) {
    %c0_i32 = arith.constant 0 : i32
    %c0_i32_0 = arith.constant 0 : i32
    %c0_i32_1 = arith.constant 0 : i32
    return %c0_i32, %c0_i32_0 : i32, i32
  }
  func.func @transform_4(%arg0: i32) -> (i32, i32) {
    %c0_i32 = arith.constant 0 : i32
    %c0_i32_0 = arith.constant 0 : i32
    %c0_i32_1 = arith.constant 0 : i32
    return %c0_i32, %c0_i32_0 : i32, i32
  }
  func.func @transform_5(%arg0: i32) -> (i32, i32) {
    %c0_i32 = arith.constant 0 : i32
    %c0_i32_0 = arith.constant 0 : i32
    %c0_i32_1 = arith.constant 0 : i32
    return %c0_i32, %c0_i32_0 : i32, i32
  }
  func.func @transform_6(%arg0: i32) -> (i32, i32) {
    %c0_i32 = arith.constant 0 : i32
    %c0_i32_0 = arith.constant 0 : i32
    %c0_i32_1 = arith.constant 0 : i32
    return %c0_i32, %c0_i32_0 : i32, i32
  }
  func.func @transform_7(%arg0: i32) -> (i32, i32) {
    %c0_i32 = arith.constant 0 : i32
    %c0_i32_0 = arith.constant 0 : i32
    %c0_i32_1 = arith.constant 0 : i32
    return %c0_i32, %c0_i32_0 : i32, i32
  }
  func.func @transform_8(%arg0: i32) -> (i32, i32) {
    %c0_i32 = arith.constant 0 : i32
    %c0_i32_0 = arith.constant 0 : i32
    %c0_i32_1 = arith.constant 0 : i32
    return %c0_i32, %c0_i32_0 : i32, i32
  }
  func.func @transform_9(%arg0: i32) -> (i32, i32) {
    %c0_i32 = arith.constant 0 : i32
    %c0_i32_0 = arith.constant 0 : i32
    %c0_i32_1 = arith.constant 0 : i32
    return %c0_i32, %c0_i32_0 : i32, i32
  }
  func.func @transform_10(%arg0: i32) -> (i32, i32) {
    %c0_i32 = arith.constant 0 : i32
    %c0_i32_0 = arith.constant 0 : i32
    %c0_i32_1 = arith.constant 0 : i32
    return %c0_i32, %c0_i32_0 : i32, i32
  }
  func.func @transform_11(%arg0: i32) -> (i32, i32) {
    %c0_i32 = arith.constant 0 : i32
    %c0_i32_0 = arith.constant 0 : i32
    %c0_i32_1 = arith.constant 0 : i32
    return %c0_i32, %c0_i32_0 : i32, i32
  }
  func.func @transform_12(%arg0: i32) -> (i32, i32) {
    %c0_i32 = arith.constant 0 : i32
    %c0_i32_0 = arith.constant 0 : i32
    %c0_i32_1 = arith.constant 0 : i32
    return %c0_i32, %c0_i32_0 : i32, i32
  }
  func.func @transform_13(%arg0: i32) -> (i32, i32) {
    %c0_i32 = arith.constant 0 : i32
    %c0_i32_0 = arith.constant 0 : i32
    %c0_i32_1 = arith.constant 0 : i32
    return %c0_i32, %c0_i32_0 : i32, i32
  }
  func.func @transform_14(%arg0: i32) -> (i32, i32) {
    %c0_i32 = arith.constant 0 : i32
    %c0_i32_0 = arith.constant 0 : i32
    %c0_i32_1 = arith.constant 0 : i32
    return %c0_i32, %c0_i32_0 : i32, i32
  }
  func.func @transform_15(%arg0: i32) -> (i32, i32) {
    %c0_i32 = arith.constant 0 : i32
    %c0_i32_0 = arith.constant 0 : i32
    %c0_i32_1 = arith.constant 0 : i32
    return %c0_i32, %c0_i32_0 : i32, i32
  }
  func.func @transform_16(%arg0: i32) -> (i32, i32) {
    %c0_i32 = arith.constant 0 : i32
    %c0_i32_0 = arith.constant 0 : i32
    %c0_i32_1 = arith.constant 0 : i32
    return %c0_i32, %c0_i32_0 : i32, i32
  }
  func.func @transform_17(%arg0: i32) -> (i32, i32) {
    %c0_i32 = arith.constant 0 : i32
    %c0_i32_0 = arith.constant 0 : i32
    %c0_i32_1 = arith.constant 0 : i32
    return %c0_i32, %c0_i32_0 : i32, i32
  }
  func.func @transform_18(%arg0: i32) -> (i32, i32) {
    %c0_i32 = arith.constant 0 : i32
    %c0_i32_0 = arith.constant 0 : i32
    %c0_i32_1 = arith.constant 0 : i32
    return %c0_i32, %c0_i32_0 : i32, i32
  }
  func.func @transform_19(%arg0: i32) -> (i32, i32) {
    %c0_i32 = arith.constant 0 : i32
    %c0_i32_0 = arith.constant 0 : i32
    %c0_i32_1 = arith.constant 0 : i32
    return %c0_i32, %c0_i32_0 : i32, i32
  }
  func.func @transform_20(%arg0: i32) -> (i32, i32) {
    %c0_i32 = arith.constant 0 : i32
    %c0_i32_0 = arith.constant 0 : i32
    %c0_i32_1 = arith.constant 0 : i32
    return %c0_i32, %c0_i32_0 : i32, i32
  }
  func.func @transform_21(%arg0: i32) -> (i32, i32) {
    %c0_i32 = arith.constant 0 : i32
    %c0_i32_0 = arith.constant 0 : i32
    return %arg0, %c0_i32 : i32, i32
  }
}

module attributes {stable_mosaic.version = 11 : i64} {
  func.func @dnn7_kernel(%arg0: i32, %arg1: memref<8x3072xf32, #tpu.memory_space<vmem>>, %arg2: memref<3072x128xbf16, #tpu.memory_space<vmem>>, %arg3: memref<1x128xf32, #tpu.memory_space<vmem>>, %arg4: memref<128x256xbf16, #tpu.memory_space<vmem>>, %arg5: memref<1x256xf32, #tpu.memory_space<vmem>>, %arg6: memref<256x384xbf16, #tpu.memory_space<vmem>>, %arg7: memref<1x384xf32, #tpu.memory_space<vmem>>, %arg8: memref<384x384xbf16, #tpu.memory_space<vmem>>, %arg9: memref<1x384xf32, #tpu.memory_space<vmem>>, %arg10: memref<384x256xbf16, #tpu.memory_space<vmem>>, %arg11: memref<1x256xf32, #tpu.memory_space<vmem>>, %arg12: memref<256x384xbf16, #tpu.memory_space<vmem>>, %arg13: memref<1x384xf32, #tpu.memory_space<vmem>>, %arg14: memref<384x128xbf16, #tpu.memory_space<vmem>>, %arg15: memref<1x128xf32, #tpu.memory_space<vmem>>, %arg16: memref<128x128xbf16, #tpu.memory_space<vmem>>, %arg17: memref<1x128xf32, #tpu.memory_space<vmem>>, %arg18: memref<128x128xbf16, #tpu.memory_space<vmem>>, %arg19: memref<1x128xf32, #tpu.memory_space<vmem>>, %arg20: memref<128x128xbf16, #tpu.memory_space<vmem>>, %arg21: memref<1x128xf32, #tpu.memory_space<vmem>>, %arg22: memref<8x128xf32, #tpu.memory_space<vmem>>) attributes {dimension_semantics = [#tpu.dimension_semantics<parallel>], iteration_bounds = array<i64: 1>, scalar_prefetch = 0 : i64, scratch_operands = 0 : i64, tpu.core_type = #tpu.core_type<tc>, window_params = [{transform_indices = @transform_0, window_bounds = array<i64: 8, 3072>}, {pipeline_mode = #tpu.pipeline_mode<synchronous>, transform_indices = @transform_1, window_bounds = array<i64: 3072, 128>}, {pipeline_mode = #tpu.pipeline_mode<synchronous>, transform_indices = @transform_2, window_bounds = array<i64: 1, 128>}, {pipeline_mode = #tpu.pipeline_mode<synchronous>, transform_indices = @transform_3, window_bounds = array<i64: 128, 256>}, {pipeline_mode = #tpu.pipeline_mode<synchronous>, transform_indices = @transform_4, window_bounds = array<i64: 1, 256>}, {pipeline_mode = #tpu.pipeline_mode<synchronous>, transform_indices = @transform_5, window_bounds = array<i64: 256, 384>}, {pipeline_mode = #tpu.pipeline_mode<synchronous>, transform_indices = @transform_6, window_bounds = array<i64: 1, 384>}, {pipeline_mode = #tpu.pipeline_mode<synchronous>, transform_indices = @transform_7, window_bounds = array<i64: 384, 384>}, {pipeline_mode = #tpu.pipeline_mode<synchronous>, transform_indices = @transform_8, window_bounds = array<i64: 1, 384>}, {pipeline_mode = #tpu.pipeline_mode<synchronous>, transform_indices = @transform_9, window_bounds = array<i64: 384, 256>}, {pipeline_mode = #tpu.pipeline_mode<synchronous>, transform_indices = @transform_10, window_bounds = array<i64: 1, 256>}, {pipeline_mode = #tpu.pipeline_mode<synchronous>, transform_indices = @transform_11, window_bounds = array<i64: 256, 384>}, {pipeline_mode = #tpu.pipeline_mode<synchronous>, transform_indices = @transform_12, window_bounds = array<i64: 1, 384>}, {pipeline_mode = #tpu.pipeline_mode<synchronous>, transform_indices = @transform_13, window_bounds = array<i64: 384, 128>}, {pipeline_mode = #tpu.pipeline_mode<synchronous>, transform_indices = @transform_14, window_bounds = array<i64: 1, 128>}, {pipeline_mode = #tpu.pipeline_mode<synchronous>, transform_indices = @transform_15, window_bounds = array<i64: 128, 128>}, {pipeline_mode = #tpu.pipeline_mode<synchronous>, transform_indices = @transform_16, window_bounds = array<i64: 1, 128>}, {pipeline_mode = #tpu.pipeline_mode<synchronous>, transform_indices = @transform_17, window_bounds = array<i64: 128, 128>}, {pipeline_mode = #tpu.pipeline_mode<synchronous>, transform_indices = @transform_18, window_bounds = array<i64: 1, 128>}, {pipeline_mode = #tpu.pipeline_mode<synchronous>, transform_indices = @transform_19, window_bounds = array<i64: 128, 128>}, {pipeline_mode = #tpu.pipeline_mode<synchronous>, transform_indices = @transform_20, window_bounds = array<i64: 1, 128>}, {transform_indices = @transform_21, window_bounds = array<i64: 8, 128>}]} {
    %c0 = arith.constant 0 : index
    %c0_0 = arith.constant 0 : index
    %0 = vector.load %arg1[%c0, %c0_0] : memref<8x3072xf32, #tpu.memory_space<vmem>>, vector<8x3072xf32>
    %1 = arith.truncf %0 : vector<8x3072xf32> to vector<8x3072xbf16>
    %c0_1 = arith.constant 0 : index
    %c0_2 = arith.constant 0 : index
    %2 = vector.load %arg2[%c0_1, %c0_2] : memref<3072x128xbf16, #tpu.memory_space<vmem>>, vector<3072x128xbf16>
    %cst = arith.constant dense<0.000000e+00> : vector<8x128xf32>
    %3 = tpu.matmul %1, %2, %cst {dimension_numbers = #tpu.dot_dimension_numbers<[1], [0], [0], [1], [0, 0, 1, 1], [], []>} : vector<8x3072xbf16>, vector<3072x128xbf16>, vector<8x128xf32> -> vector<8x128xf32>
    %c0_3 = arith.constant 0 : index
    %c0_4 = arith.constant 0 : index
    %4 = vector.load %arg3[%c0_3, %c0_4] : memref<1x128xf32, #tpu.memory_space<vmem>>, vector<1x128xf32>
    %5 = vector.broadcast %4 : vector<1x128xf32> to vector<8x128xf32>
    %6 = arith.addf %3, %5 : vector<8x128xf32>
    %cst_5 = arith.constant 0.000000e+00 : f32
    %7 = vector.broadcast %cst_5 : f32 to vector<8x128xf32>
    %8 = arith.maximumf %6, %7 : vector<8x128xf32>
    %9 = arith.truncf %8 : vector<8x128xf32> to vector<8x128xbf16>
    %c0_6 = arith.constant 0 : index
    %c0_7 = arith.constant 0 : index
    %10 = vector.load %arg4[%c0_6, %c0_7] : memref<128x256xbf16, #tpu.memory_space<vmem>>, vector<128x256xbf16>
    %cst_8 = arith.constant dense<0.000000e+00> : vector<8x256xf32>
    %11 = tpu.matmul %9, %10, %cst_8 {dimension_numbers = #tpu.dot_dimension_numbers<[1], [0], [0], [1], [0, 0, 1, 1], [], []>} : vector<8x128xbf16>, vector<128x256xbf16>, vector<8x256xf32> -> vector<8x256xf32>
    %c0_9 = arith.constant 0 : index
    %c0_10 = arith.constant 0 : index
    %12 = vector.load %arg5[%c0_9, %c0_10] : memref<1x256xf32, #tpu.memory_space<vmem>>, vector<1x256xf32>
    %13 = vector.broadcast %12 : vector<1x256xf32> to vector<8x256xf32>
    %14 = arith.addf %11, %13 : vector<8x256xf32>
    %cst_11 = arith.constant 0.000000e+00 : f32
    %15 = vector.broadcast %cst_11 : f32 to vector<8x256xf32>
    %16 = arith.maximumf %14, %15 : vector<8x256xf32>
    %17 = arith.truncf %16 : vector<8x256xf32> to vector<8x256xbf16>
    %c0_12 = arith.constant 0 : index
    %c0_13 = arith.constant 0 : index
    %18 = vector.load %arg6[%c0_12, %c0_13] : memref<256x384xbf16, #tpu.memory_space<vmem>>, vector<256x384xbf16>
    %cst_14 = arith.constant dense<0.000000e+00> : vector<8x384xf32>
    %19 = tpu.matmul %17, %18, %cst_14 {dimension_numbers = #tpu.dot_dimension_numbers<[1], [0], [0], [1], [0, 0, 1, 1], [], []>} : vector<8x256xbf16>, vector<256x384xbf16>, vector<8x384xf32> -> vector<8x384xf32>
    %c0_15 = arith.constant 0 : index
    %c0_16 = arith.constant 0 : index
    %20 = vector.load %arg7[%c0_15, %c0_16] : memref<1x384xf32, #tpu.memory_space<vmem>>, vector<1x384xf32>
    %21 = vector.broadcast %20 : vector<1x384xf32> to vector<8x384xf32>
    %22 = arith.addf %19, %21 : vector<8x384xf32>
    %cst_17 = arith.constant 0.000000e+00 : f32
    %23 = vector.broadcast %cst_17 : f32 to vector<8x384xf32>
    %24 = arith.maximumf %22, %23 : vector<8x384xf32>
    %25 = arith.truncf %24 : vector<8x384xf32> to vector<8x384xbf16>
    %c0_18 = arith.constant 0 : index
    %c0_19 = arith.constant 0 : index
    %26 = vector.load %arg8[%c0_18, %c0_19] : memref<384x384xbf16, #tpu.memory_space<vmem>>, vector<384x384xbf16>
    %cst_20 = arith.constant dense<0.000000e+00> : vector<8x384xf32>
    %27 = tpu.matmul %25, %26, %cst_20 {dimension_numbers = #tpu.dot_dimension_numbers<[1], [0], [0], [1], [0, 0, 1, 1], [], []>} : vector<8x384xbf16>, vector<384x384xbf16>, vector<8x384xf32> -> vector<8x384xf32>
    %c0_21 = arith.constant 0 : index
    %c0_22 = arith.constant 0 : index
    %28 = vector.load %arg9[%c0_21, %c0_22] : memref<1x384xf32, #tpu.memory_space<vmem>>, vector<1x384xf32>
    %29 = vector.broadcast %28 : vector<1x384xf32> to vector<8x384xf32>
    %30 = arith.addf %27, %29 : vector<8x384xf32>
    %cst_23 = arith.constant 0.000000e+00 : f32
    %31 = vector.broadcast %cst_23 : f32 to vector<8x384xf32>
    %32 = arith.maximumf %30, %31 : vector<8x384xf32>
    %33 = arith.truncf %32 : vector<8x384xf32> to vector<8x384xbf16>
    %c0_24 = arith.constant 0 : index
    %c0_25 = arith.constant 0 : index
    %34 = vector.load %arg10[%c0_24, %c0_25] : memref<384x256xbf16, #tpu.memory_space<vmem>>, vector<384x256xbf16>
    %cst_26 = arith.constant dense<0.000000e+00> : vector<8x256xf32>
    %35 = tpu.matmul %33, %34, %cst_26 {dimension_numbers = #tpu.dot_dimension_numbers<[1], [0], [0], [1], [0, 0, 1, 1], [], []>} : vector<8x384xbf16>, vector<384x256xbf16>, vector<8x256xf32> -> vector<8x256xf32>
    %c0_27 = arith.constant 0 : index
    %c0_28 = arith.constant 0 : index
    %36 = vector.load %arg11[%c0_27, %c0_28] : memref<1x256xf32, #tpu.memory_space<vmem>>, vector<1x256xf32>
    %37 = vector.broadcast %36 : vector<1x256xf32> to vector<8x256xf32>
    %38 = arith.addf %35, %37 : vector<8x256xf32>
    %cst_29 = arith.constant 0.000000e+00 : f32
    %39 = vector.broadcast %cst_29 : f32 to vector<8x256xf32>
    %40 = arith.maximumf %38, %39 : vector<8x256xf32>
    %41 = arith.truncf %40 : vector<8x256xf32> to vector<8x256xbf16>
    %c0_30 = arith.constant 0 : index
    %c0_31 = arith.constant 0 : index
    %42 = vector.load %arg12[%c0_30, %c0_31] : memref<256x384xbf16, #tpu.memory_space<vmem>>, vector<256x384xbf16>
    %cst_32 = arith.constant dense<0.000000e+00> : vector<8x384xf32>
    %43 = tpu.matmul %41, %42, %cst_32 {dimension_numbers = #tpu.dot_dimension_numbers<[1], [0], [0], [1], [0, 0, 1, 1], [], []>} : vector<8x256xbf16>, vector<256x384xbf16>, vector<8x384xf32> -> vector<8x384xf32>
    %c0_33 = arith.constant 0 : index
    %c0_34 = arith.constant 0 : index
    %44 = vector.load %arg13[%c0_33, %c0_34] : memref<1x384xf32, #tpu.memory_space<vmem>>, vector<1x384xf32>
    %45 = vector.broadcast %44 : vector<1x384xf32> to vector<8x384xf32>
    %46 = arith.addf %43, %45 : vector<8x384xf32>
    %cst_35 = arith.constant 0.000000e+00 : f32
    %47 = vector.broadcast %cst_35 : f32 to vector<8x384xf32>
    %48 = arith.maximumf %46, %47 : vector<8x384xf32>
    %49 = arith.truncf %48 : vector<8x384xf32> to vector<8x384xbf16>
    %c0_36 = arith.constant 0 : index
    %c0_37 = arith.constant 0 : index
    %50 = vector.load %arg14[%c0_36, %c0_37] : memref<384x128xbf16, #tpu.memory_space<vmem>>, vector<384x128xbf16>
    %cst_38 = arith.constant dense<0.000000e+00> : vector<8x128xf32>
    %51 = tpu.matmul %49, %50, %cst_38 {dimension_numbers = #tpu.dot_dimension_numbers<[1], [0], [0], [1], [0, 0, 1, 1], [], []>} : vector<8x384xbf16>, vector<384x128xbf16>, vector<8x128xf32> -> vector<8x128xf32>
    %c0_39 = arith.constant 0 : index
    %c0_40 = arith.constant 0 : index
    %52 = vector.load %arg15[%c0_39, %c0_40] : memref<1x128xf32, #tpu.memory_space<vmem>>, vector<1x128xf32>
    %53 = vector.broadcast %52 : vector<1x128xf32> to vector<8x128xf32>
    %54 = arith.addf %51, %53 : vector<8x128xf32>
    %cst_41 = arith.constant 0.000000e+00 : f32
    %55 = vector.broadcast %cst_41 : f32 to vector<8x128xf32>
    %56 = arith.maximumf %54, %55 : vector<8x128xf32>
    %57 = arith.truncf %56 : vector<8x128xf32> to vector<8x128xbf16>
    %c0_42 = arith.constant 0 : index
    %c0_43 = arith.constant 0 : index
    %58 = vector.load %arg16[%c0_42, %c0_43] : memref<128x128xbf16, #tpu.memory_space<vmem>>, vector<128x128xbf16>
    %cst_44 = arith.constant dense<0.000000e+00> : vector<8x128xf32>
    %59 = tpu.matmul %57, %58, %cst_44 {dimension_numbers = #tpu.dot_dimension_numbers<[1], [0], [0], [1], [0, 0, 1, 1], [], []>} : vector<8x128xbf16>, vector<128x128xbf16>, vector<8x128xf32> -> vector<8x128xf32>
    %c0_45 = arith.constant 0 : index
    %c0_46 = arith.constant 0 : index
    %60 = vector.load %arg17[%c0_45, %c0_46] : memref<1x128xf32, #tpu.memory_space<vmem>>, vector<1x128xf32>
    %61 = vector.broadcast %60 : vector<1x128xf32> to vector<8x128xf32>
    %62 = arith.addf %59, %61 : vector<8x128xf32>
    %cst_47 = arith.constant 0.000000e+00 : f32
    %63 = vector.broadcast %cst_47 : f32 to vector<8x128xf32>
    %64 = arith.maximumf %62, %63 : vector<8x128xf32>
    %65 = arith.truncf %64 : vector<8x128xf32> to vector<8x128xbf16>
    %c0_48 = arith.constant 0 : index
    %c0_49 = arith.constant 0 : index
    %66 = vector.load %arg18[%c0_48, %c0_49] : memref<128x128xbf16, #tpu.memory_space<vmem>>, vector<128x128xbf16>
    %cst_50 = arith.constant dense<0.000000e+00> : vector<8x128xf32>
    %67 = tpu.matmul %65, %66, %cst_50 {dimension_numbers = #tpu.dot_dimension_numbers<[1], [0], [0], [1], [0, 0, 1, 1], [], []>} : vector<8x128xbf16>, vector<128x128xbf16>, vector<8x128xf32> -> vector<8x128xf32>
    %c0_51 = arith.constant 0 : index
    %c0_52 = arith.constant 0 : index
    %68 = vector.load %arg19[%c0_51, %c0_52] : memref<1x128xf32, #tpu.memory_space<vmem>>, vector<1x128xf32>
    %69 = vector.broadcast %68 : vector<1x128xf32> to vector<8x128xf32>
    %70 = arith.addf %67, %69 : vector<8x128xf32>
    %cst_53 = arith.constant 0.000000e+00 : f32
    %71 = vector.broadcast %cst_53 : f32 to vector<8x128xf32>
    %72 = arith.maximumf %70, %71 : vector<8x128xf32>
    %73 = arith.truncf %72 : vector<8x128xf32> to vector<8x128xbf16>
    %c0_54 = arith.constant 0 : index
    %c0_55 = arith.constant 0 : index
    %74 = vector.load %arg20[%c0_54, %c0_55] : memref<128x128xbf16, #tpu.memory_space<vmem>>, vector<128x128xbf16>
    %cst_56 = arith.constant dense<0.000000e+00> : vector<8x128xf32>
    %75 = tpu.matmul %73, %74, %cst_56 {dimension_numbers = #tpu.dot_dimension_numbers<[1], [0], [0], [1], [0, 0, 1, 1], [], []>} : vector<8x128xbf16>, vector<128x128xbf16>, vector<8x128xf32> -> vector<8x128xf32>
    %c0_57 = arith.constant 0 : index
    %c0_58 = arith.constant 0 : index
    %76 = vector.load %arg21[%c0_57, %c0_58] : memref<1x128xf32, #tpu.memory_space<vmem>>, vector<1x128xf32>
    %77 = vector.broadcast %76 : vector<1x128xf32> to vector<8x128xf32>
    %78 = arith.addf %75, %77 : vector<8x128xf32>
    %c0_59 = arith.constant 0 : index
    %c0_60 = arith.constant 0 : index
    %79 = vector.load %arg22[%c0_59, %c0_60] : memref<8x128xf32, #tpu.memory_space<vmem>>, vector<8x128xf32>
    tpu.vector_store %arg22[%c0_59, %c0_60], %78 {strides = array<i32>} : memref<8x128xf32, #tpu.memory_space<vmem>>, vector<8x128xf32>,
    return
  }
  func.func @transform_0(%arg0: i32) -> (i32, i32) {
    %c0_i32 = arith.constant 0 : i32
    %c0_i32_0 = arith.constant 0 : i32
    return %arg0, %c0_i32 : i32, i32
  }
  func.func @transform_1(%arg0: i32) -> (i32, i32) {
    %c0_i32 = arith.constant 0 : i32
    %c0_i32_0 = arith.constant 0 : i32
    %c0_i32_1 = arith.constant 0 : i32
    return %c0_i32, %c0_i32_0 : i32, i32
  }
  func.func @transform_2(%arg0: i32) -> (i32, i32) {
    %c0_i32 = arith.constant 0 : i32
    %c0_i32_0 = arith.constant 0 : i32
    %c0_i32_1 = arith.constant 0 : i32
    return %c0_i32, %c0_i32_0 : i32, i32
  }
  func.func @transform_3(%arg0: i32) -> (i32, i32) {
    %c0_i32 = arith.constant 0 : i32
    %c0_i32_0 = arith.constant 0 : i32
    %c0_i32_1 = arith.constant 0 : i32
    return %c0_i32, %c0_i32_0 : i32, i32
  }
  func.func @transform_4(%arg0: i32) -> (i32, i32) {
    %c0_i32 = arith.constant 0 : i32
    %c0_i32_0 = arith.constant 0 : i32
    %c0_i32_1 = arith.constant 0 : i32
    return %c0_i32, %c0_i32_0 : i32, i32
  }
  func.func @transform_5(%arg0: i32) -> (i32, i32) {
    %c0_i32 = arith.constant 0 : i32
    %c0_i32_0 = arith.constant 0 : i32
    %c0_i32_1 = arith.constant 0 : i32
    return %c0_i32, %c0_i32_0 : i32, i32
  }
  func.func @transform_6(%arg0: i32) -> (i32, i32) {
    %c0_i32 = arith.constant 0 : i32
    %c0_i32_0 = arith.constant 0 : i32
    %c0_i32_1 = arith.constant 0 : i32
    return %c0_i32, %c0_i32_0 : i32, i32
  }
  func.func @transform_7(%arg0: i32) -> (i32, i32) {
    %c0_i32 = arith.constant 0 : i32
    %c0_i32_0 = arith.constant 0 : i32
    %c0_i32_1 = arith.constant 0 : i32
    return %c0_i32, %c0_i32_0 : i32, i32
  }
  func.func @transform_8(%arg0: i32) -> (i32, i32) {
    %c0_i32 = arith.constant 0 : i32
    %c0_i32_0 = arith.constant 0 : i32
    %c0_i32_1 = arith.constant 0 : i32
    return %c0_i32, %c0_i32_0 : i32, i32
  }
  func.func @transform_9(%arg0: i32) -> (i32, i32) {
    %c0_i32 = arith.constant 0 : i32
    %c0_i32_0 = arith.constant 0 : i32
    %c0_i32_1 = arith.constant 0 : i32
    return %c0_i32, %c0_i32_0 : i32, i32
  }
  func.func @transform_10(%arg0: i32) -> (i32, i32) {
    %c0_i32 = arith.constant 0 : i32
    %c0_i32_0 = arith.constant 0 : i32
    %c0_i32_1 = arith.constant 0 : i32
    return %c0_i32, %c0_i32_0 : i32, i32
  }
  func.func @transform_11(%arg0: i32) -> (i32, i32) {
    %c0_i32 = arith.constant 0 : i32
    %c0_i32_0 = arith.constant 0 : i32
    %c0_i32_1 = arith.constant 0 : i32
    return %c0_i32, %c0_i32_0 : i32, i32
  }
  func.func @transform_12(%arg0: i32) -> (i32, i32) {
    %c0_i32 = arith.constant 0 : i32
    %c0_i32_0 = arith.constant 0 : i32
    %c0_i32_1 = arith.constant 0 : i32
    return %c0_i32, %c0_i32_0 : i32, i32
  }
  func.func @transform_13(%arg0: i32) -> (i32, i32) {
    %c0_i32 = arith.constant 0 : i32
    %c0_i32_0 = arith.constant 0 : i32
    %c0_i32_1 = arith.constant 0 : i32
    return %c0_i32, %c0_i32_0 : i32, i32
  }
  func.func @transform_14(%arg0: i32) -> (i32, i32) {
    %c0_i32 = arith.constant 0 : i32
    %c0_i32_0 = arith.constant 0 : i32
    %c0_i32_1 = arith.constant 0 : i32
    return %c0_i32, %c0_i32_0 : i32, i32
  }
  func.func @transform_15(%arg0: i32) -> (i32, i32) {
    %c0_i32 = arith.constant 0 : i32
    %c0_i32_0 = arith.constant 0 : i32
    %c0_i32_1 = arith.constant 0 : i32
    return %c0_i32, %c0_i32_0 : i32, i32
  }
  func.func @transform_16(%arg0: i32) -> (i32, i32) {
    %c0_i32 = arith.constant 0 : i32
    %c0_i32_0 = arith.constant 0 : i32
    %c0_i32_1 = arith.constant 0 : i32
    return %c0_i32, %c0_i32_0 : i32, i32
  }
  func.func @transform_17(%arg0: i32) -> (i32, i32) {
    %c0_i32 = arith.constant 0 : i32
    %c0_i32_0 = arith.constant 0 : i32
    %c0_i32_1 = arith.constant 0 : i32
    return %c0_i32, %c0_i32_0 : i32, i32
  }
  func.func @transform_18(%arg0: i32) -> (i32, i32) {
    %c0_i32 = arith.constant 0 : i32
    %c0_i32_0 = arith.constant 0 : i32
    %c0_i32_1 = arith.constant 0 : i32
    return %c0_i32, %c0_i32_0 : i32, i32
  }
  func.func @transform_19(%arg0: i32) -> (i32, i32) {
    %c0_i32 = arith.constant 0 : i32
    %c0_i32_0 = arith.constant 0 : i32
    %c0_i32_1 = arith.constant 0 : i32
    return %c0_i32, %c0_i32_0 : i32, i32
  }
  func.func @transform_20(%arg0: i32) -> (i32, i32) {
    %c0_i32 = arith.constant 0 : i32
    %c0_i32_0 = arith.constant 0 : i32
    %c0_i32_1 = arith.constant 0 : i32
    return %c0_i32, %c0_i32_0 : i32, i32
  }
  func.func @transform_21(%arg0: i32) -> (i32, i32) {
    %c0_i32 = arith.constant 0 : i32
    %c0_i32_0 = arith.constant 0 : i32
    return %arg0, %c0_i32 : i32, i32
  }
}

</mosaic_0001>

<bundles_post_ra>
// kernel: fwd.1
= control target key start
LH: loop header
LB: loop body
LE: loop exit
PB: predicated region body
PF: predicated region fallthrough
CT: control target
= control target key end

     0   :  { %s7605_s0 = inlined_call_operand.vmem [shape: f32[2,3072], index: 0, kind: input, shape index: {}]   ;;  %s7606_s1 = inlined_call_operand.hbm [shape: bf16[3072,128], index: 1, kind: input, shape index: {}]   ;;  %s7607_s2 = inlined_call_operand.vmem [shape: f32[1,128], index: 2, kind: input, shape index: {}]   ;;  %s7608_s3 = inlined_call_operand.hbm [shape: bf16[128,256], index: 3, kind: input, shape index: {}]   ;;  %s7609_s4 = inlined_call_operand.vmem [shape: f32[1,256], index: 4, kind: input, shape index: {}]   ;;  %s7610_s5 = inlined_call_operand.hbm [shape: bf16[256,384], index: 5, kind: input, shape index: {}]   ;;  %s7611_s6 = inlined_call_operand.vmem [shape: f32[1,384], index: 6, kind: input, shape index: {}]   ;;  %s7612_s7 = inlined_call_operand.hbm [shape: bf16[384,384], index: 7, kind: input, shape index: {}]   ;;  %s7613_s8 = inlined_call_operand.vmem [shape: f32[1,384], index: 8, kind: input, shape index: {}]   ;;  %s7614_s9 = inlined_call_operand.hbm [shape: bf16[384,256], index: 9, kind: input, shape index: {}]   ;;  %s7615_s10 = inlined_call_operand.vmem [shape: f32[1,256], index: 10, kind: input, shape index: {}]   ;;  %s7616_s11 = inlined_call_operand.hbm [shape: bf16[256,384], index: 11, kind: input, shape index: {}]   ;;  %s7617_s12 = inlined_call_operand.vmem [shape: f32[1,384], index: 12, kind: input, shape index: {}]   ;;  %s7618_s13 = inlined_call_operand.vmem [shape: bf16[384,128], index: 13, kind: input, shape index: {}]   ;;  %s7619_s14 = inlined_call_operand.vmem [shape: f32[1,128], index: 14, kind: input, shape index: {}]   ;;  %s7620_s15 = inlined_call_operand.vmem [shape: bf16[128,128], index: 15, kind: input, shape index: {}]   ;;  %s7621_s16 = inlined_call_operand.vmem [shape: f32[1,128], index: 16, kind: input, shape index: {}]   ;;  %s7622_s17 = inlined_call_operand.hbm [shape: bf16[128,128], index: 17, kind: input, shape index: {}]   ;;  %s7623_s18 = inlined_call_operand.vmem [shape: f32[1,128], index: 18, kind: input, shape index: {}]   ;;  %s7624_s19 = inlined_call_operand.hbm [shape: bf16[128,128], index: 19, kind: input, shape index: {}]   ;;  %s7625_s20 = inlined_call_operand.vmem [shape: f32[1,128], index: 20, kind: input, shape index: {}]   ;;  %s7626_s21 = inlined_call_operand.hbm [shape: f32[2,128], index: 21, kind: output, shape index: {}]  }
   0x1   :  { %7635 = sst [smem:[#allocation23_spill]] %s7605_s0 }
   0x2   :  { %7636 = sst [smem:[#allocation24_spill]] %s7606_s1 }
   0x3   :  { %7637 = sst [smem:[#allocation25_spill]] %s7607_s2 }
   0x4   :  { %7638 = sst [smem:[#allocation26_spill]] %s7608_s3 }
   0x5   :  { %7639 = sst [smem:[#allocation27_spill]] %s7609_s4 }
   0x6   :  { %7640 = sst [smem:[#allocation28_spill]] %s7610_s5 }
   0x7   :  { %7641 = sst [smem:[#allocation29_spill]] %s7625_s20 }
   0x8   :  { %7642 = sst [smem:[#allocation30_spill]] %s7626_s21 }
   0x9   :  { %26 = vsyncpa [#allocation3], 0 }
   0xa   :  { %27 = vsyncpa [#allocation6], 0 }
   0xb   :  { %28 = vsyncpa [#allocation9], 0 }
   0xc   :  { %29 = vsyncpa [#allocation12], 0 }
   0xd   :  { %30 = vsyncpa [#allocation15], 0 }
   0xe   :  { %31 = vsyncpa [#allocation4], 0  ;;  %s7021_s2 = smov [#allocation5]   ;;  %s7643_s3 = sld [smem:[#allocation26_spill]] }
   0xf   :  { %s53_s25 = sshll.u32 %s7021_s2, 4  ;;  %s54_s25 = int_to_ptr.vmem [resolvable:$true] %s53_s25 }
  0x14   :  { %s6811_s28 = scalar_lea.hbm %s7643_s3, 2048 }
  0x15   :  { %p6812_p0 = scmp.ne.s32.totalorder %s7643_s3, %s6811_s28  ;;  %p6815_p1 = scmp.lt.u32.totalorder %s6811_s28, %s7643_s3 }
  0x17   :  { %p6817_p2 = pnand %p6815_p1, %p6812_p0 }
  0x19   :  { %6820 = shalt.err (!%p6817_p2)
}
  0x1a   :  { %s6821_s5 = scalar_lea.vmem %s54_s25, 2048  ;;  %p6826_p4 = scmp.lt.s32.totalorder %s54_s25, %s54_s25 }
  0x1b   :  { %p6822_p3 = scmp.ne.s32.totalorder %s54_s25, %s6821_s5  ;;  %p6827_p5 = scmp.lt.s32.totalorder %s6821_s5, %s6821_s5 }
  0x1d   :  { %p6828_p6 = por %p6827_p5, %p6826_p4 }
  0x1f   :  { %p6829_p7 = pnand %p6828_p6, %p6822_p3 }
  0x21   :  { %6832 = shalt.err (!%p6829_p7)
}
  0x22   :  { %s7632_s22 = smov 128   ;;  %s7633_s23 = smov 8  }
  0x23   :  { %59 = dma.hbm_to_vmem [thread:$0]  %s7643_s3, 2048, %s54_s25, [#allocation6], %s7632_s22, %s7632_s22, %s7633_s23  }
  0x24   :  { %s7024_s2 = smov [#allocation8]   ;;  %s7025_s27 = smov [#allocation11]  }
  0x25   :  { %s81_s26 = sshll.u32 %s7024_s2, 4  ;;  %s109_s28 = sshll.u32 %s7025_s27, 4  ;;  %s82_s26 = int_to_ptr.vmem [resolvable:$true] %s81_s26  ;;  %s110_s28 = int_to_ptr.vmem [resolvable:$true] %s109_s28 }
  0x26   :  { %s6833_s4 = scalar_lea.hbm %s7612_s7, 9216 }
  0x27   :  { %p6834_p8 = scmp.ne.s32.totalorder %s7612_s7, %s6833_s4  ;;  %p6837_p9 = scmp.lt.u32.totalorder %s6833_s4, %s7612_s7 }
  0x29   :  { %p6839_p10 = pnand %p6837_p9, %p6834_p8 }
  0x2b   :  { %6842 = shalt.err (!%p6839_p10)
}
  0x2c   :  { %s6843_s25 = scalar_lea.vmem %s82_s26, 9216  ;;  %p6848_p12 = scmp.lt.s32.totalorder %s82_s26, %s82_s26 }
  0x2d   :  { %p6844_p11 = scmp.ne.s32.totalorder %s82_s26, %s6843_s25  ;;  %p6849_p13 = scmp.lt.s32.totalorder %s6843_s25, %s6843_s25 }
  0x2f   :  { %p6850_p0 = por %p6849_p13, %p6848_p12 }
  0x31   :  { %p6851_p1 = pnand %p6850_p0, %p6844_p11 }
  0x33   :  { %6854 = shalt.err (!%p6851_p1)
}
  0x34   :  { %s7634_s3 = smov 192   ;;  %s7027_s1 = smov 12  }
  0x35   :  { %87 = dma.hbm_to_vmem [thread:$0]  %s7612_s7, 9216, %s82_s26, [#allocation9], %s7634_s3, %s7634_s3, %s7027_s1  }
  0x36   :  { %s6855_s27 = scalar_lea.hbm %s7616_s11, 6144 }
  0x37   :  { %p6856_p2 = scmp.ne.s32.totalorder %s7616_s11, %s6855_s27  ;;  %p6859_p3 = scmp.lt.u32.totalorder %s6855_s27, %s7616_s11 }
  0x39   :  { %p6861_p4 = pnand %p6859_p3, %p6856_p2 }
  0x3b   :  { %6864 = shalt.err (!%p6861_p4)
}
  0x3c   :  { %s6865_s5 = scalar_lea.vmem %s110_s28, 6144  ;;  %p6870_p6 = scmp.lt.s32.totalorder %s110_s28, %s110_s28 }
  0x3d   :  { %p6866_p5 = scmp.ne.s32.totalorder %s110_s28, %s6865_s5  ;;  %p6871_p7 = scmp.lt.s32.totalorder %s6865_s5, %s6865_s5 }
  0x3f   :  { %p6872_p8 = por %p6871_p7, %p6870_p6 }
  0x41   :  { %p6873_p9 = pnand %p6872_p8, %p6866_p5 }
  0x43   :  { %6876 = shalt.err (!%p6873_p9)
}
  0x44   :  { %115 = dma.hbm_to_vmem [thread:$0]  %s7616_s11, 6144, %s110_s28, [#allocation12], %s7634_s3, %s7634_s3, %s7027_s1  }
  0x45   :  { %s7028_s25 = smov [#allocation2]   ;;  %s7644_s21 = sld [smem:[#allocation24_spill]] }
  0x46   :  { %s39_s24 = sshll.u32 %s7028_s25, 4  ;;  %s40_s24 = int_to_ptr.vmem [resolvable:$true] %s39_s24 }
  0x4b   :  { %s6877_s27 = scalar_lea.hbm %s7644_s21, 24576 }
  0x4c   :  { %p6878_p10 = scmp.ne.s32.totalorder %s7644_s21, %s6877_s27  ;;  %p6881_p11 = scmp.lt.u32.totalorder %s6877_s27, %s7644_s21 }
  0x4e   :  { %p6883_p12 = pnand %p6881_p11, %p6878_p10 }
  0x50   :  { %6886 = shalt.err (!%p6883_p12)
}
  0x51   :  { %s6887_s5 = scalar_lea.vmem %s40_s24, 24576  ;;  %p6892_p0 = scmp.lt.s32.totalorder %s40_s24, %s40_s24 }
  0x52   :  { %p6888_p13 = scmp.ne.s32.totalorder %s40_s24, %s6887_s5  ;;  %p6893_p1 = scmp.lt.s32.totalorder %s6887_s5, %s6887_s5 }
  0x54   :  { %p6894_p2 = por %p6893_p1, %p6892_p0 }
  0x56   :  { %p6895_p3 = pnand %p6894_p2, %p6888_p13 }
  0x58   :  { %6898 = shalt.err (!%p6895_p3)
}
  0x59   :  { %s7029_s11 = smov 64   ;;  %s7030_s28 = smov 4  }
  0x5a   :  { %45 = dma.hbm_to_vmem [thread:$0]  %s7644_s21, 24576, %s40_s24, [#allocation3], %s7029_s11, %s7029_s11, %s7030_s28  }
  0x5b   :  { %s7031_s25 = smov [#allocation7]   ;;  %s7032_s20 = smov [#allocation10]  }
  0x5c   :  { %s67_s2 = sshll.u32 %s7031_s25, 4  ;;  %s95_s27 = sshll.u32 %s7032_s20, 4  ;;  %s68_s2 = int_to_ptr.vmem [resolvable:$true] %s67_s2  ;;  %s7212_s27 = int_to_ptr.vmem [resolvable:$true] %s95_s27 }
  0x5d   :  { %s7645_s4 = sld [smem:[#allocation28_spill]] }
  0x63   :  { %s6899_s30 = scalar_lea.hbm %s7645_s4, 6144 }
  0x64   :  { %p6900_p4 = scmp.ne.s32.totalorder %s7645_s4, %s6899_s30  ;;  %p6903_p5 = scmp.lt.u32.totalorder %s6899_s30, %s7645_s4 }
  0x66   :  { %p6905_p6 = pnand %p6903_p5, %p6900_p4 }
  0x68   :  { %6908 = shalt.err (!%p6905_p6)
}
  0x69   :  { %s6909_s24 = scalar_lea.vmem %s68_s2, 6144  ;;  %p6914_p8 = scmp.lt.s32.totalorder %s68_s2, %s68_s2 }
  0x6a   :  { %p6910_p7 = scmp.ne.s32.totalorder %s68_s2, %s6909_s24  ;;  %p6915_p9 = scmp.lt.s32.totalorder %s6909_s24, %s6909_s24 }
  0x6c   :  { %p6916_p10 = por %p6915_p9, %p6914_p8 }
  0x6e   :  { %p6917_p11 = pnand %p6916_p10, %p6910_p7 }
  0x70   :  { %6920 = shalt.err (!%p6917_p11)
}
  0x71   :  { %s7646_s21 = smov 192   ;;  %s6921_s23 = scalar_lea.hbm %s7614_s9, 6144 }
  0x72   :  { %73 = dma.hbm_to_vmem [thread:$0]  %s7645_s4, 6144, %s68_s2, [#allocation6], %s7646_s21, %s7646_s21, %s7027_s1  }
  0x73   :  { %p6922_p12 = scmp.ne.s32.totalorder %s7614_s9, %s6921_s23  ;;  %p6925_p13 = scmp.lt.u32.totalorder %s6921_s23, %s7614_s9 }
  0x75   :  { %p6927_p0 = pnand %p6925_p13, %p6922_p12 }
  0x77   :  { %6930 = shalt.err (!%p6927_p0)
}
  0x78   :  { %s6931_s30 = scalar_lea.vmem %s7212_s27, 6144  ;;  %p6936_p2 = scmp.lt.s32.totalorder %s7212_s27, %s7212_s27 }
  0x79   :  { %p6932_p1 = scmp.ne.s32.totalorder %s7212_s27, %s6931_s30  ;;  %p6937_p3 = scmp.lt.s32.totalorder %s6931_s30, %s6931_s30 }
  0x7b   :  { %p6938_p4 = por %p6937_p3, %p6936_p2 }
  0x7d   :  { %p6939_p5 = pnand %p6938_p4, %p6932_p1 }
  0x7f   :  { %6942 = shalt.err (!%p6939_p5)
}
  0x80   :  { %s7647_s1 = smov 8   ;;  %s7648_s2 = smov 128  }
  0x81   :  { %101 = dma.hbm_to_vmem [thread:$0]  %s7614_s9, 6144, %s7212_s27, [#allocation9], %s7648_s2, %s7648_s2, %s7647_s1  }
  0x82   :  { %s7033_s24 = smov [#allocation13]   ;;  %s7034_s7 = smov [#allocation14]  }
  0x83   :  { %s131_s21 = sshll.u32 %s7033_s24, 4  ;;  %s145_s26 = sshll.u32 %s7034_s7, 4  ;;  %s132_s21 = int_to_ptr.vmem [resolvable:$true] %s131_s21  ;;  %s7249_s26 = int_to_ptr.vmem [resolvable:$true] %s145_s26 }
  0x84   :  { %s6943_s23 = scalar_lea.hbm %s7622_s17, 1024 }
  0x85   :  { %p6944_p6 = scmp.ne.s32.totalorder %s7622_s17, %s6943_s23  ;;  %p6947_p7 = scmp.lt.u32.totalorder %s6943_s23, %s7622_s17 }
  0x87   :  { %p6949_p8 = pnand %p6947_p7, %p6944_p6 }
  0x89   :  { %6952 = shalt.err (!%p6949_p8)
}
  0x8a   :  { %s6953_s9 = scalar_lea.vmem %s132_s21, 1024  ;;  %p6958_p10 = scmp.lt.s32.totalorder %s132_s21, %s132_s21 }
  0x8b   :  { %p6954_p9 = scmp.ne.s32.totalorder %s132_s21, %s6953_s9  ;;  %p6959_p11 = scmp.lt.s32.totalorder %s6953_s9, %s6953_s9 }
  0x8d   :  { %p6960_p12 = por %p6959_p11, %p6958_p10 }
  0x8f   :  { %p6961_p13 = pnand %p6960_p12, %p6954_p9 }
  0x91   :  { %6964 = shalt.err (!%p6961_p13)
}
  0x92   :  { %137 = dma.hbm_to_vmem [thread:$0]  %s7622_s17, 1024, %s132_s21, [#allocation12], %s7029_s11, %s7029_s11, %s7030_s28  }
  0x93   :  { %s6965_s4 = scalar_lea.hbm %s7624_s19, 1024 }
  0x94   :  { %p6966_p0 = scmp.ne.s32.totalorder %s7624_s19, %s6965_s4  ;;  %p6969_p1 = scmp.lt.u32.totalorder %s6965_s4, %s7624_s19 }
  0x96   :  { %p6971_p2 = pnand %p6969_p1, %p6966_p0 }
  0x98   :  { %6974 = shalt.err (!%p6971_p2)
}
  0x99   :  { %s6975_s25 = scalar_lea.vmem %s7249_s26, 1024  ;;  %p6980_p4 = scmp.lt.s32.totalorder %s7249_s26, %s7249_s26 }
  0x9a   :  { %p6976_p3 = scmp.ne.s32.totalorder %s7249_s26, %s6975_s25  ;;  %p6981_p5 = scmp.lt.s32.totalorder %s6975_s25, %s6975_s25 }
  0x9c   :  { %p6982_p6 = por %p6981_p5, %p6980_p4 }
  0x9e   :  { %p6983_p7 = pnand %p6982_p6, %p6976_p3 }
  0xa0   :  { %6986 = shalt.err (!%p6983_p7)
}
  0xa1   :  { %151 = dma.hbm_to_vmem [thread:$0]  %s7624_s19, 1024, %s7249_s26, [#allocation15], %s7029_s11, %s7029_s11, %s7030_s28  }
  0xa2   :  { %7009 = dma.done.wait [#allocation3], 24576  }
  0xa3   :  { %7010 = vsyncadd [#allocation3], 4294942720 }
  0xa4   :  { %7011 = dma.done.wait [#allocation6], 8192  }
  0xa5   :  { %7012 = vsyncadd [#allocation6], 4294959104 }
  0xa6   :  { %7013 = dma.done.wait [#allocation9], 15360  }
  0xa7   :  { %7014 = vsyncadd [#allocation9], 4294951936 }
  0xa8   :  { %7015 = dma.done.wait [#allocation12], 7168  }
  0xa9   :  { %7016 = vsyncadd [#allocation12], 4294960128 }
  0xaa   :  { %7017 = dma.done.wait [#allocation15], 1024  }
  0xab   :  { %7018 = vsyncadd [#allocation15], 4294966272  ;;  %v6215_v0 = vld [vmem:[#allocation2 + $0x40] sm:$0xff]   ;;  %v6219_v4 = vld [vmem:[#allocation2 + $0x48] sm:$0xff]   ;;  %v7035_v24 = vmov 1983009808   ;;  %v234_v26 = vlaneseq }
  0xac   :  { %v6216_v1 = vld [vmem:[#allocation2 + $0xc0] sm:$0xff]   ;;  %5685 = vmatprep.subr.bf16.mxu0 %v6215_v0  ;;  %v6220_v5 = vld [vmem:[#allocation2 + $0xc8] sm:$0xff]   ;;  %v6223_v8 = vld [vmem:[#allocation2 + $0x50] sm:$0xff]   ;;  %v232_v25 = vunpack.c.l.s4 %v7035_v24  ;;  %s7649_s28 = sld [smem:[#allocation23_spill]]  ;;  %s7650_s0 = sld [smem:[#allocation25_spill]]  ;;  %vm7038_vm0 = vmmov 0  }
  0xad   :  { %v6217_v2 = vld [vmem:[#allocation2] sm:$0xff]   ;;  %5707 = vmatprep.subr.bf16.mxu1 %v6216_v1  ;;  %v6221_v6 = vld [vmem:[#allocation2 + $0x8] sm:$0xff]   ;;  %v6224_v9 = vld [vmem:[#allocation2 + $0xd0] sm:$0xff]   ;;  %v7286_v32 = vshrl.u32 %v234_v26, 7  ;;  %s7651_s30 = sld [smem:[#allocation27_spill]]  ;;  %s7652_s2 = sld [smem:[#allocation29_spill]] }
  0xae   :  { %v6218_v3 = vld [vmem:[#allocation2 + $0x80] sm:$0xff]   ;;  %5686 = vmatpush3.bf16.msra.mxu0 %v6217_v2  ;;  %v6222_v7 = vld [vmem:[#allocation2 + $0x88] sm:$0xff]   ;;  %v6225_v10 = vld [vmem:[#allocation2 + $0x10] sm:$0xff]   ;;  %v233_v31 = vunpack.c.0.s8 %v232_v25 }
  0xaf   :  { %5708 = vmatpush3.bf16.msra.mxu1 %v6218_v3  ;;  %5687 = vmatprep.subr.bf16.mxu0 %v6219_v4  ;;  %v6226_v11 = vld [vmem:[#allocation2 + $0x90] sm:$0xff]   ;;  %v6227_v12 = vld [vmem:[#allocation2 + $0x58] sm:$0xff]   ;;  %v6231_v16 = vld [vmem:[#allocation2 + $0x60] sm:$0xff]  }
  0xb0   :  { %5709 = vmatprep.subr.bf16.mxu1 %v6220_v5  ;;  %v6228_v13 = vld [vmem:[#allocation2 + $0xd8] sm:$0xff]   ;;  %v6232_v17 = vld [vmem:[#allocation2 + $0xe0] sm:$0xff]   ;;  %v6235_v20 = vld [vmem:[#allocation2 + $0x68] sm:$0xff]   ;;  %v7289_v37 = vsub.s32 %v233_v31, %v7286_v32 }
  0xb1   :  { %v6229_v14 = vld [vmem:[#allocation2 + $0x18] sm:$0xff]   ;;  %v6233_v18 = vld [vmem:[#allocation2 + $0x20] sm:$0xff]   ;;  %v6236_v21 = vld [vmem:[#allocation2 + $0xe8] sm:$0xff]  }
  0xb2   :  { %5688 = vmatpush3.bf16.msra.mxu0 %v6221_v6  ;;  %v6230_v15 = vld [vmem:[#allocation2 + $0x98] sm:$0xff]   ;;  %v6234_v19 = vld [vmem:[#allocation2 + $0xa0] sm:$0xff]   ;;  %v6237_v22 = vld [vmem:[#allocation2 + $0x28] sm:$0xff]  }
  0xb3   :  { %5710 = vmatpush3.bf16.msra.mxu1 %v6222_v7  ;;  %5689 = vmatprep.subr.bf16.mxu0 %v6223_v8  ;;  %v6238_v23 = vld [vmem:[#allocation2 + $0xa8] sm:$0xff]   ;;  %v6239_v27 = vld [vmem:[#allocation2 + $0x70] sm:$0xff]   ;;  %v6243_v33 = vld [vmem:[#allocation2 + $0x78] sm:$0xff]  }
  0xb4   :  { %5711 = vmatprep.subr.bf16.mxu1 %v6224_v9  ;;  %v6240_v28 = vld [vmem:[#allocation2 + $0xf0] sm:$0xff]   ;;  %v6244_v34 = vld [vmem:[#allocation2 + $0xf8] sm:$0xff]   ;;  %v6253_v44 = vld [vmem:[#allocation2 + $0x140] sm:$0xff]  }
  0xb5   :  { %v6241_v29 = vld [vmem:[#allocation2 + $0x30] sm:$0xff]   ;;  %v6245_v35 = vld [vmem:[#allocation2 + $0x38] sm:$0xff]   ;;  %v6254_v47 = vld [vmem:[#allocation2 + $0x1c0] sm:$0xff]  }
  0xb6   :  { %5690 = vmatpush3.bf16.msra.mxu0 %v6225_v10  ;;  %v6242_v30 = vld [vmem:[#allocation2 + $0xb0] sm:$0xff]   ;;  %v6246_v36 = vld [vmem:[#allocation2 + $0xb8] sm:$0xff]   ;;  %v6255_v50 = vld [vmem:[#allocation2 + $0x100] sm:$0xff]  }
  0xb7   :  { %5712 = vmatpush3.bf16.msra.mxu1 %v6226_v11  ;;  %5691 = vmatprep.subr.bf16.mxu0 %v6227_v12  ;;  %v6247_v38 = vld [vmem:[%s7649_s28] ss:$48 sps:$4 sm:$0xff]   ;;  %v6251_v40 = vld [vmem:[%s7649_s28 + $0x4] ss:$48 sps:$4 sm:$0xff]   ;;  %v6257_v56 = vld [vmem:[#allocation2 + $0x148] sm:$0xff]  }
  0xb8   :  { %5713 = vmatprep.subr.bf16.mxu1 %v6228_v13  ;;  %v6249_v39 = vld [vmem:[%s7649_s28 + $0x60] ss:$48 sps:$4 sm:$0xff]   ;;  %v6252_v41 = vld [vmem:[%s7649_s28 + $0x64] ss:$48 sps:$4 sm:$0xff]   ;;  %v237_v42 = vrot.slane %v6247_v38, %v7289_v37  ;;  %v244_v45 = vrot.slane %v6251_v40, %v7289_v37  ;;  %v6258_v59 = vld [vmem:[#allocation2 + $0x1c8] sm:$0xff]  }
  0xb9   :  { %v251_v43 = vrot.slane %v6249_v39, %v7289_v37  ;;  %v258_v46 = vrot.slane %v6252_v41, %v7289_v37  ;;  %v6256_v53 = vld [vmem:[#allocation2 + $0x180] sm:$0xff]   ;;  %v6259_v60 = vld [vmem:[#allocation2 + $0x108] sm:$0xff]   ;;  %v6261_v62 = vld [vmem:[#allocation2 + $0x150] sm:$0xff]  }
  0xba   :  { %5692 = vmatpush3.bf16.msra.mxu0 %v6229_v14  ;;  %v6260_v61 = vld [vmem:[#allocation2 + $0x188] sm:$0xff]   ;;  %v6262_v63 = vld [vmem:[#allocation2 + $0x1d0] sm:$0xff]   ;;  %v6265_v2 = vld [vmem:[#allocation2 + $0x158] sm:$0xff]  }
  0xbb   :  { %5714 = vmatpush3.bf16.msra.mxu1 %v6230_v15  ;;  %5693 = vmatprep.subr.bf16.mxu0 %v6231_v16  ;;  %v260_v48 = vcombine.high %v237_v42, %v251_v43  ;;  %v259_v49 = vcombine.low %v237_v42, %v251_v43  ;;  %v262_v51 = vcombine.high %v244_v45, %v258_v46  ;;  %v6263_v0 = vld [vmem:[#allocation2 + $0x110] sm:$0xff]   ;;  %v6266_v3 = vld [vmem:[#allocation2 + $0x1d8] sm:$0xff]   ;;  %v6269_v6 = vld [vmem:[#allocation2 + $0x160] sm:$0xff]  }
  0xbc   :  { %5715 = vmatprep.subr.bf16.mxu1 %v6232_v17  ;;  %v261_v52 = vcombine.low %v244_v45, %v258_v46  ;;  %v6264_v1 = vld [vmem:[#allocation2 + $0x190] sm:$0xff]   ;;  %v6267_v4 = vld [vmem:[#allocation2 + $0x118] sm:$0xff]   ;;  %v6270_v7 = vld [vmem:[#allocation2 + $0x1e0] sm:$0xff]  }
  0xbd   :  { %v468_v54 = vpack.c.bf16 %v260_v48, %v260_v48  ;;  %v467_v55 = vpack.c.bf16 %v259_v49, %v259_v49  ;;  %v470_v57 = vpack.c.bf16 %v262_v51, %v262_v51  ;;  %v6268_v5 = vld [vmem:[#allocation2 + $0x198] sm:$0xff]   ;;  %v6271_v8 = vld [vmem:[#allocation2 + $0x120] sm:$0xff]   ;;  %v6273_v10 = vld [vmem:[#allocation2 + $0x168] sm:$0xff]  }
  0xbe   :  { %5694 = vmatpush3.bf16.msra.mxu0 %v6233_v18  ;;  %v469_v58 = vpack.c.bf16 %v261_v52, %v261_v52  ;;  %v6272_v9 = vld [vmem:[#allocation2 + $0x1a0] sm:$0xff]   ;;  %v6274_v11 = vld [vmem:[#allocation2 + $0x1e8] sm:$0xff]   ;;  %v6277_v14 = vld [vmem:[#allocation2 + $0x170] sm:$0xff]  }
  0xbf   :  { %5716 = vmatpush3.bf16.msra.mxu1 %v6234_v19  ;;  %5695 = vmatprep.subr.bf16.mxu0 %v6235_v20  ;;  %v6275_v12 = vld [vmem:[#allocation2 + $0x128] sm:$0xff]   ;;  %v6278_v15 = vld [vmem:[#allocation2 + $0x1f0] sm:$0xff]   ;;  %v6281_v18 = vld [vmem:[#allocation2 + $0x178] sm:$0xff]  }
  0xc0   :  { %5717 = vmatprep.subr.bf16.mxu1 %v6236_v21  ;;  %2066 = vmatprep.mubr.bf16.mxu0 %v468_v54  ;;  %v6276_v13 = vld [vmem:[#allocation2 + $0x1a8] sm:$0xff]   ;;  %v6279_v16 = vld [vmem:[#allocation2 + $0x130] sm:$0xff]   ;;  %v6282_v19 = vld [vmem:[#allocation2 + $0x1f8] sm:$0xff]  }
  0xc1   :  { %2106 = vmatprep.mubr.bf16.mxu1 %v470_v57  ;;  %v6280_v17 = vld [vmem:[#allocation2 + $0x1b0] sm:$0xff]   ;;  %v6283_v20 = vld [vmem:[#allocation2 + $0x138] sm:$0xff]   ;;  %v6292_v31 = vld [vmem:[#allocation2 + $0x2c0] sm:$0xff]  }
  0xc2   :  { %5696 = vmatpush3.bf16.msra.mxu0 %v6237_v22  ;;  %v6284_v21 = vld [vmem:[#allocation2 + $0x1b8] sm:$0xff]   ;;  %v6294_v39 = vld [vmem:[#allocation2 + $0x280] sm:$0xff]   ;;  %v6295_v42 = vld [vmem:[#allocation2 + $0x248] sm:$0xff]  }
  0xc3   :  { %5718 = vmatpush3.bf16.msra.mxu1 %v6238_v23  ;;  %5697 = vmatprep.subr.bf16.mxu0 %v6239_v27  ;;  %v6285_v22 = vld [vmem:[%s7649_s28 + $0x8] ss:$48 sps:$4 sm:$0xff]   ;;  %v6289_v24 = vld [vmem:[%s7649_s28 + $0xc] ss:$48 sps:$4 sm:$0xff]   ;;  %v6299_v48 = vld [vmem:[#allocation2 + $0x250] sm:$0xff]  }
  0xc4   :  { %5719 = vmatprep.subr.bf16.mxu1 %v6240_v28  ;;  %v6287_v23 = vld [vmem:[%s7649_s28 + $0x68] ss:$48 sps:$4 sm:$0xff]   ;;  %v6290_v25 = vld [vmem:[%s7649_s28 + $0x6c] ss:$48 sps:$4 sm:$0xff]   ;;  %v273_v26 = vrot.slane %v6285_v22, %v7289_v37  ;;  %v280_v28 = vrot.slane %v6289_v24, %v7289_v37  ;;  %v6300_v49 = vld [vmem:[#allocation2 + $0x2d0] sm:$0xff]  }
  0xc5   :  { %v287_v27 = vrot.slane %v6287_v23, %v7289_v37  ;;  %v6296_v45 = vld [vmem:[#allocation2 + $0x2c8] sm:$0xff]   ;;  %v6302_v51 = vld [vmem:[#allocation2 + $0x290] sm:$0xff]   ;;  %v6303_v52 = vld [vmem:[#allocation2 + $0x258] sm:$0xff]  }
  0xc6   :  { %5698 = vmatpush3.bf16.msra.mxu0 %v6241_v29  ;;  %v6291_v29 = vld [vmem:[#allocation2 + $0x240] sm:$0xff]   ;;  %v6297_v46 = vld [vmem:[#allocation2 + $0x208] sm:$0xff]   ;;  %v6305_v54 = vld [vmem:[#allocation2 + $0x218] sm:$0xff]  }
  0xc7   :  { %5720 = vmatpush3.bf16.msra.mxu1 %v6242_v30  ;;  %5699 = vmatprep.subr.bf16.mxu0 %v6243_v33  ;;  %v294_v30 = vrot.slane %v6290_v25, %v7289_v37  ;;  %v296_v33 = vcombine.high %v273_v26, %v287_v27  ;;  %v6308_v57 = vld [vmem:[#allocation2 + $0x2e0] sm:$0xff]  }
  0xc8   :  { %5721 = vmatprep.subr.bf16.mxu1 %v6244_v34  ;;  %v295_v34 = vcombine.low %v273_v26, %v287_v27  ;;  %v6331_v22 = vld [vmem:[#allocation2 + $0x300] sm:$0xff]  }
  0xc9   :  { %v297_v38 = vcombine.low %v280_v28, %v294_v30  ;;  %v472_v40 = vpack.c.bf16 %v296_v33, %v296_v33  ;;  %v6332_v23 = vld [vmem:[#allocation2 + $0x380] sm:$0xff]   ;;  %v6337_v33 = vld [vmem:[#allocation2 + $0x350] sm:$0xff]  }
  0xca   :  { %5700 = vmatpush3.bf16.msra.mxu0 %v6245_v35  ;;  %v6293_v35 = vld [vmem:[#allocation2 + $0x200] sm:$0xff]   ;;  %v471_v41 = vpack.c.bf16 %v295_v34, %v295_v34  ;;  %v6338_v34 = vld [vmem:[#allocation2 + $0x3d0] sm:$0xff]  }
  0xcb   :  { %5722 = vmatpush3.bf16.msra.mxu1 %v6246_v36  ;;  %5729 = vmatprep.subr.bf16.mxu0 %v6253_v44  ;;  %v298_v36 = vcombine.high %v280_v28, %v294_v30  ;;  %v473_v44 = vpack.c.bf16 %v297_v38, %v297_v38  ;;  %v6333_v28 = vld [vmem:[#allocation2 + $0x348] sm:$0xff]   ;;  %v6341_v38 = vld [vmem:[#allocation2 + $0x358] sm:$0xff]  }
  0xcc   :  { %5751 = vmatprep.subr.bf16.mxu1 %v6254_v47  ;;  %v6298_v47 = vld [vmem:[#allocation2 + $0x288] sm:$0xff]  }
  0xcd   :  { %2067 = vmatmul.mubr.bf16.vlgmr.msra.gmra.mrb[0].mxu0 %v467_v55  ;;  %v474_v43 = vpack.c.bf16 %v298_v36, %v298_v36  ;;  %v6306_v55 = vld [vmem:[#allocation2 + $0x298] sm:$0xff]   ;;  %v6335_v30 = vld [vmem:[#allocation2 + $0x308] sm:$0xff]   ;;  %v6340_v36 = vld [vmem:[#allocation2 + $0x390] sm:$0xff]  }
  0xce   :  { %2107 = vmatmul.mubr.bf16.vlgmr.msra.gmra.mrb[0].mxu1 %v469_v58  ;;  %5730 = vmatpush3.bf16.msra.mxu0 %v6255_v50  ;;  %v6301_v50 = vld [vmem:[#allocation2 + $0x210] sm:$0xff]   ;;  %v6309_v58 = vld [vmem:[#allocation2 + $0x220] sm:$0xff]  }
  0xcf   :  { %5752 = vmatpush3.bf16.msra.mxu1 %v6256_v53  ;;  %5731 = vmatprep.subr.bf16.mxu0 %v6257_v56  ;;  %v6304_v53 = vld [vmem:[#allocation2 + $0x2d8] sm:$0xff]   ;;  %v6307_v56 = vld [vmem:[#allocation2 + $0x260] sm:$0xff]  }
  0xd0   :  { %5753 = vmatprep.subr.bf16.mxu1 %v6258_v59  ;;  %2146 = vmatprep.mubr.bf16.mxu0 %v472_v40  ;;  %v6310_v59 = vld [vmem:[#allocation2 + $0x2a0] sm:$0xff]   ;;  %v6343_v40 = vld [vmem:[#allocation2 + $0x318] sm:$0xff]  }
  0xd1   :  { %2186 = vmatprep.mubr.bf16.mxu1 %v474_v43  ;;  %v6346_v43 = vld [vmem:[#allocation2 + $0x3e0] sm:$0xff]  }
  0xd2   :  { %5732 = vmatpush3.bf16.msra.mxu0 %v6259_v60  ;;  %v6311_v60 = vld [vmem:[#allocation2 + $0x268] sm:$0xff]  }
  0xd3   :  { %5754 = vmatpush3.bf16.msra.mxu1 %v6260_v61  ;;  %5733 = vmatprep.subr.bf16.mxu0 %v6261_v62  ;;  %v6312_v61 = vld [vmem:[#allocation2 + $0x2e8] sm:$0xff]  }
  0xd4   :  { %5755 = vmatprep.subr.bf16.mxu1 %v6262_v63  ;;  %v6313_v62 = vld [vmem:[#allocation2 + $0x228] sm:$0xff]  }
  0xd5   :  { %v6314_v63 = vld [vmem:[#allocation2 + $0x2a8] sm:$0xff]  }
  0xd6   :  { %5734 = vmatpush3.bf16.msra.mxu0 %v6263_v0  ;;  %v6315_v0 = vld [vmem:[#allocation2 + $0x270] sm:$0xff]  }
  0xd7   :  { %5756 = vmatpush3.bf16.msra.mxu1 %v6264_v1  ;;  %5735 = vmatprep.subr.bf16.mxu0 %v6265_v2  ;;  %v6316_v1 = vld [vmem:[#allocation2 + $0x2f0] sm:$0xff]  }
  0xd8   :  { %5757 = vmatprep.subr.bf16.mxu1 %v6266_v3  ;;  %v6317_v2 = vld [vmem:[#allocation2 + $0x230] sm:$0xff]  }
  0xd9   :  { %v6318_v3 = vld [vmem:[#allocation2 + $0x2b0] sm:$0xff]  }
  0xda   :  { %5736 = vmatpush3.bf16.msra.mxu0 %v6267_v4  ;;  %v6319_v4 = vld [vmem:[#allocation2 + $0x278] sm:$0xff]  }
  0xdb   :  { %5758 = vmatpush3.bf16.msra.mxu1 %v6268_v5  ;;  %5737 = vmatprep.subr.bf16.mxu0 %v6269_v6  ;;  %v6320_v5 = vld [vmem:[#allocation2 + $0x2f8] sm:$0xff]  }
  0xdc   :  { %5759 = vmatprep.subr.bf16.mxu1 %v6270_v7  ;;  %v6321_v6 = vld [vmem:[#allocation2 + $0x238] sm:$0xff]  }
  0xdd   :  { %v6322_v7 = vld [vmem:[#allocation2 + $0x2b8] sm:$0xff]  }
  0xde   :  { %5738 = vmatpush3.bf16.msra.mxu0 %v6271_v8  ;;  %v6323_v8 = vld [vmem:[%s7649_s28 + $0x10] ss:$48 sps:$4 sm:$0xff]  }
  0xdf   :  { %5760 = vmatpush3.bf16.msra.mxu1 %v6272_v9  ;;  %5739 = vmatprep.subr.bf16.mxu0 %v6273_v10  ;;  %v6325_v9 = vld [vmem:[%s7649_s28 + $0x70] ss:$48 sps:$4 sm:$0xff]   ;;  %v6327_v10 = vld [vmem:[%s7649_s28 + $0x14] ss:$48 sps:$4 sm:$0xff]  }
  0xe0   :  { %5761 = vmatprep.subr.bf16.mxu1 %v6274_v11  ;;  %v6328_v11 = vld [vmem:[%s7649_s28 + $0x74] ss:$48 sps:$4 sm:$0xff]  }
  0xe2   :  { %5740 = vmatpush3.bf16.msra.mxu0 %v6275_v12  ;;  %v309_v12 = vrot.slane %v6323_v8, %v7289_v37 }
  0xe3   :  { %5762 = vmatpush3.bf16.msra.mxu1 %v6276_v13  ;;  %5741 = vmatprep.subr.bf16.mxu0 %v6277_v14  ;;  %v6329_v13 = vld [vmem:[#allocation2 + $0x340] sm:$0xff]   ;;  %v323_v14 = vrot.slane %v6325_v9, %v7289_v37 }
  0xe4   :  { %5763 = vmatprep.subr.bf16.mxu1 %v6278_v15  ;;  %v316_v15 = vrot.slane %v6327_v10, %v7289_v37  ;;  %v6370_v9 = vld [vmem:[#allocation2 + $0x480] sm:$0xff]  }
  0xe6   :  { %5742 = vmatpush3.bf16.msra.mxu0 %v6279_v16  ;;  %v330_v16 = vrot.slane %v6328_v11, %v7289_v37 }
  0xe7   :  { %5764 = vmatpush3.bf16.msra.mxu1 %v6280_v17  ;;  %5743 = vmatprep.subr.bf16.mxu0 %v6281_v18  ;;  %v6330_v17 = vld [vmem:[#allocation2 + $0x3c0] sm:$0xff]   ;;  %v332_v18 = vcombine.high %v309_v12, %v323_v14 }
  0xe8   :  { %5765 = vmatprep.subr.bf16.mxu1 %v6282_v19  ;;  %v334_v19 = vcombine.high %v316_v15, %v330_v16 }
  0xe9   :  { %v476_v24 = vpack.c.bf16 %v332_v18, %v332_v18  ;;  %v6375_v18 = vld [vmem:[#allocation2 + $0x450] sm:$0xff]  }
  0xea   :  { %5744 = vmatpush3.bf16.msra.mxu0 %v6283_v20  ;;  %v331_v20 = vcombine.low %v309_v12, %v323_v14  ;;  %v478_v25 = vpack.c.bf16 %v334_v19, %v334_v19  ;;  %v6371_v12 = vld [vmem:[#allocation2 + $0x448] sm:$0xff]   ;;  %v6376_v19 = vld [vmem:[#allocation2 + $0x4d0] sm:$0xff]  }
  0xeb   :  { %5766 = vmatpush3.bf16.msra.mxu1 %v6284_v21  ;;  %5773 = vmatprep.subr.bf16.mxu0 %v6291_v29  ;;  %v333_v21 = vcombine.low %v316_v15, %v330_v16  ;;  %v6334_v29 = vld [vmem:[#allocation2 + $0x3c8] sm:$0xff]  }
  0xec   :  { %5795 = vmatprep.subr.bf16.mxu1 %v6292_v31  ;;  %v475_v26 = vpack.c.bf16 %v331_v20, %v331_v20  ;;  %v6336_v31 = vld [vmem:[#allocation2 + $0x388] sm:$0xff]   ;;  %v6377_v20 = vld [vmem:[#allocation2 + $0x410] sm:$0xff]  }
  0xed   :  { %2147 = vmatmul.mubr.bf16.vlgmr.msra.gmra.mrb[4].mxu0 %v471_v41  ;;  %v477_v27 = vpack.c.bf16 %v333_v21, %v333_v21  ;;  %v6344_v41 = vld [vmem:[#allocation2 + $0x398] sm:$0xff]   ;;  %v6372_v15 = vld [vmem:[#allocation2 + $0x4c8] sm:$0xff]   ;;  %v6378_v21 = vld [vmem:[#allocation2 + $0x490] sm:$0xff]  }
  0xee   :  { %2187 = vmatmul.mubr.bf16.vlgmr.msra.gmra.mrb[4].mxu1 %v473_v44  ;;  %5774 = vmatpush3.bf16.msra.mxu0 %v6293_v35  ;;  %v6339_v35 = vld [vmem:[#allocation2 + $0x310] sm:$0xff]   ;;  %v6347_v44 = vld [vmem:[#allocation2 + $0x320] sm:$0xff]   ;;  %v6373_v16 = vld [vmem:[#allocation2 + $0x408] sm:$0xff]  }
  0xef   :  { %5796 = vmatpush3.bf16.msra.mxu1 %v6294_v39  ;;  %5775 = vmatprep.subr.bf16.mxu0 %v6295_v42  ;;  %v6342_v39 = vld [vmem:[#allocation2 + $0x3d8] sm:$0xff]   ;;  %v6345_v42 = vld [vmem:[#allocation2 + $0x360] sm:$0xff]  }
  0xf0   :  { %5797 = vmatprep.subr.bf16.mxu1 %v6296_v45  ;;  %2226 = vmatprep.mubr.bf16.mxu0 %v476_v24  ;;  %v6348_v45 = vld [vmem:[#allocation2 + $0x3a0] sm:$0xff]   ;;  %v6381_v24 = vld [vmem:[#allocation2 + $0x418] sm:$0xff]  }
  0xf1   :  { %2266 = vmatprep.mubr.bf16.mxu1 %v478_v25  ;;  %v6382_v25 = vld [vmem:[#allocation2 + $0x498] sm:$0xff]  }
  0xf2   :  { %5776 = vmatpush3.bf16.msra.mxu0 %v6297_v46  ;;  %v6349_v46 = vld [vmem:[#allocation2 + $0x368] sm:$0xff]  }
  0xf3   :  { %5798 = vmatpush3.bf16.msra.mxu1 %v6298_v47  ;;  %5777 = vmatprep.subr.bf16.mxu0 %v6299_v48  ;;  %v6350_v47 = vld [vmem:[#allocation2 + $0x3e8] sm:$0xff]  }
  0xf4   :  { %5799 = vmatprep.subr.bf16.mxu1 %v6300_v49  ;;  %v6351_v48 = vld [vmem:[#allocation2 + $0x328] sm:$0xff]  }
  0xf5   :  { %v6352_v49 = vld [vmem:[#allocation2 + $0x3a8] sm:$0xff]  }
  0xf6   :  { %5778 = vmatpush3.bf16.msra.mxu0 %v6301_v50  ;;  %v6353_v50 = vld [vmem:[#allocation2 + $0x370] sm:$0xff]  }
  0xf7   :  { %5800 = vmatpush3.bf16.msra.mxu1 %v6302_v51  ;;  %5779 = vmatprep.subr.bf16.mxu0 %v6303_v52  ;;  %v6354_v51 = vld [vmem:[#allocation2 + $0x3f0] sm:$0xff]  }
  0xf8   :  { %5801 = vmatprep.subr.bf16.mxu1 %v6304_v53  ;;  %v6355_v52 = vld [vmem:[#allocation2 + $0x330] sm:$0xff]  }
  0xf9   :  { %v6356_v53 = vld [vmem:[#allocation2 + $0x3b0] sm:$0xff]  }
  0xfa   :  { %5780 = vmatpush3.bf16.msra.mxu0 %v6305_v54  ;;  %v6357_v54 = vld [vmem:[#allocation2 + $0x378] sm:$0xff]  }
  0xfb   :  { %5802 = vmatpush3.bf16.msra.mxu1 %v6306_v55  ;;  %5781 = vmatprep.subr.bf16.mxu0 %v6307_v56  ;;  %v6358_v55 = vld [vmem:[#allocation2 + $0x3f8] sm:$0xff]  }
  0xfc   :  { %5803 = vmatprep.subr.bf16.mxu1 %v6308_v57  ;;  %v6359_v56 = vld [vmem:[#allocation2 + $0x338] sm:$0xff]  }
  0xfd   :  { %v6360_v57 = vld [vmem:[#allocation2 + $0x3b8] sm:$0xff]  }
  0xfe   :  { %5782 = vmatpush3.bf16.msra.mxu0 %v6309_v58  ;;  %v6361_v58 = vld [vmem:[%s7649_s28 + $0x18] ss:$48 sps:$4 sm:$0xff]  }
  0xff   :  { %5804 = vmatpush3.bf16.msra.mxu1 %v6310_v59  ;;  %5783 = vmatprep.subr.bf16.mxu0 %v6311_v60  ;;  %v6363_v59 = vld [vmem:[%s7649_s28 + $0x78] ss:$48 sps:$4 sm:$0xff]   ;;  %v6365_v60 = vld [vmem:[%s7649_s28 + $0x1c] ss:$48 sps:$4 sm:$0xff]  }
 0x100   :  { %5805 = vmatprep.subr.bf16.mxu1 %v6312_v61  ;;  %v6366_v61 = vld [vmem:[%s7649_s28 + $0x7c] ss:$48 sps:$4 sm:$0xff]  }
 0x102   :  { %5784 = vmatpush3.bf16.msra.mxu0 %v6313_v62  ;;  %v345_v62 = vrot.slane %v6361_v58, %v7289_v37 }
 0x103   :  { %5806 = vmatpush3.bf16.msra.mxu1 %v6314_v63  ;;  %5785 = vmatprep.subr.bf16.mxu0 %v6315_v0  ;;  %v359_v63 = vrot.slane %v6363_v59, %v7289_v37  ;;  %v6367_v0 = vld [vmem:[#allocation2 + $0x440] sm:$0xff]  }
 0x104   :  { %5807 = vmatprep.subr.bf16.mxu1 %v6316_v1  ;;  %v352_v1 = vrot.slane %v6365_v60, %v7289_v37  ;;  %v6408_v59 = vld [vmem:[#allocation2 + $0x580] sm:$0xff]  }
 0x106   :  { %5786 = vmatpush3.bf16.msra.mxu0 %v6317_v2  ;;  %v366_v2 = vrot.slane %v6366_v61, %v7289_v37 }
 0x107   :  { %5808 = vmatpush3.bf16.msra.mxu1 %v6318_v3  ;;  %5787 = vmatprep.subr.bf16.mxu0 %v6319_v4  ;;  %v6368_v3 = vld [vmem:[#allocation2 + $0x4c0] sm:$0xff]   ;;  %v368_v4 = vcombine.high %v345_v62, %v359_v63 }
 0x108   :  { %5809 = vmatprep.subr.bf16.mxu1 %v6320_v5  ;;  %v367_v5 = vcombine.low %v345_v62, %v359_v63  ;;  %v369_v8 = vcombine.low %v352_v1, %v366_v2  ;;  %v6409_v62 = vld [vmem:[#allocation2 + $0x548] sm:$0xff]  }
 0x109   :  { %v480_v10 = vpack.c.bf16 %v368_v4, %v368_v4  ;;  %v6413_v4 = vld [vmem:[#allocation2 + $0x550] sm:$0xff]  }
 0x10a   :  { %5788 = vmatpush3.bf16.msra.mxu0 %v6321_v6  ;;  %v6369_v6 = vld [vmem:[#allocation2 + $0x400] sm:$0xff]   ;;  %v479_v11 = vpack.c.bf16 %v367_v5, %v367_v5  ;;  %v481_v14 = vpack.c.bf16 %v369_v8, %v369_v8  ;;  %v6414_v5 = vld [vmem:[#allocation2 + $0x5d0] sm:$0xff]   ;;  %v6417_v8 = vld [vmem:[#allocation2 + $0x558] sm:$0xff]  }
 0x10b   :  { %5810 = vmatpush3.bf16.msra.mxu1 %v6322_v7  ;;  %5817 = vmatprep.subr.bf16.mxu0 %v6329_v13  ;;  %v370_v7 = vcombine.high %v352_v1, %v366_v2  ;;  %v6410_v1 = vld [vmem:[#allocation2 + $0x5c8] sm:$0xff]  }
 0x10c   :  { %5839 = vmatprep.subr.bf16.mxu1 %v6330_v17  ;;  %v6374_v17 = vld [vmem:[#allocation2 + $0x488] sm:$0xff]  }
 0x10d   :  { %2227 = vmatmul.mubr.bf16.vlgmr.msra.gmra.mrb[8].mxu0 %v475_v26  ;;  %v482_v13 = vpack.c.bf16 %v370_v7, %v370_v7  ;;  %v6383_v26 = vld [vmem:[#allocation2 + $0x460] sm:$0xff]   ;;  %v6411_v2 = vld [vmem:[#allocation2 + $0x508] sm:$0xff]   ;;  %v6416_v7 = vld [vmem:[#allocation2 + $0x590] sm:$0xff]  }
 0x10e   :  { %2267 = vmatmul.mubr.bf16.vlgmr.msra.gmra.mrb[8].mxu1 %v477_v27  ;;  %5818 = vmatpush3.bf16.msra.mxu0 %v6331_v22  ;;  %v6379_v22 = vld [vmem:[#allocation2 + $0x458] sm:$0xff]   ;;  %v6384_v27 = vld [vmem:[#allocation2 + $0x4e0] sm:$0xff]  }
 0x10f   :  { %5840 = vmatpush3.bf16.msra.mxu1 %v6332_v23  ;;  %5819 = vmatprep.subr.bf16.mxu0 %v6333_v28  ;;  %v6380_v23 = vld [vmem:[#allocation2 + $0x4d8] sm:$0xff]   ;;  %v6385_v28 = vld [vmem:[#allocation2 + $0x420] sm:$0xff]  }
 0x110   :  { %5841 = vmatprep.subr.bf16.mxu1 %v6334_v29  ;;  %2306 = vmatprep.mubr.bf16.mxu0 %v480_v10  ;;  %v6386_v29 = vld [vmem:[#allocation2 + $0x4a0] sm:$0xff]   ;;  %v6419_v10 = vld [vmem:[#allocation2 + $0x518] sm:$0xff]  }
 0x111   :  { %2346 = vmatprep.mubr.bf16.mxu1 %v482_v13  ;;  %v6422_v13 = vld [vmem:[#allocation2 + $0x5e0] sm:$0xff]  }
 0x112   :  { %5820 = vmatpush3.bf16.msra.mxu0 %v6335_v30  ;;  %v6387_v30 = vld [vmem:[#allocation2 + $0x468] sm:$0xff]  }
 0x113   :  { %5842 = vmatpush3.bf16.msra.mxu1 %v6336_v31  ;;  %5821 = vmatprep.subr.bf16.mxu0 %v6337_v33  ;;  %v6388_v31 = vld [vmem:[#allocation2 + $0x4e8] sm:$0xff]  }
 0x114   :  { %5843 = vmatprep.subr.bf16.mxu1 %v6338_v34  ;;  %v6389_v33 = vld [vmem:[#allocation2 + $0x428] sm:$0xff]  }
 0x115   :  { %v6390_v34 = vld [vmem:[#allocation2 + $0x4a8] sm:$0xff]  }
 0x116   :  { %5822 = vmatpush3.bf16.msra.mxu0 %v6339_v35  ;;  %v6391_v35 = vld [vmem:[#allocation2 + $0x470] sm:$0xff]  }
 0x117   :  { %5844 = vmatpush3.bf16.msra.mxu1 %v6340_v36  ;;  %5823 = vmatprep.subr.bf16.mxu0 %v6341_v38  ;;  %v6392_v36 = vld [vmem:[#allocation2 + $0x4f0] sm:$0xff]  }
 0x118   :  { %5845 = vmatprep.subr.bf16.mxu1 %v6342_v39  ;;  %v6393_v38 = vld [vmem:[#allocation2 + $0x430] sm:$0xff]  }
 0x119   :  { %v6394_v39 = vld [vmem:[#allocation2 + $0x4b0] sm:$0xff]  }
 0x11a   :  { %5824 = vmatpush3.bf16.msra.mxu0 %v6343_v40  ;;  %v6395_v40 = vld [vmem:[#allocation2 + $0x478] sm:$0xff]  }
 0x11b   :  { %5846 = vmatpush3.bf16.msra.mxu1 %v6344_v41  ;;  %5825 = vmatprep.subr.bf16.mxu0 %v6345_v42  ;;  %v6396_v41 = vld [vmem:[#allocation2 + $0x4f8] sm:$0xff]  }
 0x11c   :  { %5847 = vmatprep.subr.bf16.mxu1 %v6346_v43  ;;  %v6397_v42 = vld [vmem:[#allocation2 + $0x438] sm:$0xff]  }
 0x11d   :  { %v6398_v43 = vld [vmem:[#allocation2 + $0x4b8] sm:$0xff]  }
 0x11e   :  { %5826 = vmatpush3.bf16.msra.mxu0 %v6347_v44  ;;  %v6399_v44 = vld [vmem:[%s7649_s28 + $0x20] ss:$48 sps:$4 sm:$0xff]  }
 0x11f   :  { %5848 = vmatpush3.bf16.msra.mxu1 %v6348_v45  ;;  %5827 = vmatprep.subr.bf16.mxu0 %v6349_v46  ;;  %v6401_v45 = vld [vmem:[%s7649_s28 + $0x80] ss:$48 sps:$4 sm:$0xff]   ;;  %v6403_v46 = vld [vmem:[%s7649_s28 + $0x24] ss:$48 sps:$4 sm:$0xff]  }
 0x120   :  { %5849 = vmatprep.subr.bf16.mxu1 %v6350_v47  ;;  %v6404_v47 = vld [vmem:[%s7649_s28 + $0x84] ss:$48 sps:$4 sm:$0xff]  }
 0x122   :  { %5828 = vmatpush3.bf16.msra.mxu0 %v6351_v48  ;;  %v381_v48 = vrot.slane %v6399_v44, %v7289_v37 }
 0x123   :  { %5850 = vmatpush3.bf16.msra.mxu1 %v6352_v49  ;;  %5829 = vmatprep.subr.bf16.mxu0 %v6353_v50  ;;  %v395_v49 = vrot.slane %v6401_v45, %v7289_v37  ;;  %v388_v50 = vrot.slane %v6403_v46, %v7289_v37  ;;  %v5208_v46 = vld [vmem:[%s7650_s0] ss:$0 sm:$0xff] }
 0x124   :  { %5851 = vmatprep.subr.bf16.mxu1 %v6354_v51  ;;  %v6405_v51 = vld [vmem:[#allocation2 + $0x540] sm:$0xff]  }
 0x126   :  { %5830 = vmatpush3.bf16.msra.mxu0 %v6355_v52  ;;  %v402_v52 = vrot.slane %v6404_v47, %v7289_v37 }
 0x127   :  { %5852 = vmatpush3.bf16.msra.mxu1 %v6356_v53  ;;  %5831 = vmatprep.subr.bf16.mxu0 %v6357_v54  ;;  %v6406_v53 = vld [vmem:[#allocation2 + $0x5c0] sm:$0xff]   ;;  %v404_v54 = vcombine.high %v381_v48, %v395_v49 }
 0x128   :  { %5853 = vmatprep.subr.bf16.mxu1 %v6358_v55  ;;  %v403_v55 = vcombine.low %v381_v48, %v395_v49  ;;  %v405_v58 = vcombine.low %v388_v50, %v402_v52 }
 0x129   :  { %v484_v60 = vpack.c.bf16 %v404_v54, %v404_v54 }
 0x12a   :  { %5832 = vmatpush3.bf16.msra.mxu0 %v6359_v56  ;;  %v6407_v56 = vld [vmem:[#allocation2 + $0x500] sm:$0xff]   ;;  %v483_v61 = vpack.c.bf16 %v403_v55, %v403_v55 }
 0x12b   :  { %5854 = vmatpush3.bf16.msra.mxu1 %v6360_v57  ;;  %5861 = vmatprep.subr.bf16.mxu0 %v6367_v0  ;;  %v406_v57 = vcombine.high %v388_v50, %v402_v52  ;;  %v485_v0 = vpack.c.bf16 %v405_v58, %v405_v58  ;;  %v6443_v58 = vld [vmem:[#allocation5] ss:$8 sps:$4 sm:$0xff]  }
 0x12c   :  { %5883 = vmatprep.subr.bf16.mxu1 %v6368_v3  ;;  %v6412_v3 = vld [vmem:[#allocation2 + $0x588] sm:$0xff]  }
 0x12d   :  { %2307 = vmatmul.mubr.bf16.vlgmr.msra.gmra.mrb[12].mxu0 %v479_v11  ;;  %v486_v63 = vpack.c.bf16 %v406_v57, %v406_v57  ;;  %v6420_v11 = vld [vmem:[#allocation2 + $0x598] sm:$0xff]  }
 0x12e   :  { %2347 = vmatmul.mubr.bf16.vlgmr.msra.gmra.mrb[12].mxu1 %v481_v14  ;;  %5862 = vmatpush3.bf16.msra.mxu0 %v6369_v6  ;;  %v6415_v6 = vld [vmem:[#allocation2 + $0x510] sm:$0xff]   ;;  %v6423_v14 = vld [vmem:[#allocation2 + $0x520] sm:$0xff]  }
 0x12f   :  { %5884 = vmatpush3.bf16.msra.mxu1 %v6370_v9  ;;  %5863 = vmatprep.subr.bf16.mxu0 %v6371_v12  ;;  %v6418_v9 = vld [vmem:[#allocation2 + $0x5d8] sm:$0xff]   ;;  %v6421_v12 = vld [vmem:[#allocation2 + $0x560] sm:$0xff]  }
 0x130   :  { %5885 = vmatprep.subr.bf16.mxu1 %v6372_v15  ;;  %2386 = vmatprep.mubr.bf16.mxu0 %v484_v60  ;;  %v6424_v15 = vld [vmem:[#allocation2 + $0x5a0] sm:$0xff]   ;;  %v6448_v60 = vld [vmem:[#allocation5 + $0x14] ss:$8 sps:$4 sm:$0xff]  }
 0x131   :  { %2426 = vmatprep.mubr.bf16.mxu1 %v486_v63  ;;  %v6449_v63 = vld [vmem:[#allocation5 + $0x20] ss:$8 sps:$4 sm:$0xff]  }
 0x132   :  { %5864 = vmatpush3.bf16.msra.mxu0 %v6373_v16  ;;  %v6425_v16 = vld [vmem:[#allocation2 + $0x568] sm:$0xff]  }
 0x133   :  { %5886 = vmatpush3.bf16.msra.mxu1 %v6374_v17  ;;  %5865 = vmatprep.subr.bf16.mxu0 %v6375_v18  ;;  %v6426_v17 = vld [vmem:[#allocation2 + $0x5e8] sm:$0xff]  }
 0x134   :  { %5887 = vmatprep.subr.bf16.mxu1 %v6376_v19  ;;  %v6427_v18 = vld [vmem:[#allocation2 + $0x528] sm:$0xff]  }
 0x135   :  { %v6428_v19 = vld [vmem:[#allocation2 + $0x5a8] sm:$0xff]  }
 0x136   :  { %5866 = vmatpush3.bf16.msra.mxu0 %v6377_v20  ;;  %v6429_v20 = vld [vmem:[#allocation2 + $0x570] sm:$0xff]  }
 0x137   :  { %5888 = vmatpush3.bf16.msra.mxu1 %v6378_v21  ;;  %5867 = vmatprep.subr.bf16.mxu0 %v6379_v22  ;;  %v6430_v21 = vld [vmem:[#allocation2 + $0x5f0] sm:$0xff]  }
 0x138   :  { %5889 = vmatprep.subr.bf16.mxu1 %v6380_v23  ;;  %v6431_v22 = vld [vmem:[#allocation2 + $0x530] sm:$0xff]  }
 0x139   :  { %v6432_v23 = vld [vmem:[#allocation2 + $0x5b0] sm:$0xff]  }
 0x13a   :  { %5868 = vmatpush3.bf16.msra.mxu0 %v6381_v24  ;;  %v6433_v24 = vld [vmem:[#allocation2 + $0x578] sm:$0xff]  }
 0x13b   :  { %5890 = vmatpush3.bf16.msra.mxu1 %v6382_v25  ;;  %5869 = vmatprep.subr.bf16.mxu0 %v6383_v26  ;;  %v6434_v25 = vld [vmem:[#allocation2 + $0x5f8] sm:$0xff]  }
 0x13c   :  { %5891 = vmatprep.subr.bf16.mxu1 %v6384_v27  ;;  %v6435_v26 = vld [vmem:[#allocation2 + $0x538] sm:$0xff]  }
 0x13d   :  { %v6436_v27 = vld [vmem:[#allocation2 + $0x5b8] sm:$0xff]  }
 0x13e   :  { %5870 = vmatpush3.bf16.msra.mxu0 %v6385_v28  ;;  %v6437_v28 = vld [vmem:[%s7649_s28 + $0x28] ss:$48 sps:$4 sm:$0xff]  }
 0x13f   :  { %5892 = vmatpush3.bf16.msra.mxu1 %v6386_v29  ;;  %5871 = vmatprep.subr.bf16.mxu0 %v6387_v30  ;;  %v6439_v29 = vld [vmem:[%s7649_s28 + $0x88] ss:$48 sps:$4 sm:$0xff]   ;;  %v6441_v30 = vld [vmem:[%s7649_s28 + $0x2c] ss:$48 sps:$4 sm:$0xff]  }
 0x140   :  { %5893 = vmatprep.subr.bf16.mxu1 %v6388_v31  ;;  %v6442_v31 = vld [vmem:[%s7649_s28 + $0x8c] ss:$48 sps:$4 sm:$0xff]  }
 0x142   :  { %5872 = vmatpush3.bf16.msra.mxu0 %v6389_v33  ;;  %v417_v33 = vrot.slane %v6437_v28, %v7289_v37  ;;  %v6494_v28 = vld [vmem:[#allocation7 + $0xc8] ss:$12 sps:$4 sm:$0xff]  }
 0x143   :  { %5894 = vmatpush3.bf16.msra.mxu1 %v6390_v34  ;;  %5873 = vmatprep.subr.bf16.mxu0 %v6391_v35  ;;  %v431_v34 = vrot.slane %v6439_v29, %v7289_v37  ;;  %v424_v35 = vrot.slane %v6441_v30, %v7289_v37  ;;  %v6473_v29 = vld [vmem:[#allocation7 + $0x30] ss:$12 sps:$4 sm:$0xff]   ;;  %v6478_v30 = vld [vmem:[#allocation7 + $0x4c] ss:$12 sps:$4 sm:$0xff]  }
 0x144   :  { %5895 = vmatprep.subr.bf16.mxu1 %v6392_v36  ;;  %v438_v36 = vrot.slane %v6442_v31, %v7289_v37  ;;  %v6476_v31 = vld [vmem:[#allocation7 + $0x48] ss:$12 sps:$4 sm:$0xff]  }
 0x146   :  { %5874 = vmatpush3.bf16.msra.mxu0 %v6393_v38  ;;  %v440_v38 = vcombine.high %v417_v33, %v431_v34 }
 0x147   :  { %5896 = vmatpush3.bf16.msra.mxu1 %v6394_v39  ;;  %5875 = vmatprep.subr.bf16.mxu0 %v6395_v40  ;;  %v442_v39 = vcombine.high %v424_v35, %v438_v36  ;;  %v439_v40 = vcombine.low %v417_v33, %v431_v34  ;;  %v6481_v33 = vld [vmem:[#allocation7 + $0x64] ss:$12 sps:$4 sm:$0xff]  }
 0x148   :  { %5897 = vmatprep.subr.bf16.mxu1 %v6396_v41  ;;  %v441_v41 = vcombine.low %v424_v35, %v438_v36 }
 0x149   :  { %v487_v44 = vpack.c.bf16 %v439_v40, %v439_v40 }
 0x14a   :  { %5876 = vmatpush3.bf16.msra.mxu0 %v6397_v42  ;;  %v488_v42 = vpack.c.bf16 %v440_v38, %v440_v38  ;;  %v489_v45 = vpack.c.bf16 %v441_v41, %v441_v41 }
 0x14b   :  { %5898 = vmatpush3.bf16.msra.mxu1 %v6398_v43  ;;  %5905 = vmatprep.subr.bf16.mxu0 %v6405_v51  ;;  %v490_v43 = vpack.c.bf16 %v442_v39, %v442_v39 }
 0x14c   :  { %5927 = vmatprep.subr.bf16.mxu1 %v6406_v53 }
 0x14d   :  { %2387 = vmatmul.mubr.bf16.vlgmr.msra.gmra.mrb[16].mxu0 %v483_v61  ;;  %v6446_v61 = vld [vmem:[#allocation5 + $0x10] ss:$8 sps:$4 sm:$0xff]  }
 0x14e   :  { %2427 = vmatmul.mubr.bf16.vlgmr.msra.gmra.mrb[16].mxu1 %v485_v0  ;;  %5906 = vmatpush3.bf16.msra.mxu0 %v6407_v56  ;;  %v6454_v0 = vld [vmem:[#allocation5 + $0x34] ss:$8 sps:$4 sm:$0xff]  }
 0x14f   :  { %5928 = vmatpush3.bf16.msra.mxu1 %v6408_v59  ;;  %5907 = vmatprep.subr.bf16.mxu0 %v6409_v62  ;;  %v6445_v59 = vld [vmem:[#allocation5 + $0x4] ss:$8 sps:$4 sm:$0xff]  }
 0x150   :  { %5929 = vmatprep.subr.bf16.mxu1 %v6410_v1  ;;  %2466 = vmatprep.mubr.bf16.mxu0 %v488_v42  ;;  %v6451_v62 = vld [vmem:[#allocation5 + $0x24] ss:$8 sps:$4 sm:$0xff]   ;;  %v6452_v1 = vld [vmem:[#allocation5 + $0x30] ss:$8 sps:$4 sm:$0xff]  }
 0x151   :  { %2506 = vmatprep.mubr.bf16.mxu1 %v490_v43  ;;  %v6479_v43 = vld [vmem:[#allocation7 + $0x60] ss:$12 sps:$4 sm:$0xff]  }
 0x152   :  { %5908 = vmatpush3.bf16.msra.mxu0 %v6411_v2  ;;  %v6457_v2 = vld [vmem:[#allocation5 + $0x44] ss:$8 sps:$4 sm:$0xff]  }
 0x153   :  { %5930 = vmatpush3.bf16.msra.mxu1 %v6412_v3  ;;  %5909 = vmatprep.subr.bf16.mxu0 %v6413_v4  ;;  %v6455_v3 = vld [vmem:[#allocation5 + $0x40] ss:$8 sps:$4 sm:$0xff]  }
 0x154   :  { %5931 = vmatprep.subr.bf16.mxu1 %v6414_v5 }
 0x156   :  { %5910 = vmatpush3.bf16.msra.mxu0 %v6415_v6 }
 0x157   :  { %5932 = vmatpush3.bf16.msra.mxu1 %v6416_v7  ;;  %5911 = vmatprep.subr.bf16.mxu0 %v6417_v8 }
 0x158   :  { %5933 = vmatprep.subr.bf16.mxu1 %v6418_v9 }
 0x15a   :  { %5912 = vmatpush3.bf16.msra.mxu0 %v6419_v10 }
 0x15b   :  { %5934 = vmatpush3.bf16.msra.mxu1 %v6420_v11  ;;  %5913 = vmatprep.subr.bf16.mxu0 %v6421_v12 }
 0x15c   :  { %5935 = vmatprep.subr.bf16.mxu1 %v6422_v13 }
 0x15e   :  { %5914 = vmatpush3.bf16.msra.mxu0 %v6423_v14 }
 0x15f   :  { %5936 = vmatpush3.bf16.msra.mxu1 %v6424_v15  ;;  %5915 = vmatprep.subr.bf16.mxu0 %v6425_v16  ;;  %v6460_v16 = vld [vmem:[#allocation5 + $0x54] ss:$8 sps:$4 sm:$0xff]  }
 0x160   :  { %5937 = vmatprep.subr.bf16.mxu1 %v6426_v17  ;;  %v6458_v17 = vld [vmem:[#allocation5 + $0x50] ss:$8 sps:$4 sm:$0xff]  }
 0x162   :  { %5916 = vmatpush3.bf16.msra.mxu0 %v6427_v18  ;;  %v6463_v18 = vld [vmem:[#allocation5 + $0x64] ss:$8 sps:$4 sm:$0xff]  }
 0x163   :  { %5938 = vmatpush3.bf16.msra.mxu1 %v6428_v19  ;;  %5917 = vmatprep.subr.bf16.mxu0 %v6429_v20  ;;  %v6461_v19 = vld [vmem:[#allocation5 + $0x60] ss:$8 sps:$4 sm:$0xff]   ;;  %v6466_v20 = vld [vmem:[#allocation5 + $0x74] ss:$8 sps:$4 sm:$0xff]  }
 0x164   :  { %5939 = vmatprep.subr.bf16.mxu1 %v6430_v21  ;;  %v6464_v21 = vld [vmem:[#allocation5 + $0x70] ss:$8 sps:$4 sm:$0xff]  }
 0x166   :  { %5918 = vmatpush3.bf16.msra.mxu0 %v6431_v22  ;;  %v7036_v22 = vmov 0  }
 0x167   :  { %5940 = vmatpush3.bf16.msra.mxu1 %v6432_v23  ;;  %5919 = vmatprep.subr.bf16.mxu0 %v6433_v24  ;;  %v6467_v23 = vld [vmem:[#allocation7] ss:$12 sps:$4 sm:$0xff]   ;;  %v6469_v24 = vld [vmem:[#allocation7 + $0x4] ss:$12 sps:$4 sm:$0xff]  }
 0x168   :  { %5941 = vmatprep.subr.bf16.mxu1 %v6434_v25  ;;  %v6472_v25 = vld [vmem:[#allocation7 + $0x1c] ss:$12 sps:$4 sm:$0xff]  }
 0x16a   :  { %5920 = vmatpush3.bf16.msra.mxu0 %v6435_v26  ;;  %v6470_v26 = vld [vmem:[#allocation7 + $0x18] ss:$12 sps:$4 sm:$0xff]  }
 0x16b   :  { %5942 = vmatpush3.bf16.msra.mxu1 %v6436_v27  ;;  %2624 = vmatprep.subr.bf16.mxu0 %v6445_v59  ;;  %v6475_v27 = vld [vmem:[#allocation7 + $0x34] ss:$12 sps:$4 sm:$0xff]   ;;  %v6508_v59 = vld [vmem:[#allocation7 + $0x10c] ss:$12 sps:$4 sm:$0xff]  }
 0x16c   :  { %3006 = vmatprep.subr.bf16.mxu1 %v6469_v24 }
 0x16d   :  { %2467 = vmatmul.mubr.bf16.vlgmr.msra.gmra.mrb[20].mxu0 %v487_v44  ;;  %v6484_v44 = vld [vmem:[#allocation7 + $0x7c] ss:$12 sps:$4 sm:$0xff]  }
 0x16e   :  { %2507 = vmatmul.mubr.bf16.vlgmr.msra.gmra.mrb[20].mxu1 %v489_v45  ;;  %2625 = vmatpush1.bf16.msra.mxu0 %v6443_v58  ;;  %v6501_v58 = vld [vmem:[#allocation7 + $0xf0] ss:$12 sps:$4 sm:$0xff]  }
 0x16f   :  { %2626 = vmatprep.subr.bf16.mxu0 %v6448_v60  ;;  %2656 = vmatprep.mubr.bf16.mxu0 %v7036_v22  ;;  %v6506_v60 = vld [vmem:[#allocation7 + $0x108] ss:$12 sps:$4 sm:$0xff]  }
 0x170   :  { %3007 = vmatpush1.bf16.msra.mxu1 %v6467_v23 }
 0x171   :  { %3008 = vmatprep.subr.bf16.mxu1 %v6472_v25 }
 0x172   :  { %2627 = vmatpush1.bf16.msra.mxu0 %v6446_v61  ;;  %v6513_v61 = vld [vmem:[#allocation7 + $0x124] ss:$12 sps:$4 sm:$0xff]  }
 0x173   :  { %2628 = vmatprep.subr.bf16.mxu0 %v6451_v62 }
 0x174   :  { %3009 = vmatpush1.bf16.msra.mxu1 %v6470_v26 }
 0x175   :  { %3010 = vmatprep.subr.bf16.mxu1 %v6475_v27 }
 0x176   :  { %2629 = vmatpush1.bf16.msra.mxu0 %v6449_v63 }
 0x177   :  { %2630 = vmatprep.subr.bf16.mxu0 %v6454_v0 }
 0x178   :  { %3011 = vmatpush1.bf16.msra.mxu1 %v6473_v29 }
 0x179   :  { %3012 = vmatprep.subr.bf16.mxu1 %v6478_v30 }
 0x17a   :  { %2631 = vmatpush1.bf16.msra.mxu0 %v6452_v1  ;;  %v6511_v1 = vld [vmem:[#allocation7 + $0x120] ss:$12 sps:$4 sm:$0xff]  }
 0x17b   :  { %2632 = vmatprep.subr.bf16.mxu0 %v6457_v2 }
 0x17c   :  { %3013 = vmatpush1.bf16.msra.mxu1 %v6476_v31 }
 0x17d   :  { %3014 = vmatprep.subr.bf16.mxu1 %v6481_v33 }
 0x17e   :  { %2633 = vmatpush1.bf16.msra.mxu0 %v6455_v3 }
 0x17f   :  { %2634 = vmatprep.subr.bf16.mxu0 %v6460_v16 }
 0x180   :  { %3015 = vmatpush1.bf16.msra.mxu1 %v6479_v43  ;;  %v6499_v43 = vld [vmem:[#allocation7 + $0xe0] ss:$12 sps:$4 sm:$0xff]  }
 0x181   :  { %3016 = vmatprep.subr.bf16.mxu1 %v6484_v44  ;;  %v6500_v44 = vld [vmem:[#allocation7 + $0x20] ss:$12 sps:$4 sm:$0xff]  }
 0x182   :  { %2635 = vmatpush1.bf16.msra.mxu0 %v6458_v17 }
 0x183   :  { %2636 = vmatprep.subr.bf16.mxu0 %v6463_v18 }
 0x186   :  { %2637 = vmatpush1.bf16.msra.mxu0 %v6461_v19 }
 0x187   :  { %2638 = vmatprep.subr.bf16.mxu0 %v6466_v20 }
 0x18a   :  { %2639 = vmatpush1.bf16.msra.mxu0 %v6464_v21 }
 0x18b   :  { %5949 = vmatprep.subr.bf16.mxu0 %v6494_v28 }
 0x1a0   :  { %v5701_v47 = vpop.f32.mrb[0].mxu0 }
 0x1a1   :  { %v5723_v37 = vpop.f32.mrb[0].mxu1  ;;  %v5702_v48 = vpop.f32.mrb[1].mxu0 }
 0x1a2   :  { %v5703_v49 = vadd.f32 %v5702_v48, %v5701_v47  ;;  %v5724_v50 = vpop.f32.mrb[1].mxu1  ;;  %v5704_v51 = vpop.f32.mrb[2].mxu0 }
 0x1a3   :  { %v5725_v52 = vadd.f32 %v5724_v50, %v5723_v37  ;;  %v5726_v53 = vpop.f32.mrb[2].mxu1  ;;  %v5705_v54 = vpop.f32.mrb[3].mxu0  ;;  %v6482_v37 = vld [vmem:[#allocation7 + $0x78] ss:$12 sps:$4 sm:$0xff]   ;;  %v6485_v50 = vld [vmem:[#allocation7 + $0x90] ss:$12 sps:$4 sm:$0xff]  }
 0x1a4   :  { %v2069_v55 = vadd.f32 %v5703_v49, %v5208_v46  ;;  %v5727_v56 = vpop.f32.mrb[3].mxu1  ;;  %v6487_v49 = vld [vmem:[#allocation7 + $0x94] ss:$12 sps:$4 sm:$0xff]   ;;  %v6490_v51 = vld [vmem:[#allocation7 + $0xac] ss:$12 sps:$4 sm:$0xff]   ;;  %3017 = vmatpush1.bf16.msra.mxu1 %v6482_v37 }
 0x1a5   :  { %3018 = vmatprep.subr.bf16.mxu1 %v6487_v49  ;;  %v6493_v53 = vld [vmem:[#allocation7 + $0xc4] ss:$12 sps:$4 sm:$0xff]   ;;  %v6491_v54 = vld [vmem:[#allocation7 + $0xc0] ss:$12 sps:$4 sm:$0xff]   ;;  %v6515_v49 = vld [vmem:[#allocation7 + $0x68] ss:$12 sps:$4 sm:$0xff]  }
 0x1a6   :  { %v2109_v57 = vadd.f32 %v5725_v52, %v2069_v55  ;;  %v6488_v52 = vld [vmem:[#allocation7 + $0xa8] ss:$12 sps:$4 sm:$0xff]   ;;  %v6496_v56 = vld [vmem:[#allocation7 + $0xd8] ss:$12 sps:$4 sm:$0xff]   ;;  %v6510_v37 = vld [vmem:[#allocation7 + $0x50] ss:$12 sps:$4 sm:$0xff]  }
 0x1a7   :  { %v6498_v55 = vld [vmem:[#allocation7 + $0xdc] ss:$12 sps:$4 sm:$0xff]  }
 0x1a8   :  { %3019 = vmatpush1.bf16.msra.mxu1 %v6485_v50  ;;  %v6519_v50 = vld [vmem:[#allocation7 + $0x140] ss:$12 sps:$4 sm:$0xff]  }
 0x1a9   :  { %3020 = vmatprep.subr.bf16.mxu1 %v6490_v51  ;;  %v6520_v51 = vld [vmem:[#allocation7 + $0x80] ss:$12 sps:$4 sm:$0xff]  }
 0x1ac   :  { %3021 = vmatpush1.bf16.msra.mxu1 %v6488_v52  ;;  %v6523_v52 = vld [vmem:[#allocation7 + $0x154] ss:$12 sps:$4 sm:$0xff]  }
 0x1ad   :  { %3022 = vmatprep.subr.bf16.mxu1 %v6493_v53  ;;  %v6524_v53 = vld [vmem:[#allocation7 + $0x158] ss:$12 sps:$4 sm:$0xff]  }
 0x1b0   :  { %3023 = vmatpush1.bf16.msra.mxu1 %v6491_v54  ;;  %v6521_v54 = vld [vmem:[#allocation7 + $0x150] ss:$12 sps:$4 sm:$0xff]  }
 0x1b1   :  { %3024 = vmatprep.subr.bf16.mxu1 %v6498_v55  ;;  %v6525_v55 = vld [vmem:[#allocation7 + $0x98] ss:$12 sps:$4 sm:$0xff]  }
 0x1b4   :  { %3025 = vmatpush1.bf16.msra.mxu1 %v6496_v56  ;;  %v6528_v56 = vld [vmem:[#allocation7 + $0x16c] ss:$12 sps:$4 sm:$0xff]  }
 0x1c0   :  { %v5745_v4 = vpop.f32.mrb[4].mxu0 }
 0x1c1   :  { %v5767_v5 = vpop.f32.mrb[4].mxu1  ;;  %v5746_v6 = vpop.f32.mrb[5].mxu0 }
 0x1c2   :  { %v5747_v7 = vadd.f32 %v5746_v6, %v5745_v4  ;;  %v5768_v8 = vpop.f32.mrb[5].mxu1  ;;  %v5748_v9 = vpop.f32.mrb[6].mxu0 }
 0x1c3   :  { %v5769_v10 = vadd.f32 %v5768_v8, %v5767_v5  ;;  %v5770_v11 = vpop.f32.mrb[6].mxu1  ;;  %v5749_v12 = vpop.f32.mrb[7].mxu0  ;;  %v6518_v5 = vld [vmem:[#allocation7 + $0x13c] ss:$12 sps:$4 sm:$0xff]  }
 0x1c4   :  { %v2149_v13 = vadd.f32 %v5747_v7, %v2109_v57  ;;  %v5771_v14 = vpop.f32.mrb[7].mxu1  ;;  %v6503_v57 = vld [vmem:[#allocation7 + $0xf4] ss:$12 sps:$4 sm:$0xff]   ;;  %v6516_v11 = vld [vmem:[#allocation7 + $0x138] ss:$12 sps:$4 sm:$0xff]  }
 0x1c5   :  { %3026 = vmatprep.subr.bf16.mxu1 %v6503_v57  ;;  %v6529_v57 = vld [vmem:[#allocation7 + $0x170] ss:$12 sps:$4 sm:$0xff]  }
 0x1c6   :  { %v2189_v15 = vadd.f32 %v5769_v10, %v2149_v13  ;;  %3027 = vmatpush1.bf16.msra.mxu1 %v6501_v58  ;;  %v6526_v58 = vld [vmem:[#allocation7 + $0x168] ss:$12 sps:$4 sm:$0xff]  }
 0x1c7   :  { %3028 = vmatprep.subr.bf16.mxu1 %v6508_v59  ;;  %v6530_v59 = vld [vmem:[#allocation7 + $0xb0] ss:$12 sps:$4 sm:$0xff]  }
 0x1ca   :  { %3029 = vmatpush1.bf16.msra.mxu1 %v6506_v60  ;;  %v6533_v60 = vld [vmem:[#allocation8 + $0x4] ss:$12 sps:$4 sm:$0xff]  }
 0x1cb   :  { %3030 = vmatprep.subr.bf16.mxu1 %v6513_v61  ;;  %v6558_v61 = vld [vmem:[#allocation8 + $0xc8] ss:$12 sps:$4 sm:$0xff]  }
 0x1ce   :  { %3031 = vmatpush1.bf16.msra.mxu1 %v6511_v1 }
 0x1cf   :  { %3032 = vmatprep.subr.bf16.mxu1 %v6518_v5 }
 0x1d2   :  { %3033 = vmatpush1.bf16.msra.mxu1 %v6516_v11 }
 0x1d3   :  { %3034 = vmatprep.subr.bf16.mxu1 %v6523_v52  ;;  %v6580_v52 = vld [vmem:[#allocation8 + $0x138] ss:$12 sps:$4 sm:$0xff]  }
 0x1d6   :  { %3035 = vmatpush1.bf16.msra.mxu1 %v6521_v54  ;;  %v6588_v54 = vld [vmem:[#allocation8 + $0x158] ss:$12 sps:$4 sm:$0xff]  }
 0x1d7   :  { %3036 = vmatprep.subr.bf16.mxu1 %v6528_v56  ;;  %v6589_v56 = vld [vmem:[#allocation8 + $0x98] ss:$12 sps:$4 sm:$0xff]  }
 0x1da   :  { %3037 = vmatpush1.bf16.msra.mxu1 %v6526_v58  ;;  %v6593_v58 = vld [vmem:[#allocation8 + $0x170] ss:$12 sps:$4 sm:$0xff]  }
 0x1db   :  { %5971 = vmatprep.subr.bf16.mxu1 %v6558_v61  ;;  %v6597_v61 = vld [vmem:[#allocation8 + $0x184] ss:$12 sps:$4 sm:$0xff]  }
 0x1e0   :  { %v5789_v34 = vpop.f32.mrb[8].mxu0 }
 0x1e1   :  { %v5811_v35 = vpop.f32.mrb[8].mxu1  ;;  %v5790_v36 = vpop.f32.mrb[9].mxu0 }
 0x1e2   :  { %v5812_v38 = vpop.f32.mrb[9].mxu1  ;;  %v5791_v39 = vadd.f32 %v5790_v36, %v5789_v34  ;;  %v5792_v41 = vpop.f32.mrb[10].mxu0 }
 0x1e3   :  { %v5813_v40 = vadd.f32 %v5812_v38, %v5811_v35  ;;  %v5814_v42 = vpop.f32.mrb[10].mxu1  ;;  %v5793_v45 = vpop.f32.mrb[11].mxu0  ;;  %v6495_v41 = vld [vmem:[#allocation7 + $0x8] ss:$12 sps:$4 sm:$0xff]  }
 0x1e4   :  { %v5815_v46 = vpop.f32.mrb[11].mxu1  ;;  %v2229_v47 = vadd.f32 %v5791_v39, %v2189_v15  ;;  %v6504_v45 = vld [vmem:[#allocation7 + $0xf8] ss:$12 sps:$4 sm:$0xff]  }
 0x1e5   :  { %v6505_v46 = vld [vmem:[#allocation7 + $0x38] ss:$12 sps:$4 sm:$0xff]  }
 0x1e6   :  { %v2269_v48 = vadd.f32 %v5813_v40, %v2229_v47  ;;  %v6509_v47 = vld [vmem:[#allocation7 + $0x110] ss:$12 sps:$4 sm:$0xff]  }
 0x200   :  { %v5833_v62 = vpop.f32.mrb[12].mxu0 }
 0x201   :  { %v5855_v63 = vpop.f32.mrb[12].mxu1  ;;  %v5834_v0 = vpop.f32.mrb[13].mxu0 }
 0x202   :  { %v5835_v2 = vadd.f32 %v5834_v0, %v5833_v62  ;;  %v5856_v3 = vpop.f32.mrb[13].mxu1  ;;  %v5836_v4 = vpop.f32.mrb[14].mxu0  ;;  %v7392_v62 = vsub.s32 0, %v7286_v32  ;;  %v7398_v0 = vsub.s32 1, %v7286_v32 }
 0x203   :  { %v5857_v6 = vadd.f32 %v5856_v3, %v5855_v63  ;;  %v5858_v7 = vpop.f32.mrb[14].mxu1  ;;  %v5837_v8 = vpop.f32.mrb[15].mxu0  ;;  %v2532_v63 = vld [vmem:[%s7651_s30] sm:$0x3] }
 0x204   :  { %v2309_v9 = vadd.f32 %v5835_v2, %v2269_v48  ;;  %v5859_v10 = vpop.f32.mrb[15].mxu1  ;;  %v6514_v48 = vld [vmem:[#allocation7 + $0x128] ss:$12 sps:$4 sm:$0xff]   ;;  %v2537_v1 = vrot.slane %v2532_v63, %v7392_v62  ;;  %v2541_v2 = vrot.slane %v2532_v63, %v7398_v0  ;;  %v7037_v63 = vmov 0.0  }
 0x206   :  { %v2349_v12 = vadd.f32 %v5857_v6, %v2309_v9 }
 0x220   :  { %v5877_v13 = vpop.f32.mrb[16].mxu0 }
 0x221   :  { %v5899_v14 = vpop.f32.mrb[16].mxu1  ;;  %v5878_v15 = vpop.f32.mrb[17].mxu0 }
 0x222   :  { %v5879_v16 = vadd.f32 %v5878_v15, %v5877_v13  ;;  %v5900_v17 = vpop.f32.mrb[17].mxu1  ;;  %v5880_v18 = vpop.f32.mrb[18].mxu0  ;;  %v6559_v13 = vld [vmem:[#allocation8 + $0x8] ss:$12 sps:$4 sm:$0xff]  }
 0x223   :  { %v5901_v19 = vadd.f32 %v5900_v17, %v5899_v14  ;;  %v5902_v20 = vpop.f32.mrb[18].mxu1  ;;  %v5881_v21 = vpop.f32.mrb[19].mxu0  ;;  %v6536_v15 = vld [vmem:[#allocation8 + $0x1c] ss:$12 sps:$4 sm:$0xff]   ;;  %v6534_v17 = vld [vmem:[#allocation8 + $0x18] ss:$12 sps:$4 sm:$0xff]  }
 0x224   :  { %v2389_v23 = vadd.f32 %v5879_v16, %v2349_v12  ;;  %v5903_v24 = vpop.f32.mrb[19].mxu1  ;;  %v6531_v12 = vld [vmem:[#allocation8] ss:$12 sps:$4 sm:$0xff]   ;;  %v6568_v20 = vld [vmem:[#allocation8 + $0xf8] ss:$12 sps:$4 sm:$0xff]  }
 0x225   :  { %v6563_v16 = vld [vmem:[#allocation8 + $0xe0] ss:$12 sps:$4 sm:$0xff]   ;;  %v6537_v21 = vld [vmem:[#allocation8 + $0x30] ss:$12 sps:$4 sm:$0xff]  }
 0x226   :  { %v2429_v25 = vadd.f32 %v5901_v19, %v2389_v23  ;;  %v6564_v18 = vld [vmem:[#allocation8 + $0x20] ss:$12 sps:$4 sm:$0xff]   ;;  %v6569_v23 = vld [vmem:[#allocation8 + $0x38] ss:$12 sps:$4 sm:$0xff]  }
 0x227   :  { %v6539_v19 = vld [vmem:[#allocation8 + $0x34] ss:$12 sps:$4 sm:$0xff]   ;;  %v6542_v24 = vld [vmem:[#allocation8 + $0x4c] ss:$12 sps:$4 sm:$0xff]  }
 0x240   :  { %v5921_v26 = vpop.f32.mrb[20].mxu0 }
 0x241   :  { %v5943_v27 = vpop.f32.mrb[20].mxu1  ;;  %v5922_v28 = vpop.f32.mrb[21].mxu0 }
 0x242   :  { %v5944_v29 = vpop.f32.mrb[21].mxu1  ;;  %v5923_v30 = vadd.f32 %v5922_v28, %v5921_v26  ;;  %v5924_v33 = vpop.f32.mrb[22].mxu0  ;;  %v6540_v26 = vld [vmem:[#allocation8 + $0x48] ss:$12 sps:$4 sm:$0xff]   ;;  %v6545_v28 = vld [vmem:[#allocation8 + $0x64] ss:$12 sps:$4 sm:$0xff]  }
 0x243   :  { %v5945_v31 = vadd.f32 %v5944_v29, %v5943_v27  ;;  %v5946_v34 = vpop.f32.mrb[22].mxu1  ;;  %v5925_v35 = vpop.f32.mrb[23].mxu0  ;;  %v6574_v27 = vld [vmem:[#allocation8 + $0x50] ss:$12 sps:$4 sm:$0xff]   ;;  %v6578_v29 = vld [vmem:[#allocation8 + $0x128] ss:$12 sps:$4 sm:$0xff]  }
 0x244   :  { %v5947_v36 = vpop.f32.mrb[23].mxu1  ;;  %v2469_v38 = vadd.f32 %v5923_v30, %v2429_v25  ;;  %v6573_v25 = vld [vmem:[#allocation8 + $0x110] ss:$12 sps:$4 sm:$0xff]   ;;  %v6543_v30 = vld [vmem:[#allocation8 + $0x60] ss:$12 sps:$4 sm:$0xff]  }
 0x245   :  { %v6548_v33 = vld [vmem:[#allocation8 + $0x7c] ss:$12 sps:$4 sm:$0xff]   ;;  %v6583_v34 = vld [vmem:[#allocation8 + $0x140] ss:$12 sps:$4 sm:$0xff]   ;;  %v6546_v35 = vld [vmem:[#allocation8 + $0x78] ss:$12 sps:$4 sm:$0xff]  }
 0x246   :  { %v2509_v39 = vadd.f32 %v5945_v31, %v2469_v38  ;;  %v6579_v31 = vld [vmem:[#allocation8 + $0x68] ss:$12 sps:$4 sm:$0xff]   ;;  %v6584_v36 = vld [vmem:[#allocation8 + $0x80] ss:$12 sps:$4 sm:$0xff]  }
 0x247   :  { %v6551_v38 = vld [vmem:[#allocation8 + $0x94] ss:$12 sps:$4 sm:$0xff]  }
 0x248   :  { %v2514_v40 = vmax.f32 %v2509_v39, 0.0  ;;  %v6549_v39 = vld [vmem:[#allocation8 + $0x90] ss:$12 sps:$4 sm:$0xff]  }
 0x24a   :  { %v2515_v42 = vpack.c.bf16 %v2514_v40, %v2514_v40  ;;  %v6554_v40 = vld [vmem:[#allocation8 + $0xac] ss:$12 sps:$4 sm:$0xff]  }
 0x24c   :  { %2657 = vmatmul.mubr.bf16.vlgmr.msra.gmra.mrb[24].mxu0 %v2515_v42  ;;  %v6557_v42 = vld [vmem:[#allocation8 + $0xc4] ss:$12 sps:$4 sm:$0xff]  }
 0x24d   :  { %5950 = vmatpush3.bf16.msra.mxu0 %v6495_v41  ;;  %v6552_v41 = vld [vmem:[#allocation8 + $0xa8] ss:$12 sps:$4 sm:$0xff]  }
 0x24e   :  { %5951 = vmatprep.subr.bf16.mxu0 %v6499_v43  ;;  %v6555_v43 = vld [vmem:[#allocation8 + $0xc0] ss:$12 sps:$4 sm:$0xff]  }
 0x251   :  { %5952 = vmatpush3.bf16.msra.mxu0 %v6500_v44  ;;  %v6562_v44 = vld [vmem:[#allocation8 + $0xdc] ss:$12 sps:$4 sm:$0xff]  }
 0x252   :  { %5953 = vmatprep.subr.bf16.mxu0 %v6504_v45  ;;  %v6560_v45 = vld [vmem:[#allocation8 + $0xd8] ss:$12 sps:$4 sm:$0xff]  }
 0x255   :  { %5954 = vmatpush3.bf16.msra.mxu0 %v6505_v46  ;;  %v6567_v46 = vld [vmem:[#allocation8 + $0xf4] ss:$12 sps:$4 sm:$0xff]  }
 0x256   :  { %5955 = vmatprep.subr.bf16.mxu0 %v6509_v47  ;;  %v6565_v47 = vld [vmem:[#allocation8 + $0xf0] ss:$12 sps:$4 sm:$0xff]  }
 0x259   :  { %5956 = vmatpush3.bf16.msra.mxu0 %v6510_v37  ;;  %v6572_v37 = vld [vmem:[#allocation8 + $0x10c] ss:$12 sps:$4 sm:$0xff]  }
 0x25a   :  { %5957 = vmatprep.subr.bf16.mxu0 %v6514_v48  ;;  %v6570_v48 = vld [vmem:[#allocation8 + $0x108] ss:$12 sps:$4 sm:$0xff]  }
 0x25d   :  { %5958 = vmatpush3.bf16.msra.mxu0 %v6515_v49  ;;  %v6577_v49 = vld [vmem:[#allocation8 + $0x124] ss:$12 sps:$4 sm:$0xff]  }
 0x25e   :  { %5959 = vmatprep.subr.bf16.mxu0 %v6519_v50  ;;  %v6575_v50 = vld [vmem:[#allocation8 + $0x120] ss:$12 sps:$4 sm:$0xff]  }
 0x261   :  { %5960 = vmatpush3.bf16.msra.mxu0 %v6520_v51  ;;  %v6582_v51 = vld [vmem:[#allocation8 + $0x13c] ss:$12 sps:$4 sm:$0xff]  }
 0x262   :  { %5961 = vmatprep.subr.bf16.mxu0 %v6524_v53  ;;  %v6587_v53 = vld [vmem:[#allocation8 + $0x154] ss:$12 sps:$4 sm:$0xff]  }
 0x265   :  { %5962 = vmatpush3.bf16.msra.mxu0 %v6525_v55  ;;  %v6585_v55 = vld [vmem:[#allocation8 + $0x150] ss:$12 sps:$4 sm:$0xff]  }
 0x266   :  { %5963 = vmatprep.subr.bf16.mxu0 %v6529_v57  ;;  %v6592_v57 = vld [vmem:[#allocation8 + $0x16c] ss:$12 sps:$4 sm:$0xff]  }
 0x269   :  { %5964 = vmatpush3.bf16.msra.mxu0 %v6530_v59  ;;  %v6590_v59 = vld [vmem:[#allocation8 + $0x168] ss:$12 sps:$4 sm:$0xff]  }
 0x26a   :  { %3590 = vmatprep.subr.bf16.mxu0 %v6533_v60  ;;  %v6594_v60 = vld [vmem:[#allocation8 + $0xb0] ss:$12 sps:$4 sm:$0xff]  }
 0x31f   :  { %v2658_v3 = vpop.f32.mrb[24].mxu0 }
 0x320   :  { %v2659_v4 = vadd.f32 %v2658_v3, %v2537_v1  ;;  %v2660_v5 = vpop.f32.mrb[25].mxu0  ;;  %v7406_v1 = vld [vmem:[%s7611_s6] sm:$0x7] }
 0x321   :  { %v2661_v6 = vadd.f32 %v2660_v5, %v2541_v2  ;;  %v2662_v7 = vpop.f32.mrb[26].mxu0  ;;  %v2738_v2 = vrot.slane %v7406_v1, %v7392_v62  ;;  %v2742_v3 = vrot.slane %v7406_v1, %v7398_v0 }
 0x322   :  { %v2665_v8 = vmax.f32 %v2659_v4, 0.0  ;;  %v2663_v9 = vpop.f32.mrb[27].mxu0 }
 0x323   :  { %v2666_v10 = vmax.f32 %v2661_v6, 0.0 }
 0x324   :  { %v2667_v14 = vpack.c.bf16 %v2665_v8, %v2665_v8 }
 0x325   :  { %v2668_v11 = vpack.c.bf16 %v2666_v10, %v2666_v10 }
 0x327   :  { %3038 = vmatprep.mubr.bf16.mxu1 %v2668_v11  ;;  %3079 = vmatprep.mubr.bf16.mxu0 %v2668_v11 }
 0x328   :  { %3039 = vmatmul.mubr.bf16.vlgmr.msra.gmra.mrb[24].mxu1 %v2667_v14  ;;  %3080 = vmatmul.mubr.bf16.vlgmr.msra.gmra.mrb[28].mxu0 %v2667_v14 }
 0x329   :  { %3591 = vmatpush1.bf16.msra.mxu0 %v6531_v12  ;;  %5972 = vmatpush3.bf16.msra.mxu1 %v6559_v13 }
 0x32a   :  { %3592 = vmatprep.subr.bf16.mxu0 %v6536_v15  ;;  %5973 = vmatprep.subr.bf16.mxu1 %v6563_v16 }
 0x32d   :  { %3593 = vmatpush1.bf16.msra.mxu0 %v6534_v17  ;;  %5974 = vmatpush3.bf16.msra.mxu1 %v6564_v18  ;;  %v6595_v18 = vld [vmem:[#allocation8 + $0x180] ss:$12 sps:$4 sm:$0xff]  }
 0x32e   :  { %3594 = vmatprep.subr.bf16.mxu0 %v6539_v19  ;;  %5975 = vmatprep.subr.bf16.mxu1 %v6568_v20  ;;  %v6598_v19 = vld [vmem:[#allocation8 + $0x188] ss:$12 sps:$4 sm:$0xff]  }
 0x331   :  { %3595 = vmatpush1.bf16.msra.mxu0 %v6537_v21  ;;  %5976 = vmatpush3.bf16.msra.mxu1 %v6569_v23  ;;  %v6601_v21 = vld [vmem:[#allocation8 + $0x19c] ss:$12 sps:$4 sm:$0xff]   ;;  %v6599_v23 = vld [vmem:[#allocation8 + $0x198] ss:$12 sps:$4 sm:$0xff]  }
 0x332   :  { %3596 = vmatprep.subr.bf16.mxu0 %v6542_v24  ;;  %5977 = vmatprep.subr.bf16.mxu1 %v6573_v25  ;;  %v6602_v24 = vld [vmem:[#allocation8 + $0x1a0] ss:$12 sps:$4 sm:$0xff]  }
 0x333   :  { %v6605_v25 = vld [vmem:[#allocation8 + $0x1b4] ss:$12 sps:$4 sm:$0xff]  }
 0x335   :  { %3597 = vmatpush1.bf16.msra.mxu0 %v6540_v26  ;;  %5978 = vmatpush3.bf16.msra.mxu1 %v6574_v27  ;;  %v6603_v26 = vld [vmem:[#allocation8 + $0x1b0] ss:$12 sps:$4 sm:$0xff]   ;;  %v6606_v27 = vld [vmem:[#allocation8 + $0x1b8] ss:$12 sps:$4 sm:$0xff]  }
 0x336   :  { %3598 = vmatprep.subr.bf16.mxu0 %v6545_v28  ;;  %5979 = vmatprep.subr.bf16.mxu1 %v6578_v29  ;;  %v6609_v28 = vld [vmem:[#allocation8 + $0x1cc] ss:$12 sps:$4 sm:$0xff]   ;;  %v6607_v29 = vld [vmem:[#allocation8 + $0x1c8] ss:$12 sps:$4 sm:$0xff]  }
 0x339   :  { %3599 = vmatpush1.bf16.msra.mxu0 %v6543_v30  ;;  %5980 = vmatpush3.bf16.msra.mxu1 %v6579_v31  ;;  %v6610_v30 = vld [vmem:[#allocation8 + $0x1d0] ss:$12 sps:$4 sm:$0xff]  }
 0x33a   :  { %3600 = vmatprep.subr.bf16.mxu0 %v6548_v33  ;;  %5981 = vmatprep.subr.bf16.mxu1 %v6583_v34  ;;  %v6613_v31 = vld [vmem:[#allocation8 + $0x1e4] ss:$12 sps:$4 sm:$0xff]   ;;  %v6611_v33 = vld [vmem:[#allocation8 + $0x1e0] ss:$12 sps:$4 sm:$0xff]   ;;  %v6614_v34 = vld [vmem:[#allocation8 + $0x1e8] ss:$12 sps:$4 sm:$0xff]  }
 0x33d   :  { %3601 = vmatpush1.bf16.msra.mxu0 %v6546_v35  ;;  %5982 = vmatpush3.bf16.msra.mxu1 %v6584_v36  ;;  %v7419_v35 = vsub.s32 2, %v7286_v32  ;;  %v6617_v36 = vld [vmem:[#allocation8 + $0x1fc] ss:$12 sps:$4 sm:$0xff]   ;;  %v6622_v32 = vld [vmem:[#allocation8 + $0x218] ss:$12 sps:$4 sm:$0xff]  }
 0x33e   :  { %3602 = vmatprep.subr.bf16.mxu0 %v6551_v38  ;;  %5983 = vmatprep.subr.bf16.mxu1 %v6588_v54  ;;  %v6615_v38 = vld [vmem:[#allocation8 + $0x1f8] ss:$12 sps:$4 sm:$0xff]   ;;  %v6638_v54 = vld [vmem:[#allocation10 + $0x34] ss:$8 sps:$4 sm:$0xff]  }
 0x341   :  { %3603 = vmatpush1.bf16.msra.mxu0 %v6549_v39  ;;  %5984 = vmatpush3.bf16.msra.mxu1 %v6589_v56  ;;  %v6618_v39 = vld [vmem:[#allocation8 + $0x200] ss:$12 sps:$4 sm:$0xff]  }
 0x342   :  { %3604 = vmatprep.subr.bf16.mxu0 %v6554_v40  ;;  %5985 = vmatprep.subr.bf16.mxu1 %v6593_v58  ;;  %v2746_v40 = vrot.slane %v7406_v1, %v7419_v35  ;;  %v6641_v56 = vld [vmem:[#allocation10 + $0x44] ss:$8 sps:$4 sm:$0xff]   ;;  %v6644_v58 = vld [vmem:[#allocation10 + $0x54] ss:$8 sps:$4 sm:$0xff]  }
 0x343   :  { %v6650_v1 = vld [vmem:[#allocation10 + $0x74] ss:$8 sps:$4 sm:$0xff]  }
 0x345   :  { %3605 = vmatpush1.bf16.msra.mxu0 %v6552_v41  ;;  %5986 = vmatpush3.bf16.msra.mxu1 %v6594_v60  ;;  %v6621_v41 = vld [vmem:[#allocation8 + $0x214] ss:$12 sps:$4 sm:$0xff]   ;;  %v6647_v60 = vld [vmem:[#allocation10 + $0x64] ss:$8 sps:$4 sm:$0xff]  }
 0x346   :  { %3606 = vmatprep.subr.bf16.mxu0 %v6557_v42  ;;  %6082 = vmatprep.subr.bf16.mxu1 %v7037_v63  ;;  %v6619_v42 = vld [vmem:[#allocation8 + $0x210] ss:$12 sps:$4 sm:$0xff]  }
 0x349   :  { %3607 = vmatpush1.bf16.msra.mxu0 %v6555_v43 }
 0x34a   :  { %3608 = vmatprep.subr.bf16.mxu0 %v6562_v44  ;;  %v6625_v44 = vld [vmem:[#allocation8 + $0x22c] ss:$12 sps:$4 sm:$0xff]  }
 0x34d   :  { %3609 = vmatpush1.bf16.msra.mxu0 %v6560_v45  ;;  %v6623_v45 = vld [vmem:[#allocation8 + $0x228] ss:$12 sps:$4 sm:$0xff]  }
 0x34e   :  { %3610 = vmatprep.subr.bf16.mxu0 %v6567_v46  ;;  %v6626_v46 = vld [vmem:[#allocation8 + $0x230] ss:$12 sps:$4 sm:$0xff]  }
 0x351   :  { %3611 = vmatpush1.bf16.msra.mxu0 %v6565_v47 }
 0x352   :  { %3612 = vmatprep.subr.bf16.mxu0 %v6572_v37  ;;  %v6629_v37 = vld [vmem:[#allocation10 + $0x4] ss:$8 sps:$4 sm:$0xff]  }
 0x355   :  { %3613 = vmatpush1.bf16.msra.mxu0 %v6570_v48  ;;  %v6627_v48 = vld [vmem:[#allocation10] ss:$8 sps:$4 sm:$0xff]  }
 0x356   :  { %3614 = vmatprep.subr.bf16.mxu0 %v6577_v49 }
 0x359   :  { %3615 = vmatpush1.bf16.msra.mxu0 %v6575_v50  ;;  %v6632_v50 = vld [vmem:[#allocation10 + $0x14] ss:$8 sps:$4 sm:$0xff]  }
 0x35a   :  { %3616 = vmatprep.subr.bf16.mxu0 %v6582_v51  ;;  %v6630_v51 = vld [vmem:[#allocation10 + $0x10] ss:$8 sps:$4 sm:$0xff]  }
 0x35d   :  { %3617 = vmatpush1.bf16.msra.mxu0 %v6580_v52  ;;  %v6635_v52 = vld [vmem:[#allocation10 + $0x24] ss:$8 sps:$4 sm:$0xff]  }
 0x35e   :  { %3618 = vmatprep.subr.bf16.mxu0 %v6587_v53  ;;  %v6633_v53 = vld [vmem:[#allocation10 + $0x20] ss:$8 sps:$4 sm:$0xff]  }
 0x361   :  { %3619 = vmatpush1.bf16.msra.mxu0 %v6585_v55  ;;  %v6636_v55 = vld [vmem:[#allocation10 + $0x30] ss:$8 sps:$4 sm:$0xff]  }
 0x362   :  { %3620 = vmatprep.subr.bf16.mxu0 %v6592_v57  ;;  %v6639_v57 = vld [vmem:[#allocation10 + $0x40] ss:$8 sps:$4 sm:$0xff]  }
 0x365   :  { %3621 = vmatpush1.bf16.msra.mxu0 %v6590_v59  ;;  %v6642_v59 = vld [vmem:[#allocation10 + $0x50] ss:$8 sps:$4 sm:$0xff]  }
 0x366   :  { %3631 = vmatprep.subr.bf16.mxu0 %v6597_v61  ;;  %v6645_v61 = vld [vmem:[#allocation10 + $0x60] ss:$8 sps:$4 sm:$0xff]  }
 0x3fb   :  { %v3040_v4 = vpop.f32.mrb[24].mxu1  ;;  %v5965_v5 = vpop.f32.mrb[28].mxu0 }
 0x3fc   :  { %v3041_v6 = vadd.f32 %v3040_v4, %v2738_v2  ;;  %v3042_v7 = vpop.f32.mrb[25].mxu1  ;;  %v5966_v8 = vpop.f32.mrb[29].mxu0  ;;  %v6648_v2 = vld [vmem:[#allocation10 + $0x70] ss:$8 sps:$4 sm:$0xff]   ;;  %v6651_v4 = vld [vmem:[#allocation10 + $0x80] ss:$8 sps:$4 sm:$0xff]  }
 0x3fd   :  { %v3043_v9 = vadd.f32 %v3042_v7, %v2742_v3  ;;  %v5967_v10 = vadd.f32 %v5966_v8, %v5965_v5  ;;  %v3044_v11 = vpop.f32.mrb[26].mxu1  ;;  %v5968_v12 = vpop.f32.mrb[30].mxu0  ;;  %v6653_v3 = vld [vmem:[#allocation10 + $0x84] ss:$8 sps:$4 sm:$0xff]   ;;  %v6656_v5 = vld [vmem:[#allocation10 + $0x94] ss:$8 sps:$4 sm:$0xff]  }
 0x3fe   :  { %v3087_v13 = vmax.f32 %v3041_v6, 0.0  ;;  %v3045_v14 = vpop.f32.mrb[27].mxu1  ;;  %v5969_v15 = vpop.f32.mrb[31].mxu0  ;;  %v6654_v6 = vld [vmem:[#allocation10 + $0x90] ss:$8 sps:$4 sm:$0xff]  }
 0x3ff   :  { %v3088_v16 = vmax.f32 %v3043_v9, 0.0  ;;  %v3082_v43 = vadd.f32 %v5967_v10, %v2746_v40  ;;  %v6659_v7 = vld [vmem:[#allocation10 + $0xa4] ss:$8 sps:$4 sm:$0xff]   ;;  %v6657_v8 = vld [vmem:[#allocation10 + $0xa0] ss:$8 sps:$4 sm:$0xff]  }
 0x400   :  { %v3090_v20 = vpack.c.bf16 %v3087_v13, %v3087_v13  ;;  %v6662_v9 = vld [vmem:[#allocation10 + $0xb4] ss:$8 sps:$4 sm:$0xff]   ;;  %v6660_v10 = vld [vmem:[#allocation10 + $0xb0] ss:$8 sps:$4 sm:$0xff]   ;;  %v6665_v11 = vld [vmem:[#allocation10 + $0xc4] ss:$8 sps:$4 sm:$0xff]  }
 0x401   :  { %v3091_v17 = vpack.c.bf16 %v3088_v16, %v3088_v16  ;;  %v3089_v47 = vmax.f32 %v3082_v43, 0.0  ;;  %v6663_v12 = vld [vmem:[#allocation10 + $0xc0] ss:$8 sps:$4 sm:$0xff]   ;;  %v6668_v13 = vld [vmem:[#allocation10 + $0xd4] ss:$8 sps:$4 sm:$0xff]  }
 0x402   :  { %v6666_v14 = vld [vmem:[#allocation10 + $0xd0] ss:$8 sps:$4 sm:$0xff]   ;;  %v6671_v15 = vld [vmem:[#allocation10 + $0xe4] ss:$8 sps:$4 sm:$0xff]   ;;  %v6669_v16 = vld [vmem:[#allocation10 + $0xe0] ss:$8 sps:$4 sm:$0xff]  }
 0x403   :  { %3622 = vmatprep.mubr.bf16.mxu0 %v3091_v17  ;;  %3704 = vmatprep.mubr.bf16.mxu1 %v3091_v17  ;;  %v3092_v49 = vpack.c.bf16 %v3089_v47, %v3089_v47  ;;  %v6674_v17 = vld [vmem:[#allocation10 + $0xf4] ss:$8 sps:$4 sm:$0xff]   ;;  %v6725_v40 = vld [vmem:[#allocation11 + $0xc4] ss:$12 sps:$4 sm:$0xff]  }
 0x404   :  { %3623 = vmatmul.mubr.bf16.vlgmr.msra.gmra.mrb[32].mxu0 %v3090_v20  ;;  %3705 = vmatmul.mubr.bf16.vlgmr.msra.gmra.mrb[28].mxu1 %v3090_v20  ;;  %v6699_v20 = vld [vmem:[#allocation11] ss:$12 sps:$4 sm:$0xff]   ;;  %v6737_v47 = vld [vmem:[#allocation11 + $0x124] ss:$12 sps:$4 sm:$0xff]  }
 0x405   :  { %3632 = vmatpush1.bf16.msra.mxu0 %v6595_v18  ;;  %6083 = vmatpush3.bf16.msra.mxu1 %v6598_v19  ;;  %v6672_v18 = vld [vmem:[#allocation10 + $0xf0] ss:$8 sps:$4 sm:$0xff]   ;;  %v6677_v19 = vld [vmem:[#allocation10 + $0x104] ss:$8 sps:$4 sm:$0xff]   ;;  %v6731_v43 = vld [vmem:[#allocation11 + $0xf4] ss:$12 sps:$4 sm:$0xff]  }
 0x406   :  { %3633 = vmatprep.subr.bf16.mxu0 %v6601_v21  ;;  %6084 = vmatprep.subr.bf16.mxu1 %v7037_v63  ;;  %v6701_v21 = vld [vmem:[#allocation11 + $0x4] ss:$12 sps:$4 sm:$0xff]  }
 0x407   :  { %3663 = vmatprep.mubr.bf16.mxu0 %v7036_v22  ;;  %6098 = vmatprep.mubr.msk.bf16.mxu1 %vm7038_vm0, %v7037_v63 }
 0x409   :  { %3634 = vmatpush1.bf16.msra.mxu0 %v6599_v23  ;;  %6085 = vmatpush3.bf16.msra.mxu1 %v6602_v24  ;;  %v6704_v23 = vld [vmem:[#allocation11 + $0x1c] ss:$12 sps:$4 sm:$0xff]   ;;  %v6702_v24 = vld [vmem:[#allocation11 + $0x18] ss:$12 sps:$4 sm:$0xff]  }
 0x40a   :  { %3635 = vmatprep.subr.bf16.mxu0 %v6605_v25  ;;  %6086 = vmatprep.subr.bf16.mxu1 %v7037_v63  ;;  %v6707_v25 = vld [vmem:[#allocation11 + $0x34] ss:$12 sps:$4 sm:$0xff]  }
 0x40d   :  { %3636 = vmatpush1.bf16.msra.mxu0 %v6603_v26  ;;  %6087 = vmatpush3.bf16.msra.mxu1 %v6606_v27  ;;  %v6705_v26 = vld [vmem:[#allocation11 + $0x30] ss:$12 sps:$4 sm:$0xff]   ;;  %v6710_v27 = vld [vmem:[#allocation11 + $0x4c] ss:$12 sps:$4 sm:$0xff]  }
 0x40e   :  { %3637 = vmatprep.subr.bf16.mxu0 %v6609_v28  ;;  %6088 = vmatprep.subr.bf16.mxu1 %v7037_v63  ;;  %v6708_v28 = vld [vmem:[#allocation11 + $0x48] ss:$12 sps:$4 sm:$0xff]  }
 0x411   :  { %3638 = vmatpush1.bf16.msra.mxu0 %v6607_v29  ;;  %6089 = vmatpush3.bf16.msra.mxu1 %v6610_v30  ;;  %v6713_v29 = vld [vmem:[#allocation11 + $0x64] ss:$12 sps:$4 sm:$0xff]   ;;  %v6711_v30 = vld [vmem:[#allocation11 + $0x60] ss:$12 sps:$4 sm:$0xff]  }
 0x412   :  { %3639 = vmatprep.subr.bf16.mxu0 %v6613_v31  ;;  %6090 = vmatprep.subr.bf16.mxu1 %v7037_v63  ;;  %v6716_v31 = vld [vmem:[#allocation11 + $0x7c] ss:$12 sps:$4 sm:$0xff]  }
 0x415   :  { %3640 = vmatpush1.bf16.msra.mxu0 %v6611_v33  ;;  %6091 = vmatpush3.bf16.msra.mxu1 %v6614_v34  ;;  %v6714_v33 = vld [vmem:[#allocation11 + $0x78] ss:$12 sps:$4 sm:$0xff]   ;;  %v6719_v34 = vld [vmem:[#allocation11 + $0x94] ss:$12 sps:$4 sm:$0xff]  }
 0x416   :  { %3641 = vmatprep.subr.bf16.mxu0 %v6617_v36  ;;  %6092 = vmatprep.subr.bf16.mxu1 %v7037_v63  ;;  %v6717_v36 = vld [vmem:[#allocation11 + $0x90] ss:$12 sps:$4 sm:$0xff]  }
 0x419   :  { %3642 = vmatpush1.bf16.msra.mxu0 %v6615_v38  ;;  %6093 = vmatpush3.bf16.msra.mxu1 %v6618_v39  ;;  %v6722_v38 = vld [vmem:[#allocation11 + $0xac] ss:$12 sps:$4 sm:$0xff]   ;;  %v6720_v39 = vld [vmem:[#allocation11 + $0xa8] ss:$12 sps:$4 sm:$0xff]  }
 0x41a   :  { %3643 = vmatprep.subr.bf16.mxu0 %v6621_v41  ;;  %6094 = vmatprep.subr.bf16.mxu1 %v7037_v63  ;;  %v6723_v41 = vld [vmem:[#allocation11 + $0xc0] ss:$12 sps:$4 sm:$0xff]  }
 0x41d   :  { %3644 = vmatpush1.bf16.msra.mxu0 %v6619_v42  ;;  %6095 = vmatpush3.bf16.msra.mxu1 %v6622_v32  ;;  %v6728_v42 = vld [vmem:[#allocation11 + $0xdc] ss:$12 sps:$4 sm:$0xff]   ;;  %v6726_v32 = vld [vmem:[#allocation11 + $0xd8] ss:$12 sps:$4 sm:$0xff]  }
 0x41e   :  { %3645 = vmatprep.subr.bf16.mxu0 %v6625_v44  ;;  %6096 = vmatprep.subr.bf16.mxu1 %v7037_v63  ;;  %v6729_v44 = vld [vmem:[#allocation11 + $0xf0] ss:$12 sps:$4 sm:$0xff]  }
 0x421   :  { %3646 = vmatpush1.bf16.msra.mxu0 %v6623_v45  ;;  %6097 = vmatpush3.bf16.msra.mxu1 %v6626_v46  ;;  %v6734_v45 = vld [vmem:[#allocation11 + $0x10c] ss:$12 sps:$4 sm:$0xff]   ;;  %v6732_v46 = vld [vmem:[#allocation11 + $0x108] ss:$12 sps:$4 sm:$0xff]  }
 0x422   :  { %4058 = vmatprep.subr.bf16.mxu1 %v6629_v37  ;;  %4481 = vmatprep.subr.bf16.mxu0 %v6701_v21  ;;  %v6735_v37 = vld [vmem:[#allocation11 + $0x120] ss:$12 sps:$4 sm:$0xff]  }
 0x423   :  { %v6689_v21 = vld [vmem:[#allocation10 + $0x144] ss:$8 sps:$4 sm:$0xff]  }
 0x424   :  { %3664 = vmatmul.mubr.bf16.vlgmr.msra.gmra.mrb[32].mxu0 %v3092_v49  ;;  %6099 = vmatmul.mubr.bf16.vlgmr.msra.gmra.mrb[32].mxu1 %v3092_v49  ;;  %v6738_v49 = vld [vmem:[#allocation11 + $0x138] ss:$12 sps:$4 sm:$0xff]  }
 0x425   :  { %4059 = vmatpush1.bf16.msra.mxu1 %v6627_v48  ;;  %4482 = vmatpush1.bf16.msra.mxu0 %v6699_v20  ;;  %v6740_v48 = vld [vmem:[#allocation11 + $0x13c] ss:$12 sps:$4 sm:$0xff]   ;;  %v6684_v20 = vld [vmem:[#allocation10 + $0x130] ss:$8 sps:$4 sm:$0xff]  }
 0x426   :  { %4060 = vmatprep.subr.bf16.mxu1 %v6632_v50  ;;  %4483 = vmatprep.subr.bf16.mxu0 %v6704_v23  ;;  %v6687_v23 = vld [vmem:[#allocation10 + $0x140] ss:$8 sps:$4 sm:$0xff]  }
 0x429   :  { %4061 = vmatpush1.bf16.msra.mxu1 %v6630_v51  ;;  %4484 = vmatpush1.bf16.msra.mxu0 %v6702_v24  ;;  %v6692_v24 = vld [vmem:[#allocation10 + $0x154] ss:$8 sps:$4 sm:$0xff]  }
 0x42a   :  { %4062 = vmatprep.subr.bf16.mxu1 %v6635_v52  ;;  %4485 = vmatprep.subr.bf16.mxu0 %v6707_v25  ;;  %v6690_v25 = vld [vmem:[#allocation10 + $0x150] ss:$8 sps:$4 sm:$0xff]  }
 0x42d   :  { %4063 = vmatpush1.bf16.msra.mxu1 %v6633_v53  ;;  %4486 = vmatpush1.bf16.msra.mxu0 %v6705_v26  ;;  %v6695_v26 = vld [vmem:[#allocation10 + $0x164] ss:$8 sps:$4 sm:$0xff]  }
 0x42e   :  { %4064 = vmatprep.subr.bf16.mxu1 %v6638_v54  ;;  %4487 = vmatprep.subr.bf16.mxu0 %v6710_v27  ;;  %v6698_v27 = vld [vmem:[#allocation10 + $0x174] ss:$8 sps:$4 sm:$0xff]  }
 0x431   :  { %4065 = vmatpush1.bf16.msra.mxu1 %v6636_v55  ;;  %4488 = vmatpush1.bf16.msra.mxu0 %v6708_v28  ;;  %v3189_v55 = vld [vmem:[%s7613_s8] sm:$0x7]  ;;  %v6696_v28 = vld [vmem:[#allocation10 + $0x170] ss:$8 sps:$4 sm:$0xff]  }
 0x432   :  { %4066 = vmatprep.subr.bf16.mxu1 %v6641_v56  ;;  %4489 = vmatprep.subr.bf16.mxu0 %v6713_v29  ;;  %v3202_v56 = vrot.slane %v3189_v55, %v7419_v35 }
 0x435   :  { %4067 = vmatpush1.bf16.msra.mxu1 %v6639_v57  ;;  %4490 = vmatpush1.bf16.msra.mxu0 %v6711_v30  ;;  %v3194_v57 = vrot.slane %v3189_v55, %v7392_v62 }
 0x436   :  { %4068 = vmatprep.subr.bf16.mxu1 %v6644_v58  ;;  %4491 = vmatprep.subr.bf16.mxu0 %v6716_v31  ;;  %v3198_v58 = vrot.slane %v3189_v55, %v7398_v0  ;;  %v6743_v31 = vld [vmem:[#allocation11 + $0x154] ss:$12 sps:$4 sm:$0xff]  }
 0x439   :  { %4069 = vmatpush1.bf16.msra.mxu1 %v6642_v59  ;;  %4492 = vmatpush1.bf16.msra.mxu0 %v6714_v33  ;;  %v6741_v33 = vld [vmem:[#allocation11 + $0x150] ss:$12 sps:$4 sm:$0xff]  }
 0x43a   :  { %4070 = vmatprep.subr.bf16.mxu1 %v6647_v60  ;;  %4493 = vmatprep.subr.bf16.mxu0 %v6719_v34  ;;  %v6746_v34 = vld [vmem:[#allocation11 + $0x16c] ss:$12 sps:$4 sm:$0xff]  }
 0x43d   :  { %4071 = vmatpush1.bf16.msra.mxu1 %v6645_v61  ;;  %4494 = vmatpush1.bf16.msra.mxu0 %v6717_v36  ;;  %v6744_v36 = vld [vmem:[#allocation11 + $0x168] ss:$12 sps:$4 sm:$0xff]  }
 0x43e   :  { %4072 = vmatprep.subr.bf16.mxu1 %v6650_v1  ;;  %4495 = vmatprep.subr.bf16.mxu0 %v6722_v38  ;;  %v6747_v38 = vld [vmem:[#allocation11 + $0xc8] ss:$12 sps:$4 sm:$0xff]  }
 0x441   :  { %4073 = vmatpush1.bf16.msra.mxu1 %v6648_v2  ;;  %4496 = vmatpush1.bf16.msra.mxu0 %v6720_v39  ;;  %v6763_v39 = vld [vmem:[%s7618_s13 + $0x40] sm:$0xff]  }
 0x442   :  { %4074 = vmatprep.subr.bf16.mxu1 %v6653_v3  ;;  %4497 = vmatprep.subr.bf16.mxu0 %v6725_v40  ;;  %v6764_v40 = vld [vmem:[%s7618_s13] sm:$0xff]  }
 0x445   :  { %4075 = vmatpush1.bf16.msra.mxu1 %v6651_v4  ;;  %4498 = vmatpush1.bf16.msra.mxu0 %v6723_v41  ;;  %v6765_v41 = vld [vmem:[%s7618_s13 + $0x48] sm:$0xff]  }
 0x446   :  { %4076 = vmatprep.subr.bf16.mxu1 %v6656_v5  ;;  %4499 = vmatprep.subr.bf16.mxu0 %v6728_v42  ;;  %v6766_v42 = vld [vmem:[%s7618_s13 + $0x8] sm:$0xff]  }
 0x449   :  { %4077 = vmatpush1.bf16.msra.mxu1 %v6654_v6  ;;  %4500 = vmatpush1.bf16.msra.mxu0 %v6726_v32  ;;  %v6767_v32 = vld [vmem:[%s7618_s13 + $0x50] sm:$0xff]  }
 0x44a   :  { %4078 = vmatprep.subr.bf16.mxu1 %v6659_v7  ;;  %4501 = vmatprep.subr.bf16.mxu0 %v6731_v43  ;;  %v6768_v43 = vld [vmem:[%s7618_s13 + $0x10] sm:$0xff]  }
 0x44d   :  { %4079 = vmatpush1.bf16.msra.mxu1 %v6657_v8  ;;  %4502 = vmatpush1.bf16.msra.mxu0 %v6729_v44  ;;  %v6769_v44 = vld [vmem:[%s7618_s13 + $0x58] sm:$0xff]  }
 0x44e   :  { %4080 = vmatprep.subr.bf16.mxu1 %v6662_v9  ;;  %4503 = vmatprep.subr.bf16.mxu0 %v6734_v45  ;;  %v6770_v45 = vld [vmem:[%s7618_s13 + $0x18] sm:$0xff]  }
 0x451   :  { %4081 = vmatpush1.bf16.msra.mxu1 %v6660_v10  ;;  %4504 = vmatpush1.bf16.msra.mxu0 %v6732_v46  ;;  %v6771_v46 = vld [vmem:[%s7618_s13 + $0x60] sm:$0xff]  }
 0x452   :  { %4082 = vmatprep.subr.bf16.mxu1 %v6665_v11  ;;  %4505 = vmatprep.subr.bf16.mxu0 %v6737_v47  ;;  %v6772_v47 = vld [vmem:[%s7618_s13 + $0x20] sm:$0xff]  }
 0x455   :  { %4083 = vmatpush1.bf16.msra.mxu1 %v6663_v12  ;;  %4506 = vmatpush1.bf16.msra.mxu0 %v6735_v37  ;;  %v6773_v37 = vld [vmem:[%s7618_s13 + $0x68] sm:$0xff]  }
 0x456   :  { %4084 = vmatprep.subr.bf16.mxu1 %v6668_v13  ;;  %4507 = vmatprep.subr.bf16.mxu0 %v6740_v48  ;;  %v6675_v13 = vld [vmem:[#allocation10 + $0x100] ss:$8 sps:$4 sm:$0xff]  }
 0x457   :  { %v6774_v48 = vld [vmem:[%s7618_s13 + $0x28] sm:$0xff]  }
 0x459   :  { %4085 = vmatpush1.bf16.msra.mxu1 %v6666_v14  ;;  %4508 = vmatpush1.bf16.msra.mxu0 %v6738_v49  ;;  %v3806_v49 = vld [vmem:[%s7615_s10] sm:$0x3] }
 0x45a   :  { %4086 = vmatprep.subr.bf16.mxu1 %v6671_v15  ;;  %v6680_v15 = vld [vmem:[#allocation10 + $0x114] ss:$8 sps:$4 sm:$0xff]   ;;  %4509 = vmatprep.subr.bf16.mxu0 %v6743_v31 }
 0x45d   :  { %4087 = vmatpush1.bf16.msra.mxu1 %v6669_v16  ;;  %v6678_v16 = vld [vmem:[#allocation10 + $0x110] ss:$8 sps:$4 sm:$0xff]   ;;  %4510 = vmatpush1.bf16.msra.mxu0 %v6741_v33 }
 0x45e   :  { %4088 = vmatprep.subr.bf16.mxu1 %v6674_v17  ;;  %v6683_v17 = vld [vmem:[#allocation10 + $0x124] ss:$8 sps:$4 sm:$0xff]   ;;  %4511 = vmatprep.subr.bf16.mxu0 %v6746_v34 }
 0x461   :  { %4089 = vmatpush1.bf16.msra.mxu1 %v6672_v18  ;;  %v6681_v18 = vld [vmem:[#allocation10 + $0x120] ss:$8 sps:$4 sm:$0xff]   ;;  %4512 = vmatpush1.bf16.msra.mxu0 %v6744_v36 }
 0x462   :  { %4099 = vmatprep.subr.bf16.mxu1 %v6677_v19  ;;  %v6686_v19 = vld [vmem:[#allocation10 + $0x134] ss:$8 sps:$4 sm:$0xff]   ;;  %6002 = vmatprep.subr.bf16.mxu0 %v6747_v38 }
 0x4d7   :  { %v5987_v50 = vpop.f32.mrb[28].mxu1 }
 0x4d8   :  { %v5988_v51 = vpop.f32.mrb[29].mxu1 }
 0x4d9   :  { %v5989_v52 = vadd.f32 %v5988_v51, %v5987_v50  ;;  %v5990_v53 = vpop.f32.mrb[30].mxu1  ;;  %v3811_v50 = vrot.slane %v3806_v49, %v7392_v62  ;;  %v3815_v51 = vrot.slane %v3806_v49, %v7398_v0  ;;  %v6787_v49 = vld [vmem:[%s7620_s15] sm:$0xff]  }
 0x4da   :  { %v5991_v54 = vpop.f32.mrb[31].mxu1 }
 0x4db   :  { %v3707_v59 = vadd.f32 %v5989_v52, %v3202_v56 }
 0x4f7   :  { %v3665_v60 = vpop.f32.mrb[32].mxu0  ;;  %v3746_v61 = vpop.f32.mrb[32].mxu1 }
 0x4f8   :  { %v6182_v1 = vadd.f32 %v3665_v60, %v3194_v57  ;;  %v3747_v2 = vadd.f32 %v3746_v61, %v3707_v59  ;;  %v3667_v3 = vpop.f32.mrb[33].mxu0  ;;  %v6100_v4 = vpop.f32.mrb[33].mxu1  ;;  %v6748_v61 = vld [vmem:[#allocation11 + $0x8] ss:$12 sps:$4 sm:$0xff]  }
 0x4f9   :  { %v6183_v5 = vadd.f32 %v3667_v3, %v3198_v58  ;;  %v3669_v6 = vpop.f32.mrb[34].mxu0  ;;  %v3749_v7 = vpop.f32.mrb[34].mxu1  ;;  %v6750_v3 = vld [vmem:[#allocation11 + $0x20] ss:$12 sps:$4 sm:$0xff]   ;;  %v6751_v4 = vld [vmem:[#allocation11 + $0xf8] ss:$12 sps:$4 sm:$0xff]  }
 0x4fa   :  { %v3752_v8 = vmax.f32 %v6182_v1, 0.0  ;;  %v3670_v9 = vpop.f32.mrb[35].mxu0  ;;  %v6101_v10 = vpop.f32.mrb[35].mxu1  ;;  %v3754_v29 = vmax.f32 %v3747_v2, 0.0  ;;  %v6749_v2 = vld [vmem:[#allocation11 + $0xe0] ss:$12 sps:$4 sm:$0xff]  }
 0x4fb   :  { %v3753_v11 = vmax.f32 %v6183_v5, 0.0  ;;  %v6752_v5 = vld [vmem:[#allocation11 + $0x38] ss:$12 sps:$4 sm:$0xff]   ;;  %v6753_v6 = vld [vmem:[#allocation11 + $0x110] ss:$12 sps:$4 sm:$0xff]  }
 0x4fc   :  { %v3755_v14 = vpack.c.bf16 %v3752_v8, %v3752_v8  ;;  %v3757_v30 = vpack.c.bf16 %v3754_v29, %v3754_v29  ;;  %v6754_v7 = vld [vmem:[#allocation11 + $0x50] ss:$12 sps:$4 sm:$0xff]   ;;  %v6755_v8 = vld [vmem:[#allocation11 + $0x128] ss:$12 sps:$4 sm:$0xff]   ;;  %v6757_v10 = vld [vmem:[#allocation11 + $0x140] ss:$12 sps:$4 sm:$0xff]  }
 0x4fd   :  { %v3756_v12 = vpack.c.bf16 %v3753_v11, %v3753_v11  ;;  %v6756_v9 = vld [vmem:[#allocation11 + $0x68] ss:$12 sps:$4 sm:$0xff]   ;;  %v6758_v11 = vld [vmem:[#allocation11 + $0x80] ss:$12 sps:$4 sm:$0xff]  }
 0x4ff   :  { %4090 = vmatprep.mubr.bf16.mxu1 %v3756_v12  ;;  %v6759_v12 = vld [vmem:[#allocation11 + $0x158] ss:$12 sps:$4 sm:$0xff]  }
 0x500   :  { %4091 = vmatmul.mubr.bf16.vlgmr.msra.gmra.mrb[36].mxu1 %v3755_v14  ;;  %v6761_v14 = vld [vmem:[#allocation11 + $0x170] ss:$12 sps:$4 sm:$0xff]  }
 0x501   :  { %4100 = vmatpush1.bf16.msra.mxu1 %v6675_v13  ;;  %4131 = vmatprep.mubr.bf16.mxu1 %v7036_v22  ;;  %v6693_v22 = vld [vmem:[#allocation10 + $0x160] ss:$8 sps:$4 sm:$0xff]   ;;  %v6760_v13 = vld [vmem:[#allocation11 + $0x98] ss:$12 sps:$4 sm:$0xff]  }
 0x502   :  { %4101 = vmatprep.subr.bf16.mxu1 %v6680_v15  ;;  %v6762_v15 = vld [vmem:[#allocation11 + $0xb0] ss:$12 sps:$4 sm:$0xff]  }
 0x505   :  { %4102 = vmatpush1.bf16.msra.mxu1 %v6678_v16  ;;  %v6775_v16 = vld [vmem:[%s7618_s13 + $0x70] sm:$0xff]  }
 0x506   :  { %4103 = vmatprep.subr.bf16.mxu1 %v6683_v17  ;;  %v6776_v17 = vld [vmem:[%s7618_s13 + $0x30] sm:$0xff]  }
 0x509   :  { %4104 = vmatpush1.bf16.msra.mxu1 %v6681_v18  ;;  %v6777_v18 = vld [vmem:[%s7618_s13 + $0x78] sm:$0xff]  }
 0x50a   :  { %4105 = vmatprep.subr.bf16.mxu1 %v6686_v19  ;;  %v6778_v19 = vld [vmem:[%s7618_s13 + $0x38] sm:$0xff]  }
 0x50d   :  { %4106 = vmatpush1.bf16.msra.mxu1 %v6684_v20  ;;  %v6779_v20 = vld [vmem:[%s7618_s13 + $0x80] sm:$0xff]  }
 0x50e   :  { %4107 = vmatprep.subr.bf16.mxu1 %v6689_v21  ;;  %v6780_v21 = vld [vmem:[%s7618_s13 + $0x88] sm:$0xff]  }
 0x511   :  { %4108 = vmatpush1.bf16.msra.mxu1 %v6687_v23  ;;  %v6781_v23 = vld [vmem:[%s7618_s13 + $0x90] sm:$0xff]  }
 0x512   :  { %4109 = vmatprep.subr.bf16.mxu1 %v6692_v24  ;;  %v6782_v24 = vld [vmem:[%s7618_s13 + $0x98] sm:$0xff]  }
 0x515   :  { %4110 = vmatpush1.bf16.msra.mxu1 %v6690_v25  ;;  %v6783_v25 = vld [vmem:[%s7618_s13 + $0xa0] sm:$0xff]  }
 0x516   :  { %4111 = vmatprep.subr.bf16.mxu1 %v6695_v26  ;;  %v6784_v26 = vld [vmem:[%s7618_s13 + $0xa8] sm:$0xff]  }
 0x519   :  { %4112 = vmatpush1.bf16.msra.mxu1 %v6693_v22  ;;  %v6785_v22 = vld [vmem:[%s7618_s13 + $0xb0] sm:$0xff]  }
 0x51a   :  { %4113 = vmatprep.subr.bf16.mxu1 %v6698_v27  ;;  %v6786_v27 = vld [vmem:[%s7618_s13 + $0xb8] sm:$0xff]  }
 0x51d   :  { %4114 = vmatpush1.bf16.msra.mxu1 %v6696_v28  ;;  %v4208_v28 = vld [vmem:[%s7617_s12] sm:$0x7] }
 0x51e   :  { %6024 = vmatprep.subr.bf16.mxu1 %v6763_v39  ;;  %v4213_v29 = vrot.slane %v4208_v28, %v7392_v62  ;;  %v4221_v62 = vrot.slane %v4208_v28, %v7419_v35  ;;  %v6788_v35 = vld [vmem:[%s7620_s15 + $0x8] sm:$0xff]  }
 0x520   :  { %4132 = vmatmul.mubr.bf16.vlgmr.msra.gmra.mrb[36].mxu1 %v3757_v30  ;;  %v4217_v30 = vrot.slane %v4208_v28, %v7398_v0 }
 0x521   :  { %6025 = vmatpush3.bf16.msra.mxu1 %v6764_v40 }
 0x522   :  { %6026 = vmatprep.subr.bf16.mxu1 %v6765_v41 }
 0x525   :  { %6027 = vmatpush3.bf16.msra.mxu1 %v6766_v42 }
 0x526   :  { %6028 = vmatprep.subr.bf16.mxu1 %v6767_v32 }
 0x529   :  { %6029 = vmatpush3.bf16.msra.mxu1 %v6768_v43 }
 0x52a   :  { %6030 = vmatprep.subr.bf16.mxu1 %v6769_v44 }
 0x52d   :  { %6031 = vmatpush3.bf16.msra.mxu1 %v6770_v45 }
 0x52e   :  { %6032 = vmatprep.subr.bf16.mxu1 %v6771_v46 }
 0x531   :  { %6033 = vmatpush3.bf16.msra.mxu1 %v6772_v47 }
 0x532   :  { %6034 = vmatprep.subr.bf16.mxu1 %v6773_v37 }
 0x535   :  { %6035 = vmatpush3.bf16.msra.mxu1 %v6774_v48 }
 0x536   :  { %6036 = vmatprep.subr.bf16.mxu1 %v6775_v16  ;;  %v6802_v16 = vld [vmem:[#allocation13 + $0x38] sm:$0xff]  }
 0x539   :  { %6037 = vmatpush3.bf16.msra.mxu1 %v6776_v17  ;;  %v6803_v17 = vld [vmem:[#allocation14] sm:$0xff]  }
 0x53a   :  { %6038 = vmatprep.subr.bf16.mxu1 %v6777_v18  ;;  %v6804_v18 = vld [vmem:[#allocation14 + $0x8] sm:$0xff]  }
 0x53d   :  { %6039 = vmatpush3.bf16.msra.mxu1 %v6778_v19  ;;  %v6805_v19 = vld [vmem:[#allocation14 + $0x10] sm:$0xff]  }
 0x53e   :  { %6122 = vmatprep.subr.bf16.mxu1 %v7037_v63 }
 0x5f3   :  { %v4133_v52 = vpop.f32.mrb[36].mxu1 }
 0x5f4   :  { %v6184_v53 = vadd.f32 %v4133_v52, %v3811_v50  ;;  %v4135_v54 = vpop.f32.mrb[37].mxu1  ;;  %v6789_v50 = vld [vmem:[%s7620_s15 + $0x10] sm:$0xff]   ;;  %v6791_v52 = vld [vmem:[%s7620_s15 + $0x20] sm:$0xff]  }
 0x5f5   :  { %v6185_v55 = vadd.f32 %v4135_v54, %v3815_v51  ;;  %v4137_v56 = vpop.f32.mrb[38].mxu1  ;;  %v6790_v51 = vld [vmem:[%s7620_s15 + $0x18] sm:$0xff]   ;;  %v6793_v54 = vld [vmem:[%s7620_s15 + $0x30] sm:$0xff]  }
 0x5f6   :  { %v4140_v57 = vmax.f32 %v6184_v53, 0.0  ;;  %v4138_v58 = vpop.f32.mrb[39].mxu1  ;;  %v6792_v53 = vld [vmem:[%s7620_s15 + $0x28] sm:$0xff]   ;;  %v6795_v56 = vld [vmem:[#allocation13] sm:$0xff]  }
 0x5f7   :  { %v4141_v59 = vmax.f32 %v6185_v55, 0.0  ;;  %v6794_v55 = vld [vmem:[%s7620_s15 + $0x38] sm:$0xff]   ;;  %v6797_v58 = vld [vmem:[#allocation13 + $0x10] sm:$0xff]  }
 0x5f8   :  { %v4142_v1 = vpack.c.bf16 %v4140_v57, %v4140_v57  ;;  %v6796_v57 = vld [vmem:[#allocation13 + $0x8] sm:$0xff]  }
 0x5f9   :  { %v4143_v60 = vpack.c.bf16 %v4141_v59, %v4141_v59  ;;  %v6798_v59 = vld [vmem:[#allocation13 + $0x18] sm:$0xff]  }
 0x5fb   :  { %4513 = vmatprep.mubr.bf16.mxu0 %v4143_v60 }
 0x5fc   :  { %4514 = vmatmul.mubr.bf16.vlgmr.msra.gmra.mrb[36].mxu0 %v4142_v1 }
 0x5fd   :  { %6003 = vmatpush3.bf16.msra.mxu0 %v6748_v61  ;;  %4554 = vmatprep.mubr.bf16.mxu0 %v4143_v60  ;;  %v6799_v60 = vld [vmem:[#allocation13 + $0x20] sm:$0xff]   ;;  %v6800_v61 = vld [vmem:[#allocation13 + $0x28] sm:$0xff]  }
 0x5fe   :  { %6004 = vmatprep.subr.bf16.mxu0 %v6749_v2 }
 0x601   :  { %6005 = vmatpush3.bf16.msra.mxu0 %v6750_v3 }
 0x602   :  { %6006 = vmatprep.subr.bf16.mxu0 %v6751_v4 }
 0x605   :  { %6007 = vmatpush3.bf16.msra.mxu0 %v6752_v5 }
 0x606   :  { %6008 = vmatprep.subr.bf16.mxu0 %v6753_v6  ;;  %v5633_v6 = vld [vmem:[%s7619_s14] ss:$0 sm:$0xff] }
 0x609   :  { %6009 = vmatpush3.bf16.msra.mxu0 %v6754_v7 }
 0x60a   :  { %6010 = vmatprep.subr.bf16.mxu0 %v6755_v8 }
 0x60d   :  { %6011 = vmatpush3.bf16.msra.mxu0 %v6756_v9 }
 0x60e   :  { %6012 = vmatprep.subr.bf16.mxu0 %v6757_v10 }
 0x611   :  { %6013 = vmatpush3.bf16.msra.mxu0 %v6758_v11 }
 0x612   :  { %6014 = vmatprep.subr.bf16.mxu0 %v6759_v12 }
 0x615   :  { %6015 = vmatpush3.bf16.msra.mxu0 %v6760_v13 }
 0x616   :  { %6016 = vmatprep.subr.bf16.mxu0 %v6761_v14 }
 0x619   :  { %6017 = vmatpush3.bf16.msra.mxu0 %v6762_v15  ;;  %v6801_v15 = vld [vmem:[#allocation13 + $0x30] sm:$0xff]  }
 0x61a   :  { %6102 = vmatprep.subr.bf16.mxu0 %v7037_v63 }
 0x61c   :  { %4555 = vmatmul.mubr.bf16.vlgmr.msra.gmra.mrb[40].mxu0 %v4142_v1 }
 0x61d   :  { %6118 = vmatprep.mubr.msk.bf16.mxu0 %vm7038_vm0, %v7037_v63  ;;  %6103 = vmatpush3.bf16.msra.mxu0 %v6779_v20  ;;  %v6806_v20 = vld [vmem:[#allocation14 + $0x18] sm:$0xff]  }
 0x61e   :  { %6104 = vmatprep.subr.bf16.mxu0 %v7037_v63 }
 0x621   :  { %6105 = vmatpush3.bf16.msra.mxu0 %v6780_v21  ;;  %v6807_v21 = vld [vmem:[#allocation14 + $0x20] sm:$0xff]  }
 0x622   :  { %6106 = vmatprep.subr.bf16.mxu0 %v7037_v63 }
 0x625   :  { %6107 = vmatpush3.bf16.msra.mxu0 %v6781_v23  ;;  %v6808_v23 = vld [vmem:[#allocation14 + $0x28] sm:$0xff]  }
 0x626   :  { %6108 = vmatprep.subr.bf16.mxu0 %v7037_v63 }
 0x629   :  { %6109 = vmatpush3.bf16.msra.mxu0 %v6782_v24  ;;  %v5658_v24 = vld [vmem:[%s7621_s16] ss:$0 sm:$0xff] }
 0x62a   :  { %6110 = vmatprep.subr.bf16.mxu0 %v7037_v63 }
 0x62d   :  { %6111 = vmatpush3.bf16.msra.mxu0 %v6783_v25 }
 0x62e   :  { %6112 = vmatprep.subr.bf16.mxu0 %v7037_v63 }
 0x631   :  { %6113 = vmatpush3.bf16.msra.mxu0 %v6784_v26 }
 0x632   :  { %6114 = vmatprep.subr.bf16.mxu0 %v7037_v63 }
 0x635   :  { %6115 = vmatpush3.bf16.msra.mxu0 %v6785_v22 }
 0x636   :  { %6116 = vmatprep.subr.bf16.mxu0 %v7037_v63 }
 0x639   :  { %6117 = vmatpush3.bf16.msra.mxu0 %v6786_v27 }
 0x63a   :  { %6142 = vmatprep.subr.bf16.mxu0 %v7037_v63 }
 0x6cf   :  { %v4515_v31 = vpop.f32.mrb[36].mxu0 }
 0x6d0   :  { %v4516_v33 = vadd.f32 %v4515_v31, %v4213_v29  ;;  %v4517_v34 = vpop.f32.mrb[37].mxu0  ;;  %v6809_v31 = vld [vmem:[#allocation14 + $0x30] sm:$0xff]  }
 0x6d1   :  { %v4518_v36 = vadd.f32 %v4517_v34, %v4217_v30  ;;  %v4519_v38 = vpop.f32.mrb[38].mxu0  ;;  %v5667_v34 = vld [vmem:[%s7623_s18] ss:$0 sm:$0xff] }
 0x6d2   :  { %v4562_v39 = vmax.f32 %v4516_v33, 0.0  ;;  %v4520_v40 = vpop.f32.mrb[39].mxu0  ;;  %v6810_v33 = vld [vmem:[#allocation14 + $0x38] sm:$0xff]  }
 0x6d3   :  { %v4563_v41 = vmax.f32 %v4518_v36, 0.0 }
 0x6d4   :  { %v4565_v32 = vpack.c.bf16 %v4562_v39, %v4562_v39 }
 0x6d5   :  { %v4566_v42 = vpack.c.bf16 %v4563_v41, %v4563_v41 }
 0x6d7   :  { %4799 = vmatprep.mubr.bf16.mxu1 %v4566_v42 }
 0x6d8   :  { %4800 = vmatmul.mubr.bf16.vlgmr.msra.gmra.mrb[40].mxu1 %v4565_v32 }
 0x6d9   :  { %6138 = vmatprep.mubr.msk.bf16.mxu1 %vm7038_vm0, %v7037_v63  ;;  %6123 = vmatpush3.bf16.msra.mxu1 %v6787_v49 }
 0x6da   :  { %6124 = vmatprep.subr.bf16.mxu1 %v7037_v63 }
 0x6dd   :  { %6125 = vmatpush3.bf16.msra.mxu1 %v6788_v35 }
 0x6de   :  { %6126 = vmatprep.subr.bf16.mxu1 %v7037_v63 }
 0x6e1   :  { %6127 = vmatpush3.bf16.msra.mxu1 %v6789_v50 }
 0x6e2   :  { %6128 = vmatprep.subr.bf16.mxu1 %v7037_v63 }
 0x6e5   :  { %6129 = vmatpush3.bf16.msra.mxu1 %v6790_v51 }
 0x6e6   :  { %6130 = vmatprep.subr.bf16.mxu1 %v7037_v63 }
 0x6e9   :  { %6131 = vmatpush3.bf16.msra.mxu1 %v6791_v52 }
 0x6ea   :  { %6132 = vmatprep.subr.bf16.mxu1 %v7037_v63 }
 0x6ed   :  { %6133 = vmatpush3.bf16.msra.mxu1 %v6792_v53 }
 0x6ee   :  { %6134 = vmatprep.subr.bf16.mxu1 %v7037_v63 }
 0x6ef   :  { %v6018_v43 = vpop.f32.mrb[40].mxu0 }
 0x6f0   :  { %v6019_v44 = vpop.f32.mrb[41].mxu0 }
 0x6f1   :  { %v6020_v0 = vadd.f32 %v6019_v44, %v6018_v43  ;;  %v6021_v45 = vpop.f32.mrb[42].mxu0  ;;  %6135 = vmatpush3.bf16.msra.mxu1 %v6793_v54  ;;  %v5676_v43 = vld [vmem:[%s7652_s2] ss:$0 sm:$0xff] }
 0x6f2   :  { %v6022_v46 = vpop.f32.mrb[43].mxu0  ;;  %6136 = vmatprep.subr.bf16.mxu1 %v7037_v63 }
 0x6f3   :  { %v4557_v47 = vadd.f32 %v6020_v0, %v4221_v62 }
 0x6f5   :  { %v4564_v37 = vmax.f32 %v4557_v47, 0.0  ;;  %6137 = vmatpush3.bf16.msra.mxu1 %v6794_v55 }
 0x6f6   :  { %6162 = vmatprep.subr.bf16.mxu1 %v7037_v63 }
 0x6f7   :  { %v4567_v48 = vpack.c.bf16 %v4564_v37, %v4564_v37 }
 0x6f9   :  { %6119 = vmatmul.mubr.bf16.vlgmr.msra.gmra.mrb[44].mxu0 %v4567_v48 }
 0x6fa   :  { %6158 = vmatprep.mubr.msk.bf16.mxu0 %vm7038_vm0, %v7037_v63  ;;  %6143 = vmatpush3.bf16.msra.mxu0 %v6795_v56 }
 0x6fb   :  { %6144 = vmatprep.subr.bf16.mxu0 %v7037_v63 }
 0x6fe   :  { %6145 = vmatpush3.bf16.msra.mxu0 %v6796_v57 }
 0x6ff   :  { %6146 = vmatprep.subr.bf16.mxu0 %v7037_v63 }
 0x702   :  { %6147 = vmatpush3.bf16.msra.mxu0 %v6797_v58 }
 0x703   :  { %6148 = vmatprep.subr.bf16.mxu0 %v7037_v63 }
 0x706   :  { %6149 = vmatpush3.bf16.msra.mxu0 %v6798_v59 }
 0x707   :  { %6150 = vmatprep.subr.bf16.mxu0 %v7037_v63 }
 0x70a   :  { %6151 = vmatpush3.bf16.msra.mxu0 %v6799_v60 }
 0x70b   :  { %6152 = vmatprep.subr.bf16.mxu0 %v7037_v63 }
 0x70e   :  { %6153 = vmatpush3.bf16.msra.mxu0 %v6800_v61 }
 0x70f   :  { %6154 = vmatprep.subr.bf16.mxu0 %v7037_v63 }
 0x712   :  { %6155 = vmatpush3.bf16.msra.mxu0 %v6801_v15 }
 0x713   :  { %6156 = vmatprep.subr.bf16.mxu0 %v7037_v63 }
 0x716   :  { %6157 = vmatpush3.bf16.msra.mxu0 %v6802_v16 }
 0x7ab   :  { %v6040_v1 = vpop.f32.mrb[40].mxu1 }
 0x7ac   :  { %v6041_v2 = vpop.f32.mrb[41].mxu1 }
 0x7ad   :  { %v6042_v3 = vadd.f32 %v6041_v2, %v6040_v1  ;;  %v6043_v4 = vpop.f32.mrb[42].mxu1 }
 0x7ae   :  { %v6044_v5 = vpop.f32.mrb[43].mxu1 }
 0x7af   :  { %v4802_v7 = vadd.f32 %v6042_v3, %v5633_v6 }
 0x7cc   :  { %v4841_v8 = vpop.f32.mrb[44].mxu0 }
 0x7cd   :  { %v4842_v9 = vadd.f32 %v4841_v8, %v4802_v7  ;;  %v6120_v10 = vpop.f32.mrb[45].mxu0 }
 0x7ce   :  { %v4844_v11 = vpop.f32.mrb[46].mxu0 }
 0x7cf   :  { %v4847_v12 = vmax.f32 %v4842_v9, 0.0  ;;  %v6121_v13 = vpop.f32.mrb[47].mxu0 }
 0x7d1   :  { %v4848_v14 = vpack.c.bf16 %v4847_v12, %v4847_v12 }
 0x7d3   :  { %6139 = vmatmul.mubr.bf16.vlgmr.msra.gmra.mrb[44].mxu1 %v4848_v14 }
 0x7d4   :  { %6178 = vmatprep.mubr.msk.bf16.mxu1 %vm7038_vm0, %v7037_v63  ;;  %6163 = vmatpush3.bf16.msra.mxu1 %v6803_v17 }
 0x7d5   :  { %6164 = vmatprep.subr.bf16.mxu1 %v7037_v63 }
 0x7d8   :  { %6165 = vmatpush3.bf16.msra.mxu1 %v6804_v18 }
 0x7d9   :  { %6166 = vmatprep.subr.bf16.mxu1 %v7037_v63 }
 0x7dc   :  { %6167 = vmatpush3.bf16.msra.mxu1 %v6805_v19 }
 0x7dd   :  { %6168 = vmatprep.subr.bf16.mxu1 %v7037_v63 }
 0x7e0   :  { %6169 = vmatpush3.bf16.msra.mxu1 %v6806_v20 }
 0x7e1   :  { %6170 = vmatprep.subr.bf16.mxu1 %v7037_v63 }
 0x7e4   :  { %6171 = vmatpush3.bf16.msra.mxu1 %v6807_v21 }
 0x7e5   :  { %6172 = vmatprep.subr.bf16.mxu1 %v7037_v63 }
 0x7e8   :  { %6173 = vmatpush3.bf16.msra.mxu1 %v6808_v23 }
 0x7e9   :  { %6174 = vmatprep.subr.bf16.mxu1 %v7037_v63 }
 0x7ec   :  { %6175 = vmatpush3.bf16.msra.mxu1 %v6809_v31 }
 0x7ed   :  { %6176 = vmatprep.subr.bf16.mxu1 %v7037_v63 }
 0x7f0   :  { %6177 = vmatpush3.bf16.msra.mxu1 %v6810_v33 }
 0x8a6   :  { %v4954_v25 = vpop.f32.mrb[44].mxu1 }
 0x8a7   :  { %v4955_v26 = vadd.f32 %v5658_v24, %v4954_v25  ;;  %v6140_v22 = vpop.f32.mrb[45].mxu1 }
 0x8a8   :  { %v4957_v27 = vpop.f32.mrb[46].mxu1 }
 0x8a9   :  { %v4960_v28 = vmax.f32 %v4955_v26, 0.0  ;;  %v6141_v29 = vpop.f32.mrb[47].mxu1 }
 0x8ab   :  { %v4961_v30 = vpack.c.bf16 %v4960_v28, %v4960_v28 }
 0x8ad   :  { %6159 = vmatmul.mubr.bf16.vlgmr.msra.gmra.mrb[48].mxu0 %v4961_v30 }
 0x980   :  { %v5067_v36 = vpop.f32.mrb[48].mxu0 }
 0x981   :  { %v5068_v38 = vadd.f32 %v5667_v34, %v5067_v36  ;;  %v6160_v39 = vpop.f32.mrb[49].mxu0 }
 0x982   :  { %v5070_v40 = vpop.f32.mrb[50].mxu0 }
 0x983   :  { %v5073_v41 = vmax.f32 %v5068_v38, 0.0  ;;  %v6161_v42 = vpop.f32.mrb[51].mxu0 }
 0x985   :  { %v5074_v32 = vpack.c.bf16 %v5073_v41, %v5073_v41 }
 0x987   :  { %6179 = vmatmul.mubr.bf16.vlgmr.msra.gmra.mrb[48].mxu1 %v5074_v32 }
 0xa5a   :  { %v5180_v62 = vpop.f32.mrb[48].mxu1 }
 0xa5b   :  { %v5181_v63 = vadd.f32 %v5676_v43, %v5180_v62  ;;  %v6180_v44 = vpop.f32.mrb[49].mxu1 }
 0xa5c   :  { %v5183_v0 = vpop.f32.mrb[50].mxu1 }
 0xa5d   :  { %5186 = vst [vmem:[#allocation16] sm:$0xff] %v5181_v63  ;;  %v6181_v45 = vpop.f32.mrb[51].mxu1 }
 0xa5e   :  { %5191 = vsyncadd [#allocation4], 96  ;;  %s7039_s18 = smov [#allocation16]  }
 0xa5f   :  { %s5192_s6 = sshll.u32 %s7039_s18, 4  ;;  %s5193_s6 = int_to_ptr.vmem [resolvable:$true] %s5192_s6 }
 0xa60   :  { %s6987_s4 = scalar_lea.vmem %s5193_s6, 32  ;;  %s6991_s8 = scalar_lea.vmem %s5193_s6, 128 }
 0xa61   :  { %p6988_p8 = scmp.ne.s32.totalorder %s5193_s6, %s6987_s4  ;;  %p6992_p9 = scmp.lt.s32.totalorder %s5193_s6, %s5193_s6 }
 0xa62   :  { %p6993_p10 = scmp.lt.s32.totalorder %s6991_s8, %s6987_s4 }
 0xa64   :  { %p6994_p11 = por %p6993_p10, %p6992_p9 }
 0xa66   :  { %p6995_p12 = pnand %p6994_p11, %p6988_p8 }
 0xa68   :  { %6998 = shalt.err (!%p6995_p12)
}
 0xa69   :  { %s7653_s12 = sld [smem:[#allocation30_spill]] }
 0xa6f   :  { %s6999_s13 = scalar_lea.hbm %s7653_s12, 32 }
 0xa70   :  { %p7000_p13 = scmp.ne.s32.totalorder %s7653_s12, %s6999_s13  ;;  %p7003_p0 = scmp.lt.u32.totalorder %s6999_s13, %s7653_s12 }
 0xa72   :  { %p7005_p1 = pnand %p7003_p0, %p7000_p13 }
 0xa74   :  { %7008 = shalt.err (!%p7005_p1)
}
 0xa75   :  { %s7040_s17 = smov 32   ;;  %s7041_s21 = smov 2  }
 0xa76   :  { %5198 = dma.vmem_to_hbm [thread:$0]  %s5193_s6, 32, %s7653_s12, [#allocation4], %s7040_s17, %s7040_s17, %s7041_s21  }
 0xa77   :  { %7019 = dma.done.wait [#allocation4], 128  }
 0xa78   :  { %7020 = vsyncadd [#allocation4], 4294967168 }
 0xa79   :  { %5202 = vsyncpa [#allocation3], 1 }
 0xa7a   :  { %5203 = vsyncpa [#allocation6], 1 }
 0xa7b   :  { %5204 = vsyncpa [#allocation9], 1 }
 0xa7c   :  { %5205 = vsyncpa [#allocation12], 1 }
 0xa7d   :  { %5206 = vsyncpa [#allocation15], 1 }
 0xa7e   :  { %5207 = vsyncpa [#allocation4], 1 }

// kernel: fwd.1
= control target key start
LH: loop header
LB: loop body
LE: loop exit
PB: predicated region body
PF: predicated region fallthrough
CT: control target
= control target key end

     0   :  { %s7605_s0 = inlined_call_operand.vmem [shape: f32[2,3072], index: 0, kind: input, shape index: {}]   ;;  %s7606_s1 = inlined_call_operand.hbm [shape: bf16[3072,128], index: 1, kind: input, shape index: {}]   ;;  %s7607_s2 = inlined_call_operand.vmem [shape: f32[1,128], index: 2, kind: input, shape index: {}]   ;;  %s7608_s3 = inlined_call_operand.hbm [shape: bf16[128,256], index: 3, kind: input, shape index: {}]   ;;  %s7609_s4 = inlined_call_operand.vmem [shape: f32[1,256], index: 4, kind: input, shape index: {}]   ;;  %s7610_s5 = inlined_call_operand.hbm [shape: bf16[256,384], index: 5, kind: input, shape index: {}]   ;;  %s7611_s6 = inlined_call_operand.vmem [shape: f32[1,384], index: 6, kind: input, shape index: {}]   ;;  %s7612_s7 = inlined_call_operand.hbm [shape: bf16[384,384], index: 7, kind: input, shape index: {}]   ;;  %s7613_s8 = inlined_call_operand.vmem [shape: f32[1,384], index: 8, kind: input, shape index: {}]   ;;  %s7614_s9 = inlined_call_operand.hbm [shape: bf16[384,256], index: 9, kind: input, shape index: {}]   ;;  %s7615_s10 = inlined_call_operand.vmem [shape: f32[1,256], index: 10, kind: input, shape index: {}]   ;;  %s7616_s11 = inlined_call_operand.hbm [shape: bf16[256,384], index: 11, kind: input, shape index: {}]   ;;  %s7617_s12 = inlined_call_operand.vmem [shape: f32[1,384], index: 12, kind: input, shape index: {}]   ;;  %s7618_s13 = inlined_call_operand.vmem [shape: bf16[384,128], index: 13, kind: input, shape index: {}]   ;;  %s7619_s14 = inlined_call_operand.vmem [shape: f32[1,128], index: 14, kind: input, shape index: {}]   ;;  %s7620_s15 = inlined_call_operand.vmem [shape: bf16[128,128], index: 15, kind: input, shape index: {}]   ;;  %s7621_s16 = inlined_call_operand.vmem [shape: f32[1,128], index: 16, kind: input, shape index: {}]   ;;  %s7622_s17 = inlined_call_operand.hbm [shape: bf16[128,128], index: 17, kind: input, shape index: {}]   ;;  %s7623_s18 = inlined_call_operand.vmem [shape: f32[1,128], index: 18, kind: input, shape index: {}]   ;;  %s7624_s19 = inlined_call_operand.hbm [shape: bf16[128,128], index: 19, kind: input, shape index: {}]   ;;  %s7625_s20 = inlined_call_operand.vmem [shape: f32[1,128], index: 20, kind: input, shape index: {}]   ;;  %s7626_s21 = inlined_call_operand.hbm [shape: f32[2,128], index: 21, kind: output, shape index: {}]  }
   0x1   :  { %7635 = sst [smem:[#allocation23_spill]] %s7605_s0 }
   0x2   :  { %7636 = sst [smem:[#allocation24_spill]] %s7606_s1 }
   0x3   :  { %7637 = sst [smem:[#allocation25_spill]] %s7607_s2 }
   0x4   :  { %7638 = sst [smem:[#allocation26_spill]] %s7608_s3 }
   0x5   :  { %7639 = sst [smem:[#allocation27_spill]] %s7609_s4 }
   0x6   :  { %7640 = sst [smem:[#allocation28_spill]] %s7610_s5 }
   0x7   :  { %7641 = sst [smem:[#allocation29_spill]] %s7625_s20 }
   0x8   :  { %7642 = sst [smem:[#allocation30_spill]] %s7626_s21 }
   0x9   :  { %26 = vsyncpa [#allocation3], 0 }
   0xa   :  { %27 = vsyncpa [#allocation6], 0 }
   0xb   :  { %28 = vsyncpa [#allocation9], 0 }
   0xc   :  { %29 = vsyncpa [#allocation12], 0 }
   0xd   :  { %30 = vsyncpa [#allocation15], 0 }
   0xe   :  { %31 = vsyncpa [#allocation4], 0  ;;  %s7021_s2 = smov [#allocation5]   ;;  %s7643_s3 = sld [smem:[#allocation26_spill]] }
   0xf   :  { %s53_s25 = sshll.u32 %s7021_s2, 4  ;;  %s54_s25 = int_to_ptr.vmem [resolvable:$true] %s53_s25 }
  0x14   :  { %s6811_s28 = scalar_lea.hbm %s7643_s3, 2048 }
  0x15   :  { %p6812_p0 = scmp.ne.s32.totalorder %s7643_s3, %s6811_s28  ;;  %p6815_p1 = scmp.lt.u32.totalorder %s6811_s28, %s7643_s3 }
  0x17   :  { %p6817_p2 = pnand %p6815_p1, %p6812_p0 }
  0x19   :  { %6820 = shalt.err (!%p6817_p2)
}
  0x1a   :  { %s6821_s5 = scalar_lea.vmem %s54_s25, 2048  ;;  %p6826_p4 = scmp.lt.s32.totalorder %s54_s25, %s54_s25 }
  0x1b   :  { %p6822_p3 = scmp.ne.s32.totalorder %s54_s25, %s6821_s5  ;;  %p6827_p5 = scmp.lt.s32.totalorder %s6821_s5, %s6821_s5 }
  0x1d   :  { %p6828_p6 = por %p6827_p5, %p6826_p4 }
  0x1f   :  { %p6829_p7 = pnand %p6828_p6, %p6822_p3 }
  0x21   :  { %6832 = shalt.err (!%p6829_p7)
}
  0x22   :  { %s7632_s22 = smov 128   ;;  %s7633_s23 = smov 8  }
  0x23   :  { %59 = dma.hbm_to_vmem [thread:$0]  %s7643_s3, 2048, %s54_s25, [#allocation6], %s7632_s22, %s7632_s22, %s7633_s23  }
  0x24   :  { %s7024_s2 = smov [#allocation8]   ;;  %s7025_s27 = smov [#allocation11]  }
  0x25   :  { %s81_s26 = sshll.u32 %s7024_s2, 4  ;;  %s109_s28 = sshll.u32 %s7025_s27, 4  ;;  %s82_s26 = int_to_ptr.vmem [resolvable:$true] %s81_s26  ;;  %s110_s28 = int_to_ptr.vmem [resolvable:$true] %s109_s28 }
  0x26   :  { %s6833_s4 = scalar_lea.hbm %s7612_s7, 9216 }
  0x27   :  { %p6834_p8 = scmp.ne.s32.totalorder %s7612_s7, %s6833_s4  ;;  %p6837_p9 = scmp.lt.u32.totalorder %s6833_s4, %s7612_s7 }
  0x29   :  { %p6839_p10 = pnand %p6837_p9, %p6834_p8 }
  0x2b   :  { %6842 = shalt.err (!%p6839_p10)
}
  0x2c   :  { %s6843_s25 = scalar_lea.vmem %s82_s26, 9216  ;;  %p6848_p12 = scmp.lt.s32.totalorder %s82_s26, %s82_s26 }
  0x2d   :  { %p6844_p11 = scmp.ne.s32.totalorder %s82_s26, %s6843_s25  ;;  %p6849_p13 = scmp.lt.s32.totalorder %s6843_s25, %s6843_s25 }
  0x2f   :  { %p6850_p0 = por %p6849_p13, %p6848_p12 }
  0x31   :  { %p6851_p1 = pnand %p6850_p0, %p6844_p11 }
  0x33   :  { %6854 = shalt.err (!%p6851_p1)
}
  0x34   :  { %s7634_s3 = smov 192   ;;  %s7027_s1 = smov 12  }
  0x35   :  { %87 = dma.hbm_to_vmem [thread:$0]  %s7612_s7, 9216, %s82_s26, [#allocation9], %s7634_s3, %s7634_s3, %s7027_s1  }
  0x36   :  { %s6855_s27 = scalar_lea.hbm %s7616_s11, 6144 }
  0x37   :  { %p6856_p2 = scmp.ne.s32.totalorder %s7616_s11, %s6855_s27  ;;  %p6859_p3 = scmp.lt.u32.totalorder %s6855_s27, %s7616_s11 }
  0x39   :  { %p6861_p4 = pnand %p6859_p3, %p6856_p2 }
  0x3b   :  { %6864 = shalt.err (!%p6861_p4)
}
  0x3c   :  { %s6865_s5 = scalar_lea.vmem %s110_s28, 6144  ;;  %p6870_p6 = scmp.lt.s32.totalorder %s110_s28, %s110_s28 }
  0x3d   :  { %p6866_p5 = scmp.ne.s32.totalorder %s110_s28, %s6865_s5  ;;  %p6871_p7 = scmp.lt.s32.totalorder %s6865_s5, %s6865_s5 }
  0x3f   :  { %p6872_p8 = por %p6871_p7, %p6870_p6 }
  0x41   :  { %p6873_p9 = pnand %p6872_p8, %p6866_p5 }
  0x43   :  { %6876 = shalt.err (!%p6873_p9)
}
  0x44   :  { %115 = dma.hbm_to_vmem [thread:$0]  %s7616_s11, 6144, %s110_s28, [#allocation12], %s7634_s3, %s7634_s3, %s7027_s1  }
  0x45   :  { %s7028_s25 = smov [#allocation2]   ;;  %s7644_s21 = sld [smem:[#allocation24_spill]] }
  0x46   :  { %s39_s24 = sshll.u32 %s7028_s25, 4  ;;  %s40_s24 = int_to_ptr.vmem [resolvable:$true] %s39_s24 }
  0x4b   :  { %s6877_s27 = scalar_lea.hbm %s7644_s21, 24576 }
  0x4c   :  { %p6878_p10 = scmp.ne.s32.totalorder %s7644_s21, %s6877_s27  ;;  %p6881_p11 = scmp.lt.u32.totalorder %s6877_s27, %s7644_s21 }
  0x4e   :  { %p6883_p12 = pnand %p6881_p11, %p6878_p10 }
  0x50   :  { %6886 = shalt.err (!%p6883_p12)
}
  0x51   :  { %s6887_s5 = scalar_lea.vmem %s40_s24, 24576  ;;  %p6892_p0 = scmp.lt.s32.totalorder %s40_s24, %s40_s24 }
  0x52   :  { %p6888_p13 = scmp.ne.s32.totalorder %s40_s24, %s6887_s5  ;;  %p6893_p1 = scmp.lt.s32.totalorder %s6887_s5, %s6887_s5 }
  0x54   :  { %p6894_p2 = por %p6893_p1, %p6892_p0 }
  0x56   :  { %p6895_p3 = pnand %p6894_p2, %p6888_p13 }
  0x58   :  { %6898 = shalt.err (!%p6895_p3)
}
  0x59   :  { %s7029_s11 = smov 64   ;;  %s7030_s28 = smov 4  }
  0x5a   :  { %45 = dma.hbm_to_vmem [thread:$0]  %s7644_s21, 24576, %s40_s24, [#allocation3], %s7029_s11, %s7029_s11, %s7030_s28  }
  0x5b   :  { %s7031_s25 = smov [#allocation7]   ;;  %s7032_s20 = smov [#allocation10]  }
  0x5c   :  { %s67_s2 = sshll.u32 %s7031_s25, 4  ;;  %s95_s27 = sshll.u32 %s7032_s20, 4  ;;  %s68_s2 = int_to_ptr.vmem [resolvable:$true] %s67_s2  ;;  %s7212_s27 = int_to_ptr.vmem [resolvable:$true] %s95_s27 }
  0x5d   :  { %s7645_s4 = sld [smem:[#allocation28_spill]] }
  0x63   :  { %s6899_s30 = scalar_lea.hbm %s7645_s4, 6144 }
  0x64   :  { %p6900_p4 = scmp.ne.s32.totalorder %s7645_s4, %s6899_s30  ;;  %p6903_p5 = scmp.lt.u32.totalorder %s6899_s30, %s7645_s4 }
  0x66   :  { %p6905_p6 = pnand %p6903_p5, %p6900_p4 }
  0x68   :  { %6908 = shalt.err (!%p6905_p6)
}
  0x69   :  { %s6909_s24 = scalar_lea.vmem %s68_s2, 6144  ;;  %p6914_p8 = scmp.lt.s32.totalorder %s68_s2, %s68_s2 }
  0x6a   :  { %p6910_p7 = scmp.ne.s32.totalorder %s68_s2, %s6909_s24  ;;  %p6915_p9 = scmp.lt.s32.totalorder %s6909_s24, %s6909_s24 }
  0x6c   :  { %p6916_p10 = por %p6915_p9, %p6914_p8 }
  0x6e   :  { %p6917_p11 = pnand %p6916_p10, %p6910_p7 }
  0x70   :  { %6920 = shalt.err (!%p6917_p11)
}
  0x71   :  { %s7646_s21 = smov 192   ;;  %s6921_s23 = scalar_lea.hbm %s7614_s9, 6144 }
  0x72   :  { %73 = dma.hbm_to_vmem [thread:$0]  %s7645_s4, 6144, %s68_s2, [#allocation6], %s7646_s21, %s7646_s21, %s7027_s1  }
  0x73   :  { %p6922_p12 = scmp.ne.s32.totalorder %s7614_s9, %s6921_s23  ;;  %p6925_p13 = scmp.lt.u32.totalorder %s6921_s23, %s7614_s9 }
  0x75   :  { %p6927_p0 = pnand %p6925_p13, %p6922_p12 }
  0x77   :  { %6930 = shalt.err (!%p6927_p0)
}
  0x78   :  { %s6931_s30 = scalar_lea.vmem %s7212_s27, 6144  ;;  %p6936_p2 = scmp.lt.s32.totalorder %s7212_s27, %s7212_s27 }
  0x79   :  { %p6932_p1 = scmp.ne.s32.totalorder %s7212_s27, %s6931_s30  ;;  %p6937_p3 = scmp.lt.s32.totalorder %s6931_s30, %s6931_s30 }
  0x7b   :  { %p6938_p4 = por %p6937_p3, %p6936_p2 }
  0x7d   :  { %p6939_p5 = pnand %p6938_p4, %p6932_p1 }
  0x7f   :  { %6942 = shalt.err (!%p6939_p5)
}
  0x80   :  { %s7647_s1 = smov 8   ;;  %s7648_s2 = smov 128  }
  0x81   :  { %101 = dma.hbm_to_vmem [thread:$0]  %s7614_s9, 6144, %s7212_s27, [#allocation9], %s7648_s2, %s7648_s2, %s7647_s1  }
  0x82   :  { %s7033_s24 = smov [#allocation13]   ;;  %s7034_s7 = smov [#allocation14]  }
  0x83   :  { %s131_s21 = sshll.u32 %s7033_s24, 4  ;;  %s145_s26 = sshll.u32 %s7034_s7, 4  ;;  %s132_s21 = int_to_ptr.vmem [resolvable:$true] %s131_s21  ;;  %s7249_s26 = int_to_ptr.vmem [resolvable:$true] %s145_s26 }
  0x84   :  { %s6943_s23 = scalar_lea.hbm %s7622_s17, 1024 }
  0x85   :  { %p6944_p6 = scmp.ne.s32.totalorder %s7622_s17, %s6943_s23  ;;  %p6947_p7 = scmp.lt.u32.totalorder %s6943_s23, %s7622_s17 }
  0x87   :  { %p6949_p8 = pnand %p6947_p7, %p6944_p6 }
  0x89   :  { %6952 = shalt.err (!%p6949_p8)
}
  0x8a   :  { %s6953_s9 = scalar_lea.vmem %s132_s21, 1024  ;;  %p6958_p10 = scmp.lt.s32.totalorder %s132_s21, %s132_s21 }
  0x8b   :  { %p6954_p9 = scmp.ne.s32.totalorder %s132_s21, %s6953_s9  ;;  %p6959_p11 = scmp.lt.s32.totalorder %s6953_s9, %s6953_s9 }
  0x8d   :  { %p6960_p12 = por %p6959_p11, %p6958_p10 }
  0x8f   :  { %p6961_p13 = pnand %p6960_p12, %p6954_p9 }
  0x91   :  { %6964 = shalt.err (!%p6961_p13)
}
  0x92   :  { %137 = dma.hbm_to_vmem [thread:$0]  %s7622_s17, 1024, %s132_s21, [#allocation12], %s7029_s11, %s7029_s11, %s7030_s28  }
  0x93   :  { %s6965_s4 = scalar_lea.hbm %s7624_s19, 1024 }
  0x94   :  { %p6966_p0 = scmp.ne.s32.totalorder %s7624_s19, %s6965_s4  ;;  %p6969_p1 = scmp.lt.u32.totalorder %s6965_s4, %s7624_s19 }
  0x96   :  { %p6971_p2 = pnand %p6969_p1, %p6966_p0 }
  0x98   :  { %6974 = shalt.err (!%p6971_p2)
}
  0x99   :  { %s6975_s25 = scalar_lea.vmem %s7249_s26, 1024  ;;  %p6980_p4 = scmp.lt.s32.totalorder %s7249_s26, %s7249_s26 }
  0x9a   :  { %p6976_p3 = scmp.ne.s32.totalorder %s7249_s26, %s6975_s25  ;;  %p6981_p5 = scmp.lt.s32.totalorder %s6975_s25, %s6975_s25 }
  0x9c   :  { %p6982_p6 = por %p6981_p5, %p6980_p4 }
  0x9e   :  { %p6983_p7 = pnand %p6982_p6, %p6976_p3 }
  0xa0   :  { %6986 = shalt.err (!%p6983_p7)
}
  0xa1   :  { %151 = dma.hbm_to_vmem [thread:$0]  %s7624_s19, 1024, %s7249_s26, [#allocation15], %s7029_s11, %s7029_s11, %s7030_s28  }
  0xa2   :  { %7009 = dma.done.wait [#allocation3], 24576  }
  0xa3   :  { %7010 = vsyncadd [#allocation3], 4294942720 }
  0xa4   :  { %7011 = dma.done.wait [#allocation6], 8192  }
  0xa5   :  { %7012 = vsyncadd [#allocation6], 4294959104 }
  0xa6   :  { %7013 = dma.done.wait [#allocation9], 15360  }
  0xa7   :  { %7014 = vsyncadd [#allocation9], 4294951936 }
  0xa8   :  { %7015 = dma.done.wait [#allocation12], 7168  }
  0xa9   :  { %7016 = vsyncadd [#allocation12], 4294960128 }
  0xaa   :  { %7017 = dma.done.wait [#allocation15], 1024  }
  0xab   :  { %7018 = vsyncadd [#allocation15], 4294966272  ;;  %v6215_v0 = vld [vmem:[#allocation2 + $0x40] sm:$0xff]   ;;  %v6219_v4 = vld [vmem:[#allocation2 + $0x48] sm:$0xff]   ;;  %v7035_v24 = vmov 1983009808   ;;  %v234_v26 = vlaneseq }
  0xac   :  { %v6216_v1 = vld [vmem:[#allocation2 + $0xc0] sm:$0xff]   ;;  %5685 = vmatprep.subr.bf16.mxu0 %v6215_v0  ;;  %v6220_v5 = vld [vmem:[#allocation2 + $0xc8] sm:$0xff]   ;;  %v6223_v8 = vld [vmem:[#allocation2 + $0x50] sm:$0xff]   ;;  %v232_v25 = vunpack.c.l.s4 %v7035_v24  ;;  %s7649_s28 = sld [smem:[#allocation23_spill]]  ;;  %s7650_s0 = sld [smem:[#allocation25_spill]]  ;;  %vm7038_vm0 = vmmov 0  }
  0xad   :  { %v6217_v2 = vld [vmem:[#allocation2] sm:$0xff]   ;;  %5707 = vmatprep.subr.bf16.mxu1 %v6216_v1  ;;  %v6221_v6 = vld [vmem:[#allocation2 + $0x8] sm:$0xff]   ;;  %v6224_v9 = vld [vmem:[#allocation2 + $0xd0] sm:$0xff]   ;;  %v7286_v32 = vshrl.u32 %v234_v26, 7  ;;  %s7651_s30 = sld [smem:[#allocation27_spill]]  ;;  %s7652_s2 = sld [smem:[#allocation29_spill]] }
  0xae   :  { %v6218_v3 = vld [vmem:[#allocation2 + $0x80] sm:$0xff]   ;;  %5686 = vmatpush3.bf16.msra.mxu0 %v6217_v2  ;;  %v6222_v7 = vld [vmem:[#allocation2 + $0x88] sm:$0xff]   ;;  %v6225_v10 = vld [vmem:[#allocation2 + $0x10] sm:$0xff]   ;;  %v233_v31 = vunpack.c.0.s8 %v232_v25 }
  0xaf   :  { %5708 = vmatpush3.bf16.msra.mxu1 %v6218_v3  ;;  %5687 = vmatprep.subr.bf16.mxu0 %v6219_v4  ;;  %v6226_v11 = vld [vmem:[#allocation2 + $0x90] sm:$0xff]   ;;  %v6227_v12 = vld [vmem:[#allocation2 + $0x58] sm:$0xff]   ;;  %v6231_v16 = vld [vmem:[#allocation2 + $0x60] sm:$0xff]  }
  0xb0   :  { %5709 = vmatprep.subr.bf16.mxu1 %v6220_v5  ;;  %v6228_v13 = vld [vmem:[#allocation2 + $0xd8] sm:$0xff]   ;;  %v6232_v17 = vld [vmem:[#allocation2 + $0xe0] sm:$0xff]   ;;  %v6235_v20 = vld [vmem:[#allocation2 + $0x68] sm:$0xff]   ;;  %v7289_v37 = vsub.s32 %v233_v31, %v7286_v32 }
  0xb1   :  { %v6229_v14 = vld [vmem:[#allocation2 + $0x18] sm:$0xff]   ;;  %v6233_v18 = vld [vmem:[#allocation2 + $0x20] sm:$0xff]   ;;  %v6236_v21 = vld [vmem:[#allocation2 + $0xe8] sm:$0xff]  }
  0xb2   :  { %5688 = vmatpush3.bf16.msra.mxu0 %v6221_v6  ;;  %v6230_v15 = vld [vmem:[#allocation2 + $0x98] sm:$0xff]   ;;  %v6234_v19 = vld [vmem:[#allocation2 + $0xa0] sm:$0xff]   ;;  %v6237_v22 = vld [vmem:[#allocation2 + $0x28] sm:$0xff]  }
  0xb3   :  { %5710 = vmatpush3.bf16.msra.mxu1 %v6222_v7  ;;  %5689 = vmatprep.subr.bf16.mxu0 %v6223_v8  ;;  %v6238_v23 = vld [vmem:[#allocation2 + $0xa8] sm:$0xff]   ;;  %v6239_v27 = vld [vmem:[#allocation2 + $0x70] sm:$0xff]   ;;  %v6243_v33 = vld [vmem:[#allocation2 + $0x78] sm:$0xff]  }
  0xb4   :  { %5711 = vmatprep.subr.bf16.mxu1 %v6224_v9  ;;  %v6240_v28 = vld [vmem:[#allocation2 + $0xf0] sm:$0xff]   ;;  %v6244_v34 = vld [vmem:[#allocation2 + $0xf8] sm:$0xff]   ;;  %v6253_v44 = vld [vmem:[#allocation2 + $0x140] sm:$0xff]  }
  0xb5   :  { %v6241_v29 = vld [vmem:[#allocation2 + $0x30] sm:$0xff]   ;;  %v6245_v35 = vld [vmem:[#allocation2 + $0x38] sm:$0xff]   ;;  %v6254_v47 = vld [vmem:[#allocation2 + $0x1c0] sm:$0xff]  }
  0xb6   :  { %5690 = vmatpush3.bf16.msra.mxu0 %v6225_v10  ;;  %v6242_v30 = vld [vmem:[#allocation2 + $0xb0] sm:$0xff]   ;;  %v6246_v36 = vld [vmem:[#allocation2 + $0xb8] sm:$0xff]   ;;  %v6255_v50 = vld [vmem:[#allocation2 + $0x100] sm:$0xff]  }
  0xb7   :  { %5712 = vmatpush3.bf16.msra.mxu1 %v6226_v11  ;;  %5691 = vmatprep.subr.bf16.mxu0 %v6227_v12  ;;  %v6247_v38 = vld [vmem:[%s7649_s28] ss:$48 sps:$4 sm:$0xff]   ;;  %v6251_v40 = vld [vmem:[%s7649_s28 + $0x4] ss:$48 sps:$4 sm:$0xff]   ;;  %v6257_v56 = vld [vmem:[#allocation2 + $0x148] sm:$0xff]  }
  0xb8   :  { %5713 = vmatprep.subr.bf16.mxu1 %v6228_v13  ;;  %v6249_v39 = vld [vmem:[%s7649_s28 + $0x60] ss:$48 sps:$4 sm:$0xff]   ;;  %v6252_v41 = vld [vmem:[%s7649_s28 + $0x64] ss:$48 sps:$4 sm:$0xff]   ;;  %v237_v42 = vrot.slane %v6247_v38, %v7289_v37  ;;  %v244_v45 = vrot.slane %v6251_v40, %v7289_v37  ;;  %v6258_v59 = vld [vmem:[#allocation2 + $0x1c8] sm:$0xff]  }
  0xb9   :  { %v251_v43 = vrot.slane %v6249_v39, %v7289_v37  ;;  %v258_v46 = vrot.slane %v6252_v41, %v7289_v37  ;;  %v6256_v53 = vld [vmem:[#allocation2 + $0x180] sm:$0xff]   ;;  %v6259_v60 = vld [vmem:[#allocation2 + $0x108] sm:$0xff]   ;;  %v6261_v62 = vld [vmem:[#allocation2 + $0x150] sm:$0xff]  }
  0xba   :  { %5692 = vmatpush3.bf16.msra.mxu0 %v6229_v14  ;;  %v6260_v61 = vld [vmem:[#allocation2 + $0x188] sm:$0xff]   ;;  %v6262_v63 = vld [vmem:[#allocation2 + $0x1d0] sm:$0xff]   ;;  %v6265_v2 = vld [vmem:[#allocation2 + $0x158] sm:$0xff]  }
  0xbb   :  { %5714 = vmatpush3.bf16.msra.mxu1 %v6230_v15  ;;  %5693 = vmatprep.subr.bf16.mxu0 %v6231_v16  ;;  %v260_v48 = vcombine.high %v237_v42, %v251_v43  ;;  %v259_v49 = vcombine.low %v237_v42, %v251_v43  ;;  %v262_v51 = vcombine.high %v244_v45, %v258_v46  ;;  %v6263_v0 = vld [vmem:[#allocation2 + $0x110] sm:$0xff]   ;;  %v6266_v3 = vld [vmem:[#allocation2 + $0x1d8] sm:$0xff]   ;;  %v6269_v6 = vld [vmem:[#allocation2 + $0x160] sm:$0xff]  }
  0xbc   :  { %5715 = vmatprep.subr.bf16.mxu1 %v6232_v17  ;;  %v261_v52 = vcombine.low %v244_v45, %v258_v46  ;;  %v6264_v1 = vld [vmem:[#allocation2 + $0x190] sm:$0xff]   ;;  %v6267_v4 = vld [vmem:[#allocation2 + $0x118] sm:$0xff]   ;;  %v6270_v7 = vld [vmem:[#allocation2 + $0x1e0] sm:$0xff]  }
  0xbd   :  { %v468_v54 = vpack.c.bf16 %v260_v48, %v260_v48  ;;  %v467_v55 = vpack.c.bf16 %v259_v49, %v259_v49  ;;  %v470_v57 = vpack.c.bf16 %v262_v51, %v262_v51  ;;  %v6268_v5 = vld [vmem:[#allocation2 + $0x198] sm:$0xff]   ;;  %v6271_v8 = vld [vmem:[#allocation2 + $0x120] sm:$0xff]   ;;  %v6273_v10 = vld [vmem:[#allocation2 + $0x168] sm:$0xff]  }
  0xbe   :  { %5694 = vmatpush3.bf16.msra.mxu0 %v6233_v18  ;;  %v469_v58 = vpack.c.bf16 %v261_v52, %v261_v52  ;;  %v6272_v9 = vld [vmem:[#allocation2 + $0x1a0] sm:$0xff]   ;;  %v6274_v11 = vld [vmem:[#allocation2 + $0x1e8] sm:$0xff]   ;;  %v6277_v14 = vld [vmem:[#allocation2 + $0x170] sm:$0xff]  }
  0xbf   :  { %5716 = vmatpush3.bf16.msra.mxu1 %v6234_v19  ;;  %5695 = vmatprep.subr.bf16.mxu0 %v6235_v20  ;;  %v6275_v12 = vld [vmem:[#allocation2 + $0x128] sm:$0xff]   ;;  %v6278_v15 = vld [vmem:[#allocation2 + $0x1f0] sm:$0xff]   ;;  %v6281_v18 = vld [vmem:[#allocation2 + $0x178] sm:$0xff]  }
  0xc0   :  { %5717 = vmatprep.subr.bf16.mxu1 %v6236_v21  ;;  %2066 = vmatprep.mubr.bf16.mxu0 %v468_v54  ;;  %v6276_v13 = vld [vmem:[#allocation2 + $0x1a8] sm:$0xff]   ;;  %v6279_v16 = vld [vmem:[#allocation2 + $0x130] sm:$0xff]   ;;  %v6282_v19 = vld [vmem:[#allocation2 + $0x1f8] sm:$0xff]  }
  0xc1   :  { %2106 = vmatprep.mubr.bf16.mxu1 %v470_v57  ;;  %v6280_v17 = vld [vmem:[#allocation2 + $0x1b0] sm:$0xff]   ;;  %v6283_v20 = vld [vmem:[#allocation2 + $0x138] sm:$0xff]   ;;  %v6292_v31 = vld [vmem:[#allocation2 + $0x2c0] sm:$0xff]  }
  0xc2   :  { %5696 = vmatpush3.bf16.msra.mxu0 %v6237_v22  ;;  %v6284_v21 = vld [vmem:[#allocation2 + $0x1b8] sm:$0xff]   ;;  %v6294_v39 = vld [vmem:[#allocation2 + $0x280] sm:$0xff]   ;;  %v6295_v42 = vld [vmem:[#allocation2 + $0x248] sm:$0xff]  }
  0xc3   :  { %5718 = vmatpush3.bf16.msra.mxu1 %v6238_v23  ;;  %5697 = vmatprep.subr.bf16.mxu0 %v6239_v27  ;;  %v6285_v22 = vld [vmem:[%s7649_s28 + $0x8] ss:$48 sps:$4 sm:$0xff]   ;;  %v6289_v24 = vld [vmem:[%s7649_s28 + $0xc] ss:$48 sps:$4 sm:$0xff]   ;;  %v6299_v48 = vld [vmem:[#allocation2 + $0x250] sm:$0xff]  }
  0xc4   :  { %5719 = vmatprep.subr.bf16.mxu1 %v6240_v28  ;;  %v6287_v23 = vld [vmem:[%s7649_s28 + $0x68] ss:$48 sps:$4 sm:$0xff]   ;;  %v6290_v25 = vld [vmem:[%s7649_s28 + $0x6c] ss:$48 sps:$4 sm:$0xff]   ;;  %v273_v26 = vrot.slane %v6285_v22, %v7289_v37  ;;  %v280_v28 = vrot.slane %v6289_v24, %v7289_v37  ;;  %v6300_v49 = vld [vmem:[#allocation2 + $0x2d0] sm:$0xff]  }
  0xc5   :  { %v287_v27 = vrot.slane %v6287_v23, %v7289_v37  ;;  %v6296_v45 = vld [vmem:[#allocation2 + $0x2c8] sm:$0xff]   ;;  %v6302_v51 = vld [vmem:[#allocation2 + $0x290] sm:$0xff]   ;;  %v6303_v52 = vld [vmem:[#allocation2 + $0x258] sm:$0xff]  }
  0xc6   :  { %5698 = vmatpush3.bf16.msra.mxu0 %v6241_v29  ;;  %v6291_v29 = vld [vmem:[#allocation2 + $0x240] sm:$0xff]   ;;  %v6297_v46 = vld [vmem:[#allocation2 + $0x208] sm:$0xff]   ;;  %v6305_v54 = vld [vmem:[#allocation2 + $0x218] sm:$0xff]  }
  0xc7   :  { %5720 = vmatpush3.bf16.msra.mxu1 %v6242_v30  ;;  %5699 = vmatprep.subr.bf16.mxu0 %v6243_v33  ;;  %v294_v30 = vrot.slane %v6290_v25, %v7289_v37  ;;  %v296_v33 = vcombine.high %v273_v26, %v287_v27  ;;  %v6308_v57 = vld [vmem:[#allocation2 + $0x2e0] sm:$0xff]  }
  0xc8   :  { %5721 = vmatprep.subr.bf16.mxu1 %v6244_v34  ;;  %v295_v34 = vcombine.low %v273_v26, %v287_v27  ;;  %v6331_v22 = vld [vmem:[#allocation2 + $0x300] sm:$0xff]  }
  0xc9   :  { %v297_v38 = vcombine.low %v280_v28, %v294_v30  ;;  %v472_v40 = vpack.c.bf16 %v296_v33, %v296_v33  ;;  %v6332_v23 = vld [vmem:[#allocation2 + $0x380] sm:$0xff]   ;;  %v6337_v33 = vld [vmem:[#allocation2 + $0x350] sm:$0xff]  }
  0xca   :  { %5700 = vmatpush3.bf16.msra.mxu0 %v6245_v35  ;;  %v6293_v35 = vld [vmem:[#allocation2 + $0x200] sm:$0xff]   ;;  %v471_v41 = vpack.c.bf16 %v295_v34, %v295_v34  ;;  %v6338_v34 = vld [vmem:[#allocation2 + $0x3d0] sm:$0xff]  }
  0xcb   :  { %5722 = vmatpush3.bf16.msra.mxu1 %v6246_v36  ;;  %5729 = vmatprep.subr.bf16.mxu0 %v6253_v44  ;;  %v298_v36 = vcombine.high %v280_v28, %v294_v30  ;;  %v473_v44 = vpack.c.bf16 %v297_v38, %v297_v38  ;;  %v6333_v28 = vld [vmem:[#allocation2 + $0x348] sm:$0xff]   ;;  %v6341_v38 = vld [vmem:[#allocation2 + $0x358] sm:$0xff]  }
  0xcc   :  { %5751 = vmatprep.subr.bf16.mxu1 %v6254_v47  ;;  %v6298_v47 = vld [vmem:[#allocation2 + $0x288] sm:$0xff]  }
  0xcd   :  { %2067 = vmatmul.mubr.bf16.vlgmr.msra.gmra.mrb[0].mxu0 %v467_v55  ;;  %v474_v43 = vpack.c.bf16 %v298_v36, %v298_v36  ;;  %v6306_v55 = vld [vmem:[#allocation2 + $0x298] sm:$0xff]   ;;  %v6335_v30 = vld [vmem:[#allocation2 + $0x308] sm:$0xff]   ;;  %v6340_v36 = vld [vmem:[#allocation2 + $0x390] sm:$0xff]  }
  0xce   :  { %2107 = vmatmul.mubr.bf16.vlgmr.msra.gmra.mrb[0].mxu1 %v469_v58  ;;  %5730 = vmatpush3.bf16.msra.mxu0 %v6255_v50  ;;  %v6301_v50 = vld [vmem:[#allocation2 + $0x210] sm:$0xff]   ;;  %v6309_v58 = vld [vmem:[#allocation2 + $0x220] sm:$0xff]  }
  0xcf   :  { %5752 = vmatpush3.bf16.msra.mxu1 %v6256_v53  ;;  %5731 = vmatprep.subr.bf16.mxu0 %v6257_v56  ;;  %v6304_v53 = vld [vmem:[#allocation2 + $0x2d8] sm:$0xff]   ;;  %v6307_v56 = vld [vmem:[#allocation2 + $0x260] sm:$0xff]  }
  0xd0   :  { %5753 = vmatprep.subr.bf16.mxu1 %v6258_v59  ;;  %2146 = vmatprep.mubr.bf16.mxu0 %v472_v40  ;;  %v6310_v59 = vld [vmem:[#allocation2 + $0x2a0] sm:$0xff]   ;;  %v6343_v40 = vld [vmem:[#allocation2 + $0x318] sm:$0xff]  }
  0xd1   :  { %2186 = vmatprep.mubr.bf16.mxu1 %v474_v43  ;;  %v6346_v43 = vld [vmem:[#allocation2 + $0x3e0] sm:$0xff]  }
  0xd2   :  { %5732 = vmatpush3.bf16.msra.mxu0 %v6259_v60  ;;  %v6311_v60 = vld [vmem:[#allocation2 + $0x268] sm:$0xff]  }
  0xd3   :  { %5754 = vmatpush3.bf16.msra.mxu1 %v6260_v61  ;;  %5733 = vmatprep.subr.bf16.mxu0 %v6261_v62  ;;  %v6312_v61 = vld [vmem:[#allocation2 + $0x2e8] sm:$0xff]  }
  0xd4   :  { %5755 = vmatprep.subr.bf16.mxu1 %v6262_v63  ;;  %v6313_v62 = vld [vmem:[#allocation2 + $0x228] sm:$0xff]  }
  0xd5   :  { %v6314_v63 = vld [vmem:[#allocation2 + $0x2a8] sm:$0xff]  }
  0xd6   :  { %5734 = vmatpush3.bf16.msra.mxu0 %v6263_v0  ;;  %v6315_v0 = vld [vmem:[#allocation2 + $0x270] sm:$0xff]  }
  0xd7   :  { %5756 = vmatpush3.bf16.msra.mxu1 %v6264_v1  ;;  %5735 = vmatprep.subr.bf16.mxu0 %v6265_v2  ;;  %v6316_v1 = vld [vmem:[#allocation2 + $0x2f0] sm:$0xff]  }
  0xd8   :  { %5757 = vmatprep.subr.bf16.mxu1 %v6266_v3  ;;  %v6317_v2 = vld [vmem:[#allocation2 + $0x230] sm:$0xff]  }
  0xd9   :  { %v6318_v3 = vld [vmem:[#allocation2 + $0x2b0] sm:$0xff]  }
  0xda   :  { %5736 = vmatpush3.bf16.msra.mxu0 %v6267_v4  ;;  %v6319_v4 = vld [vmem:[#allocation2 + $0x278] sm:$0xff]  }
  0xdb   :  { %5758 = vmatpush3.bf16.msra.mxu1 %v6268_v5  ;;  %5737 = vmatprep.subr.bf16.mxu0 %v6269_v6  ;;  %v6320_v5 = vld [vmem:[#allocation2 + $0x2f8] sm:$0xff]  }
  0xdc   :  { %5759 = vmatprep.subr.bf16.mxu1 %v6270_v7  ;;  %v6321_v6 = vld [vmem:[#allocation2 + $0x238] sm:$0xff]  }
  0xdd   :  { %v6322_v7 = vld [vmem:[#allocation2 + $0x2b8] sm:$0xff]  }
  0xde   :  { %5738 = vmatpush3.bf16.msra.mxu0 %v6271_v8  ;;  %v6323_v8 = vld [vmem:[%s7649_s28 + $0x10] ss:$48 sps:$4 sm:$0xff]  }
  0xdf   :  { %5760 = vmatpush3.bf16.msra.mxu1 %v6272_v9  ;;  %5739 = vmatprep.subr.bf16.mxu0 %v6273_v10  ;;  %v6325_v9 = vld [vmem:[%s7649_s28 + $0x70] ss:$48 sps:$4 sm:$0xff]   ;;  %v6327_v10 = vld [vmem:[%s7649_s28 + $0x14] ss:$48 sps:$4 sm:$0xff]  }
  0xe0   :  { %5761 = vmatprep.subr.bf16.mxu1 %v6274_v11  ;;  %v6328_v11 = vld [vmem:[%s7649_s28 + $0x74] ss:$48 sps:$4 sm:$0xff]  }
  0xe2   :  { %5740 = vmatpush3.bf16.msra.mxu0 %v6275_v12  ;;  %v309_v12 = vrot.slane %v6323_v8, %v7289_v37 }
  0xe3   :  { %5762 = vmatpush3.bf16.msra.mxu1 %v6276_v13  ;;  %5741 = vmatprep.subr.bf16.mxu0 %v6277_v14  ;;  %v6329_v13 = vld [vmem:[#allocation2 + $0x340] sm:$0xff]   ;;  %v323_v14 = vrot.slane %v6325_v9, %v7289_v37 }
  0xe4   :  { %5763 = vmatprep.subr.bf16.mxu1 %v6278_v15  ;;  %v316_v15 = vrot.slane %v6327_v10, %v7289_v37  ;;  %v6370_v9 = vld [vmem:[#allocation2 + $0x480] sm:$0xff]  }
  0xe6   :  { %5742 = vmatpush3.bf16.msra.mxu0 %v6279_v16  ;;  %v330_v16 = vrot.slane %v6328_v11, %v7289_v37 }
  0xe7   :  { %5764 = vmatpush3.bf16.msra.mxu1 %v6280_v17  ;;  %5743 = vmatprep.subr.bf16.mxu0 %v6281_v18  ;;  %v6330_v17 = vld [vmem:[#allocation2 + $0x3c0] sm:$0xff]   ;;  %v332_v18 = vcombine.high %v309_v12, %v323_v14 }
  0xe8   :  { %5765 = vmatprep.subr.bf16.mxu1 %v6282_v19  ;;  %v334_v19 = vcombine.high %v316_v15, %v330_v16 }
  0xe9   :  { %v476_v24 = vpack.c.bf16 %v332_v18, %v332_v18  ;;  %v6375_v18 = vld [vmem:[#allocation2 + $0x450] sm:$0xff]  }
  0xea   :  { %5744 = vmatpush3.bf16.msra.mxu0 %v6283_v20  ;;  %v331_v20 = vcombine.low %v309_v12, %v323_v14  ;;  %v478_v25 = vpack.c.bf16 %v334_v19, %v334_v19  ;;  %v6371_v12 = vld [vmem:[#allocation2 + $0x448] sm:$0xff]   ;;  %v6376_v19 = vld [vmem:[#allocation2 + $0x4d0] sm:$0xff]  }
  0xeb   :  { %5766 = vmatpush3.bf16.msra.mxu1 %v6284_v21  ;;  %5773 = vmatprep.subr.bf16.mxu0 %v6291_v29  ;;  %v333_v21 = vcombine.low %v316_v15, %v330_v16  ;;  %v6334_v29 = vld [vmem:[#allocation2 + $0x3c8] sm:$0xff]  }
  0xec   :  { %5795 = vmatprep.subr.bf16.mxu1 %v6292_v31  ;;  %v475_v26 = vpack.c.bf16 %v331_v20, %v331_v20  ;;  %v6336_v31 = vld [vmem:[#allocation2 + $0x388] sm:$0xff]   ;;  %v6377_v20 = vld [vmem:[#allocation2 + $0x410] sm:$0xff]  }
  0xed   :  { %2147 = vmatmul.mubr.bf16.vlgmr.msra.gmra.mrb[4].mxu0 %v471_v41  ;;  %v477_v27 = vpack.c.bf16 %v333_v21, %v333_v21  ;;  %v6344_v41 = vld [vmem:[#allocation2 + $0x398] sm:$0xff]   ;;  %v6372_v15 = vld [vmem:[#allocation2 + $0x4c8] sm:$0xff]   ;;  %v6378_v21 = vld [vmem:[#allocation2 + $0x490] sm:$0xff]  }
  0xee   :  { %2187 = vmatmul.mubr.bf16.vlgmr.msra.gmra.mrb[4].mxu1 %v473_v44  ;;  %5774 = vmatpush3.bf16.msra.mxu0 %v6293_v35  ;;  %v6339_v35 = vld [vmem:[#allocation2 + $0x310] sm:$0xff]   ;;  %v6347_v44 = vld [vmem:[#allocation2 + $0x320] sm:$0xff]   ;;  %v6373_v16 = vld [vmem:[#allocation2 + $0x408] sm:$0xff]  }
  0xef   :  { %5796 = vmatpush3.bf16.msra.mxu1 %v6294_v39  ;;  %5775 = vmatprep.subr.bf16.mxu0 %v6295_v42  ;;  %v6342_v39 = vld [vmem:[#allocation2 + $0x3d8] sm:$0xff]   ;;  %v6345_v42 = vld [vmem:[#allocation2 + $0x360] sm:$0xff]  }
  0xf0   :  { %5797 = vmatprep.subr.bf16.mxu1 %v6296_v45  ;;  %2226 = vmatprep.mubr.bf16.mxu0 %v476_v24  ;;  %v6348_v45 = vld [vmem:[#allocation2 + $0x3a0] sm:$0xff]   ;;  %v6381_v24 = vld [vmem:[#allocation2 + $0x418] sm:$0xff]  }
  0xf1   :  { %2266 = vmatprep.mubr.bf16.mxu1 %v478_v25  ;;  %v6382_v25 = vld [vmem:[#allocation2 + $0x498] sm:$0xff]  }
  0xf2   :  { %5776 = vmatpush3.bf16.msra.mxu0 %v6297_v46  ;;  %v6349_v46 = vld [vmem:[#allocation2 + $0x368] sm:$0xff]  }
  0xf3   :  { %5798 = vmatpush3.bf16.msra.mxu1 %v6298_v47  ;;  %5777 = vmatprep.subr.bf16.mxu0 %v6299_v48  ;;  %v6350_v47 = vld [vmem:[#allocation2 + $0x3e8] sm:$0xff]  }
  0xf4   :  { %5799 = vmatprep.subr.bf16.mxu1 %v6300_v49  ;;  %v6351_v48 = vld [vmem:[#allocation2 + $0x328] sm:$0xff]  }
  0xf5   :  { %v6352_v49 = vld [vmem:[#allocation2 + $0x3a8] sm:$0xff]  }
  0xf6   :  { %5778 = vmatpush3.bf16.msra.mxu0 %v6301_v50  ;;  %v6353_v50 = vld [vmem:[#allocation2 + $0x370] sm:$0xff]  }
  0xf7   :  { %5800 = vmatpush3.bf16.msra.mxu1 %v6302_v51  ;;  %5779 = vmatprep.subr.bf16.mxu0 %v6303_v52  ;;  %v6354_v51 = vld [vmem:[#allocation2 + $0x3f0] sm:$0xff]  }
  0xf8   :  { %5801 = vmatprep.subr.bf16.mxu1 %v6304_v53  ;;  %v6355_v52 = vld [vmem:[#allocation2 + $0x330] sm:$0xff]  }
  0xf9   :  { %v6356_v53 = vld [vmem:[#allocation2 + $0x3b0] sm:$0xff]  }
  0xfa   :  { %5780 = vmatpush3.bf16.msra.mxu0 %v6305_v54  ;;  %v6357_v54 = vld [vmem:[#allocation2 + $0x378] sm:$0xff]  }
  0xfb   :  { %5802 = vmatpush3.bf16.msra.mxu1 %v6306_v55  ;;  %5781 = vmatprep.subr.bf16.mxu0 %v6307_v56  ;;  %v6358_v55 = vld [vmem:[#allocation2 + $0x3f8] sm:$0xff]  }
  0xfc   :  { %5803 = vmatprep.subr.bf16.mxu1 %v6308_v57  ;;  %v6359_v56 = vld [vmem:[#allocation2 + $0x338] sm:$0xff]  }
  0xfd   :  { %v6360_v57 = vld [vmem:[#allocation2 + $0x3b8] sm:$0xff]  }
  0xfe   :  { %5782 = vmatpush3.bf16.msra.mxu0 %v6309_v58  ;;  %v6361_v58 = vld [vmem:[%s7649_s28 + $0x18] ss:$48 sps:$4 sm:$0xff]  }
  0xff   :  { %5804 = vmatpush3.bf16.msra.mxu1 %v6310_v59  ;;  %5783 = vmatprep.subr.bf16.mxu0 %v6311_v60  ;;  %v6363_v59 = vld [vmem:[%s7649_s28 + $0x78] ss:$48 sps:$4 sm:$0xff]   ;;  %v6365_v60 = vld [vmem:[%s7649_s28 + $0x1c] ss:$48 sps:$4 sm:$0xff]  }
 0x100   :  { %5805 = vmatprep.subr.bf16.mxu1 %v6312_v61  ;;  %v6366_v61 = vld [vmem:[%s7649_s28 + $0x7c] ss:$48 sps:$4 sm:$0xff]  }
 0x102   :  { %5784 = vmatpush3.bf16.msra.mxu0 %v6313_v62  ;;  %v345_v62 = vrot.slane %v6361_v58, %v7289_v37 }
 0x103   :  { %5806 = vmatpush3.bf16.msra.mxu1 %v6314_v63  ;;  %5785 = vmatprep.subr.bf16.mxu0 %v6315_v0  ;;  %v359_v63 = vrot.slane %v6363_v59, %v7289_v37  ;;  %v6367_v0 = vld [vmem:[#allocation2 + $0x440] sm:$0xff]  }
 0x104   :  { %5807 = vmatprep.subr.bf16.mxu1 %v6316_v1  ;;  %v352_v1 = vrot.slane %v6365_v60, %v7289_v37  ;;  %v6408_v59 = vld [vmem:[#allocation2 + $0x580] sm:$0xff]  }
 0x106   :  { %5786 = vmatpush3.bf16.msra.mxu0 %v6317_v2  ;;  %v366_v2 = vrot.slane %v6366_v61, %v7289_v37 }
 0x107   :  { %5808 = vmatpush3.bf16.msra.mxu1 %v6318_v3  ;;  %5787 = vmatprep.subr.bf16.mxu0 %v6319_v4  ;;  %v6368_v3 = vld [vmem:[#allocation2 + $0x4c0] sm:$0xff]   ;;  %v368_v4 = vcombine.high %v345_v62, %v359_v63 }
 0x108   :  { %5809 = vmatprep.subr.bf16.mxu1 %v6320_v5  ;;  %v367_v5 = vcombine.low %v345_v62, %v359_v63  ;;  %v369_v8 = vcombine.low %v352_v1, %v366_v2  ;;  %v6409_v62 = vld [vmem:[#allocation2 + $0x548] sm:$0xff]  }
 0x109   :  { %v480_v10 = vpack.c.bf16 %v368_v4, %v368_v4  ;;  %v6413_v4 = vld [vmem:[#allocation2 + $0x550] sm:$0xff]  }
 0x10a   :  { %5788 = vmatpush3.bf16.msra.mxu0 %v6321_v6  ;;  %v6369_v6 = vld [vmem:[#allocation2 + $0x400] sm:$0xff]   ;;  %v479_v11 = vpack.c.bf16 %v367_v5, %v367_v5  ;;  %v481_v14 = vpack.c.bf16 %v369_v8, %v369_v8  ;;  %v6414_v5 = vld [vmem:[#allocation2 + $0x5d0] sm:$0xff]   ;;  %v6417_v8 = vld [vmem:[#allocation2 + $0x558] sm:$0xff]  }
 0x10b   :  { %5810 = vmatpush3.bf16.msra.mxu1 %v6322_v7  ;;  %5817 = vmatprep.subr.bf16.mxu0 %v6329_v13  ;;  %v370_v7 = vcombine.high %v352_v1, %v366_v2  ;;  %v6410_v1 = vld [vmem:[#allocation2 + $0x5c8] sm:$0xff]  }
 0x10c   :  { %5839 = vmatprep.subr.bf16.mxu1 %v6330_v17  ;;  %v6374_v17 = vld [vmem:[#allocation2 + $0x488] sm:$0xff]  }
 0x10d   :  { %2227 = vmatmul.mubr.bf16.vlgmr.msra.gmra.mrb[8].mxu0 %v475_v26  ;;  %v482_v13 = vpack.c.bf16 %v370_v7, %v370_v7  ;;  %v6383_v26 = vld [vmem:[#allocation2 + $0x460] sm:$0xff]   ;;  %v6411_v2 = vld [vmem:[#allocation2 + $0x508] sm:$0xff]   ;;  %v6416_v7 = vld [vmem:[#allocation2 + $0x590] sm:$0xff]  }
 0x10e   :  { %2267 = vmatmul.mubr.bf16.vlgmr.msra.gmra.mrb[8].mxu1 %v477_v27  ;;  %5818 = vmatpush3.bf16.msra.mxu0 %v6331_v22  ;;  %v6379_v22 = vld [vmem:[#allocation2 + $0x458] sm:$0xff]   ;;  %v6384_v27 = vld [vmem:[#allocation2 + $0x4e0] sm:$0xff]  }
 0x10f   :  { %5840 = vmatpush3.bf16.msra.mxu1 %v6332_v23  ;;  %5819 = vmatprep.subr.bf16.mxu0 %v6333_v28  ;;  %v6380_v23 = vld [vmem:[#allocation2 + $0x4d8] sm:$0xff]   ;;  %v6385_v28 = vld [vmem:[#allocation2 + $0x420] sm:$0xff]  }
 0x110   :  { %5841 = vmatprep.subr.bf16.mxu1 %v6334_v29  ;;  %2306 = vmatprep.mubr.bf16.mxu0 %v480_v10  ;;  %v6386_v29 = vld [vmem:[#allocation2 + $0x4a0] sm:$0xff]   ;;  %v6419_v10 = vld [vmem:[#allocation2 + $0x518] sm:$0xff]  }
 0x111   :  { %2346 = vmatprep.mubr.bf16.mxu1 %v482_v13  ;;  %v6422_v13 = vld [vmem:[#allocation2 + $0x5e0] sm:$0xff]  }
 0x112   :  { %5820 = vmatpush3.bf16.msra.mxu0 %v6335_v30  ;;  %v6387_v30 = vld [vmem:[#allocation2 + $0x468] sm:$0xff]  }
 0x113   :  { %5842 = vmatpush3.bf16.msra.mxu1 %v6336_v31  ;;  %5821 = vmatprep.subr.bf16.mxu0 %v6337_v33  ;;  %v6388_v31 = vld [vmem:[#allocation2 + $0x4e8] sm:$0xff]  }
 0x114   :  { %5843 = vmatprep.subr.bf16.mxu1 %v6338_v34  ;;  %v6389_v33 = vld [vmem:[#allocation2 + $0x428] sm:$0xff]  }
 0x115   :  { %v6390_v34 = vld [vmem:[#allocation2 + $0x4a8] sm:$0xff]  }
 0x116   :  { %5822 = vmatpush3.bf16.msra.mxu0 %v6339_v35  ;;  %v6391_v35 = vld [vmem:[#allocation2 + $0x470] sm:$0xff]  }
 0x117   :  { %5844 = vmatpush3.bf16.msra.mxu1 %v6340_v36  ;;  %5823 = vmatprep.subr.bf16.mxu0 %v6341_v38  ;;  %v6392_v36 = vld [vmem:[#allocation2 + $0x4f0] sm:$0xff]  }
 0x118   :  { %5845 = vmatprep.subr.bf16.mxu1 %v6342_v39  ;;  %v6393_v38 = vld [vmem:[#allocation2 + $0x430] sm:$0xff]  }
 0x119   :  { %v6394_v39 = vld [vmem:[#allocation2 + $0x4b0] sm:$0xff]  }
 0x11a   :  { %5824 = vmatpush3.bf16.msra.mxu0 %v6343_v40  ;;  %v6395_v40 = vld [vmem:[#allocation2 + $0x478] sm:$0xff]  }
 0x11b   :  { %5846 = vmatpush3.bf16.msra.mxu1 %v6344_v41  ;;  %5825 = vmatprep.subr.bf16.mxu0 %v6345_v42  ;;  %v6396_v41 = vld [vmem:[#allocation2 + $0x4f8] sm:$0xff]  }
 0x11c   :  { %5847 = vmatprep.subr.bf16.mxu1 %v6346_v43  ;;  %v6397_v42 = vld [vmem:[#allocation2 + $0x438] sm:$0xff]  }
 0x11d   :  { %v6398_v43 = vld [vmem:[#allocation2 + $0x4b8] sm:$0xff]  }
 0x11e   :  { %5826 = vmatpush3.bf16.msra.mxu0 %v6347_v44  ;;  %v6399_v44 = vld [vmem:[%s7649_s28 + $0x20] ss:$48 sps:$4 sm:$0xff]  }
 0x11f   :  { %5848 = vmatpush3.bf16.msra.mxu1 %v6348_v45  ;;  %5827 = vmatprep.subr.bf16.mxu0 %v6349_v46  ;;  %v6401_v45 = vld [vmem:[%s7649_s28 + $0x80] ss:$48 sps:$4 sm:$0xff]   ;;  %v6403_v46 = vld [vmem:[%s7649_s28 + $0x24] ss:$48 sps:$4 sm:$0xff]  }
 0x120   :  { %5849 = vmatprep.subr.bf16.mxu1 %v6350_v47  ;;  %v6404_v47 = vld [vmem:[%s7649_s28 + $0x84] ss:$48 sps:$4 sm:$0xff]  }
 0x122   :  { %5828 = vmatpush3.bf16.msra.mxu0 %v6351_v48  ;;  %v381_v48 = vrot.slane %v6399_v44, %v7289_v37 }
 0x123   :  { %5850 = vmatpush3.bf16.msra.mxu1 %v6352_v49  ;;  %5829 = vmatprep.subr.bf16.mxu0 %v6353_v50  ;;  %v395_v49 = vrot.slane %v6401_v45, %v7289_v37  ;;  %v388_v50 = vrot.slane %v6403_v46, %v7289_v37  ;;  %v5208_v46 = vld [vmem:[%s7650_s0] ss:$0 sm:$0xff] }
 0x124   :  { %5851 = vmatprep.subr.bf16.mxu1 %v6354_v51  ;;  %v6405_v51 = vld [vmem:[#allocation2 + $0x540] sm:$0xff]  }
 0x126   :  { %5830 = vmatpush3.bf16.msra.mxu0 %v6355_v52  ;;  %v402_v52 = vrot.slane %v6404_v47, %v7289_v37 }
 0x127   :  { %5852 = vmatpush3.bf16.msra.mxu1 %v6356_v53  ;;  %5831 = vmatprep.subr.bf16.mxu0 %v6357_v54  ;;  %v6406_v53 = vld [vmem:[#allocation2 + $0x5c0] sm:$0xff]   ;;  %v404_v54 = vcombine.high %v381_v48, %v395_v49 }
 0x128   :  { %5853 = vmatprep.subr.bf16.mxu1 %v6358_v55  ;;  %v403_v55 = vcombine.low %v381_v48, %v395_v49  ;;  %v405_v58 = vcombine.low %v388_v50, %v402_v52 }
 0x129   :  { %v484_v60 = vpack.c.bf16 %v404_v54, %v404_v54 }
 0x12a   :  { %5832 = vmatpush3.bf16.msra.mxu0 %v6359_v56  ;;  %v6407_v56 = vld [vmem:[#allocation2 + $0x500] sm:$0xff]   ;;  %v483_v61 = vpack.c.bf16 %v403_v55, %v403_v55 }
 0x12b   :  { %5854 = vmatpush3.bf16.msra.mxu1 %v6360_v57  ;;  %5861 = vmatprep.subr.bf16.mxu0 %v6367_v0  ;;  %v406_v57 = vcombine.high %v388_v50, %v402_v52  ;;  %v485_v0 = vpack.c.bf16 %v405_v58, %v405_v58  ;;  %v6443_v58 = vld [vmem:[#allocation5] ss:$8 sps:$4 sm:$0xff]  }
 0x12c   :  { %5883 = vmatprep.subr.bf16.mxu1 %v6368_v3  ;;  %v6412_v3 = vld [vmem:[#allocation2 + $0x588] sm:$0xff]  }
 0x12d   :  { %2307 = vmatmul.mubr.bf16.vlgmr.msra.gmra.mrb[12].mxu0 %v479_v11  ;;  %v486_v63 = vpack.c.bf16 %v406_v57, %v406_v57  ;;  %v6420_v11 = vld [vmem:[#allocation2 + $0x598] sm:$0xff]  }
 0x12e   :  { %2347 = vmatmul.mubr.bf16.vlgmr.msra.gmra.mrb[12].mxu1 %v481_v14  ;;  %5862 = vmatpush3.bf16.msra.mxu0 %v6369_v6  ;;  %v6415_v6 = vld [vmem:[#allocation2 + $0x510] sm:$0xff]   ;;  %v6423_v14 = vld [vmem:[#allocation2 + $0x520] sm:$0xff]  }
 0x12f   :  { %5884 = vmatpush3.bf16.msra.mxu1 %v6370_v9  ;;  %5863 = vmatprep.subr.bf16.mxu0 %v6371_v12  ;;  %v6418_v9 = vld [vmem:[#allocation2 + $0x5d8] sm:$0xff]   ;;  %v6421_v12 = vld [vmem:[#allocation2 + $0x560] sm:$0xff]  }
 0x130   :  { %5885 = vmatprep.subr.bf16.mxu1 %v6372_v15  ;;  %2386 = vmatprep.mubr.bf16.mxu0 %v484_v60  ;;  %v6424_v15 = vld [vmem:[#allocation2 + $0x5a0] sm:$0xff]   ;;  %v6448_v60 = vld [vmem:[#allocation5 + $0x14] ss:$8 sps:$4 sm:$0xff]  }
 0x131   :  { %2426 = vmatprep.mubr.bf16.mxu1 %v486_v63  ;;  %v6449_v63 = vld [vmem:[#allocation5 + $0x20] ss:$8 sps:$4 sm:$0xff]  }
 0x132   :  { %5864 = vmatpush3.bf16.msra.mxu0 %v6373_v16  ;;  %v6425_v16 = vld [vmem:[#allocation2 + $0x568] sm:$0xff]  }
 0x133   :  { %5886 = vmatpush3.bf16.msra.mxu1 %v6374_v17  ;;  %5865 = vmatprep.subr.bf16.mxu0 %v6375_v18  ;;  %v6426_v17 = vld [vmem:[#allocation2 + $0x5e8] sm:$0xff]  }
 0x134   :  { %5887 = vmatprep.subr.bf16.mxu1 %v6376_v19  ;;  %v6427_v18 = vld [vmem:[#allocation2 + $0x528] sm:$0xff]  }
 0x135   :  { %v6428_v19 = vld [vmem:[#allocation2 + $0x5a8] sm:$0xff]  }
 0x136   :  { %5866 = vmatpush3.bf16.msra.mxu0 %v6377_v20  ;;  %v6429_v20 = vld [vmem:[#allocation2 + $0x570] sm:$0xff]  }
 0x137   :  { %5888 = vmatpush3.bf16.msra.mxu1 %v6378_v21  ;;  %5867 = vmatprep.subr.bf16.mxu0 %v6379_v22  ;;  %v6430_v21 = vld [vmem:[#allocation2 + $0x5f0] sm:$0xff]  }
 0x138   :  { %5889 = vmatprep.subr.bf16.mxu1 %v6380_v23  ;;  %v6431_v22 = vld [vmem:[#allocation2 + $0x530] sm:$0xff]  }
 0x139   :  { %v6432_v23 = vld [vmem:[#allocation2 + $0x5b0] sm:$0xff]  }
 0x13a   :  { %5868 = vmatpush3.bf16.msra.mxu0 %v6381_v24  ;;  %v6433_v24 = vld [vmem:[#allocation2 + $0x578] sm:$0xff]  }
 0x13b   :  { %5890 = vmatpush3.bf16.msra.mxu1 %v6382_v25  ;;  %5869 = vmatprep.subr.bf16.mxu0 %v6383_v26  ;;  %v6434_v25 = vld [vmem:[#allocation2 + $0x5f8] sm:$0xff]  }
 0x13c   :  { %5891 = vmatprep.subr.bf16.mxu1 %v6384_v27  ;;  %v6435_v26 = vld [vmem:[#allocation2 + $0x538] sm:$0xff]  }
 0x13d   :  { %v6436_v27 = vld [vmem:[#allocation2 + $0x5b8] sm:$0xff]  }
 0x13e   :  { %5870 = vmatpush3.bf16.msra.mxu0 %v6385_v28  ;;  %v6437_v28 = vld [vmem:[%s7649_s28 + $0x28] ss:$48 sps:$4 sm:$0xff]  }
 0x13f   :  { %5892 = vmatpush3.bf16.msra.mxu1 %v6386_v29  ;;  %5871 = vmatprep.subr.bf16.mxu0 %v6387_v30  ;;  %v6439_v29 = vld [vmem:[%s7649_s28 + $0x88] ss:$48 sps:$4 sm:$0xff]   ;;  %v6441_v30 = vld [vmem:[%s7649_s28 + $0x2c] ss:$48 sps:$4 sm:$0xff]  }
 0x140   :  { %5893 = vmatprep.subr.bf16.mxu1 %v6388_v31  ;;  %v6442_v31 = vld [vmem:[%s7649_s28 + $0x8c] ss:$48 sps:$4 sm:$0xff]  }
 0x142   :  { %5872 = vmatpush3.bf16.msra.mxu0 %v6389_v33  ;;  %v417_v33 = vrot.slane %v6437_v28, %v7289_v37  ;;  %v6494_v28 = vld [vmem:[#allocation7 + $0xc8] ss:$12 sps:$4 sm:$0xff]  }
 0x143   :  { %5894 = vmatpush3.bf16.msra.mxu1 %v6390_v34  ;;  %5873 = vmatprep.subr.bf16.mxu0 %v6391_v35  ;;  %v431_v34 = vrot.slane %v6439_v29, %v7289_v37  ;;  %v424_v35 = vrot.slane %v6441_v30, %v7289_v37  ;;  %v6473_v29 = vld [vmem:[#allocation7 + $0x30] ss:$12 sps:$4 sm:$0xff]   ;;  %v6478_v30 = vld [vmem:[#allocation7 + $0x4c] ss:$12 sps:$4 sm:$0xff]  }
 0x144   :  { %5895 = vmatprep.subr.bf16.mxu1 %v6392_v36  ;;  %v438_v36 = vrot.slane %v6442_v31, %v7289_v37  ;;  %v6476_v31 = vld [vmem:[#allocation7 + $0x48] ss:$12 sps:$4 sm:$0xff]  }
 0x146   :  { %5874 = vmatpush3.bf16.msra.mxu0 %v6393_v38  ;;  %v440_v38 = vcombine.high %v417_v33, %v431_v34 }
 0x147   :  { %5896 = vmatpush3.bf16.msra.mxu1 %v6394_v39  ;;  %5875 = vmatprep.subr.bf16.mxu0 %v6395_v40  ;;  %v442_v39 = vcombine.high %v424_v35, %v438_v36  ;;  %v439_v40 = vcombine.low %v417_v33, %v431_v34  ;;  %v6481_v33 = vld [vmem:[#allocation7 + $0x64] ss:$12 sps:$4 sm:$0xff]  }
 0x148   :  { %5897 = vmatprep.subr.bf16.mxu1 %v6396_v41  ;;  %v441_v41 = vcombine.low %v424_v35, %v438_v36 }
 0x149   :  { %v487_v44 = vpack.c.bf16 %v439_v40, %v439_v40 }
 0x14a   :  { %5876 = vmatpush3.bf16.msra.mxu0 %v6397_v42  ;;  %v488_v42 = vpack.c.bf16 %v440_v38, %v440_v38  ;;  %v489_v45 = vpack.c.bf16 %v441_v41, %v441_v41 }
 0x14b   :  { %5898 = vmatpush3.bf16.msra.mxu1 %v6398_v43  ;;  %5905 = vmatprep.subr.bf16.mxu0 %v6405_v51  ;;  %v490_v43 = vpack.c.bf16 %v442_v39, %v442_v39 }
 0x14c   :  { %5927 = vmatprep.subr.bf16.mxu1 %v6406_v53 }
 0x14d   :  { %2387 = vmatmul.mubr.bf16.vlgmr.msra.gmra.mrb[16].mxu0 %v483_v61  ;;  %v6446_v61 = vld [vmem:[#allocation5 + $0x10] ss:$8 sps:$4 sm:$0xff]  }
 0x14e   :  { %2427 = vmatmul.mubr.bf16.vlgmr.msra.gmra.mrb[16].mxu1 %v485_v0  ;;  %5906 = vmatpush3.bf16.msra.mxu0 %v6407_v56  ;;  %v6454_v0 = vld [vmem:[#allocation5 + $0x34] ss:$8 sps:$4 sm:$0xff]  }
 0x14f   :  { %5928 = vmatpush3.bf16.msra.mxu1 %v6408_v59  ;;  %5907 = vmatprep.subr.bf16.mxu0 %v6409_v62  ;;  %v6445_v59 = vld [vmem:[#allocation5 + $0x4] ss:$8 sps:$4 sm:$0xff]  }
 0x150   :  { %5929 = vmatprep.subr.bf16.mxu1 %v6410_v1  ;;  %2466 = vmatprep.mubr.bf16.mxu0 %v488_v42  ;;  %v6451_v62 = vld [vmem:[#allocation5 + $0x24] ss:$8 sps:$4 sm:$0xff]   ;;  %v6452_v1 = vld [vmem:[#allocation5 + $0x30] ss:$8 sps:$4 sm:$0xff]  }
 0x151   :  { %2506 = vmatprep.mubr.bf16.mxu1 %v490_v43  ;;  %v6479_v43 = vld [vmem:[#allocation7 + $0x60] ss:$12 sps:$4 sm:$0xff]  }
 0x152   :  { %5908 = vmatpush3.bf16.msra.mxu0 %v6411_v2  ;;  %v6457_v2 = vld [vmem:[#allocation5 + $0x44] ss:$8 sps:$4 sm:$0xff]  }
 0x153   :  { %5930 = vmatpush3.bf16.msra.mxu1 %v6412_v3  ;;  %5909 = vmatprep.subr.bf16.mxu0 %v6413_v4  ;;  %v6455_v3 = vld [vmem:[#allocation5 + $0x40] ss:$8 sps:$4 sm:$0xff]  }
 0x154   :  { %5931 = vmatprep.subr.bf16.mxu1 %v6414_v5 }
 0x156   :  { %5910 = vmatpush3.bf16.msra.mxu0 %v6415_v6 }
 0x157   :  { %5932 = vmatpush3.bf16.msra.mxu1 %v6416_v7  ;;  %5911 = vmatprep.subr.bf16.mxu0 %v6417_v8 }
 0x158   :  { %5933 = vmatprep.subr.bf16.mxu1 %v6418_v9 }
 0x15a   :  { %5912 = vmatpush3.bf16.msra.mxu0 %v6419_v10 }
 0x15b   :  { %5934 = vmatpush3.bf16.msra.mxu1 %v6420_v11  ;;  %5913 = vmatprep.subr.bf16.mxu0 %v6421_v12 }
 0x15c   :  { %5935 = vmatprep.subr.bf16.mxu1 %v6422_v13 }
 0x15e   :  { %5914 = vmatpush3.bf16.msra.mxu0 %v6423_v14 }
 0x15f   :  { %5936 = vmatpush3.bf16.msra.mxu1 %v6424_v15  ;;  %5915 = vmatprep.subr.bf16.mxu0 %v6425_v16  ;;  %v6460_v16 = vld [vmem:[#allocation5 + $0x54] ss:$8 sps:$4 sm:$0xff]  }
 0x160   :  { %5937 = vmatprep.subr.bf16.mxu1 %v6426_v17  ;;  %v6458_v17 = vld [vmem:[#allocation5 + $0x50] ss:$8 sps:$4 sm:$0xff]  }
 0x162   :  { %5916 = vmatpush3.bf16.msra.mxu0 %v6427_v18  ;;  %v6463_v18 = vld [vmem:[#allocation5 + $0x64] ss:$8 sps:$4 sm:$0xff]  }
 0x163   :  { %5938 = vmatpush3.bf16.msra.mxu1 %v6428_v19  ;;  %5917 = vmatprep.subr.bf16.mxu0 %v6429_v20  ;;  %v6461_v19 = vld [vmem:[#allocation5 + $0x60] ss:$8 sps:$4 sm:$0xff]   ;;  %v6466_v20 = vld [vmem:[#allocation5 + $0x74] ss:$8 sps:$4 sm:$0xff]  }
 0x164   :  { %5939 = vmatprep.subr.bf16.mxu1 %v6430_v21  ;;  %v6464_v21 = vld [vmem:[#allocation5 + $0x70] ss:$8 sps:$4 sm:$0xff]  }
 0x166   :  { %5918 = vmatpush3.bf16.msra.mxu0 %v6431_v22  ;;  %v7036_v22 = vmov 0  }
 0x167   :  { %5940 = vmatpush3.bf16.msra.mxu1 %v6432_v23  ;;  %5919 = vmatprep.subr.bf16.mxu0 %v6433_v24  ;;  %v6467_v23 = vld [vmem:[#allocation7] ss:$12 sps:$4 sm:$0xff]   ;;  %v6469_v24 = vld [vmem:[#allocation7 + $0x4] ss:$12 sps:$4 sm:$0xff]  }
 0x168   :  { %5941 = vmatprep.subr.bf16.mxu1 %v6434_v25  ;;  %v6472_v25 = vld [vmem:[#allocation7 + $0x1c] ss:$12 sps:$4 sm:$0xff]  }
 0x16a   :  { %5920 = vmatpush3.bf16.msra.mxu0 %v6435_v26  ;;  %v6470_v26 = vld [vmem:[#allocation7 + $0x18] ss:$12 sps:$4 sm:$0xff]  }
 0x16b   :  { %5942 = vmatpush3.bf16.msra.mxu1 %v6436_v27  ;;  %2624 = vmatprep.subr.bf16.mxu0 %v6445_v59  ;;  %v6475_v27 = vld [vmem:[#allocation7 + $0x34] ss:$12 sps:$4 sm:$0xff]   ;;  %v6508_v59 = vld [vmem:[#allocation7 + $0x10c] ss:$12 sps:$4 sm:$0xff]  }
 0x16c   :  { %3006 = vmatprep.subr.bf16.mxu1 %v6469_v24 }
 0x16d   :  { %2467 = vmatmul.mubr.bf16.vlgmr.msra.gmra.mrb[20].mxu0 %v487_v44  ;;  %v6484_v44 = vld [vmem:[#allocation7 + $0x7c] ss:$12 sps:$4 sm:$0xff]  }
 0x16e   :  { %2507 = vmatmul.mubr.bf16.vlgmr.msra.gmra.mrb[20].mxu1 %v489_v45  ;;  %2625 = vmatpush1.bf16.msra.mxu0 %v6443_v58  ;;  %v6501_v58 = vld [vmem:[#allocation7 + $0xf0] ss:$12 sps:$4 sm:$0xff]  }
 0x16f   :  { %2626 = vmatprep.subr.bf16.mxu0 %v6448_v60  ;;  %2656 = vmatprep.mubr.bf16.mxu0 %v7036_v22  ;;  %v6506_v60 = vld [vmem:[#allocation7 + $0x108] ss:$12 sps:$4 sm:$0xff]  }
 0x170   :  { %3007 = vmatpush1.bf16.msra.mxu1 %v6467_v23 }
 0x171   :  { %3008 = vmatprep.subr.bf16.mxu1 %v6472_v25 }
 0x172   :  { %2627 = vmatpush1.bf16.msra.mxu0 %v6446_v61  ;;  %v6513_v61 = vld [vmem:[#allocation7 + $0x124] ss:$12 sps:$4 sm:$0xff]  }
 0x173   :  { %2628 = vmatprep.subr.bf16.mxu0 %v6451_v62 }
 0x174   :  { %3009 = vmatpush1.bf16.msra.mxu1 %v6470_v26 }
 0x175   :  { %3010 = vmatprep.subr.bf16.mxu1 %v6475_v27 }
 0x176   :  { %2629 = vmatpush1.bf16.msra.mxu0 %v6449_v63 }
 0x177   :  { %2630 = vmatprep.subr.bf16.mxu0 %v6454_v0 }
 0x178   :  { %3011 = vmatpush1.bf16.msra.mxu1 %v6473_v29 }
 0x179   :  { %3012 = vmatprep.subr.bf16.mxu1 %v6478_v30 }
 0x17a   :  { %2631 = vmatpush1.bf16.msra.mxu0 %v6452_v1  ;;  %v6511_v1 = vld [vmem:[#allocation7 + $0x120] ss:$12 sps:$4 sm:$0xff]  }
 0x17b   :  { %2632 = vmatprep.subr.bf16.mxu0 %v6457_v2 }
 0x17c   :  { %3013 = vmatpush1.bf16.msra.mxu1 %v6476_v31 }
 0x17d   :  { %3014 = vmatprep.subr.bf16.mxu1 %v6481_v33 }
 0x17e   :  { %2633 = vmatpush1.bf16.msra.mxu0 %v6455_v3 }
 0x17f   :  { %2634 = vmatprep.subr.bf16.mxu0 %v6460_v16 }
 0x180   :  { %3015 = vmatpush1.bf16.msra.mxu1 %v6479_v43  ;;  %v6499_v43 = vld [vmem:[#allocation7 + $0xe0] ss:$12 sps:$4 sm:$0xff]  }
 0x181   :  { %3016 = vmatprep.subr.bf16.mxu1 %v6484_v44  ;;  %v6500_v44 = vld [vmem:[#allocation7 + $0x20] ss:$12 sps:$4 sm:$0xff]  }
 0x182   :  { %2635 = vmatpush1.bf16.msra.mxu0 %v6458_v17 }
 0x183   :  { %2636 = vmatprep.subr.bf16.mxu0 %v6463_v18 }
 0x186   :  { %2637 = vmatpush1.bf16.msra.mxu0 %v6461_v19 }
 0x187   :  { %2638 = vmatprep.subr.bf16.mxu0 %v6466_v20 }
 0x18a   :  { %2639 = vmatpush1.bf16.msra.mxu0 %v6464_v21 }
 0x18b   :  { %5949 = vmatprep.subr.bf16.mxu0 %v6494_v28 }
 0x1a0   :  { %v5701_v47 = vpop.f32.mrb[0].mxu0 }
 0x1a1   :  { %v5723_v37 = vpop.f32.mrb[0].mxu1  ;;  %v5702_v48 = vpop.f32.mrb[1].mxu0 }
 0x1a2   :  { %v5703_v49 = vadd.f32 %v5702_v48, %v5701_v47  ;;  %v5724_v50 = vpop.f32.mrb[1].mxu1  ;;  %v5704_v51 = vpop.f32.mrb[2].mxu0 }
 0x1a3   :  { %v5725_v52 = vadd.f32 %v5724_v50, %v5723_v37  ;;  %v5726_v53 = vpop.f32.mrb[2].mxu1  ;;  %v5705_v54 = vpop.f32.mrb[3].mxu0  ;;  %v6482_v37 = vld [vmem:[#allocation7 + $0x78] ss:$12 sps:$4 sm:$0xff]   ;;  %v6485_v50 = vld [vmem:[#allocation7 + $0x90] ss:$12 sps:$4 sm:$0xff]  }
 0x1a4   :  { %v2069_v55 = vadd.f32 %v5703_v49, %v5208_v46  ;;  %v5727_v56 = vpop.f32.mrb[3].mxu1  ;;  %v6487_v49 = vld [vmem:[#allocation7 + $0x94] ss:$12 sps:$4 sm:$0xff]   ;;  %v6490_v51 = vld [vmem:[#allocation7 + $0xac] ss:$12 sps:$4 sm:$0xff]   ;;  %3017 = vmatpush1.bf16.msra.mxu1 %v6482_v37 }
 0x1a5   :  { %3018 = vmatprep.subr.bf16.mxu1 %v6487_v49  ;;  %v6493_v53 = vld [vmem:[#allocation7 + $0xc4] ss:$12 sps:$4 sm:$0xff]   ;;  %v6491_v54 = vld [vmem:[#allocation7 + $0xc0] ss:$12 sps:$4 sm:$0xff]   ;;  %v6515_v49 = vld [vmem:[#allocation7 + $0x68] ss:$12 sps:$4 sm:$0xff]  }
 0x1a6   :  { %v2109_v57 = vadd.f32 %v5725_v52, %v2069_v55  ;;  %v6488_v52 = vld [vmem:[#allocation7 + $0xa8] ss:$12 sps:$4 sm:$0xff]   ;;  %v6496_v56 = vld [vmem:[#allocation7 + $0xd8] ss:$12 sps:$4 sm:$0xff]   ;;  %v6510_v37 = vld [vmem:[#allocation7 + $0x50] ss:$12 sps:$4 sm:$0xff]  }
 0x1a7   :  { %v6498_v55 = vld [vmem:[#allocation7 + $0xdc] ss:$12 sps:$4 sm:$0xff]  }
 0x1a8   :  { %3019 = vmatpush1.bf16.msra.mxu1 %v6485_v50  ;;  %v6519_v50 = vld [vmem:[#allocation7 + $0x140] ss:$12 sps:$4 sm:$0xff]  }
 0x1a9   :  { %3020 = vmatprep.subr.bf16.mxu1 %v6490_v51  ;;  %v6520_v51 = vld [vmem:[#allocation7 + $0x80] ss:$12 sps:$4 sm:$0xff]  }
 0x1ac   :  { %3021 = vmatpush1.bf16.msra.mxu1 %v6488_v52  ;;  %v6523_v52 = vld [vmem:[#allocation7 + $0x154] ss:$12 sps:$4 sm:$0xff]  }
 0x1ad   :  { %3022 = vmatprep.subr.bf16.mxu1 %v6493_v53  ;;  %v6524_v53 = vld [vmem:[#allocation7 + $0x158] ss:$12 sps:$4 sm:$0xff]  }
 0x1b0   :  { %3023 = vmatpush1.bf16.msra.mxu1 %v6491_v54  ;;  %v6521_v54 = vld [vmem:[#allocation7 + $0x150] ss:$12 sps:$4 sm:$0xff]  }
 0x1b1   :  { %3024 = vmatprep.subr.bf16.mxu1 %v6498_v55  ;;  %v6525_v55 = vld [vmem:[#allocation7 + $0x98] ss:$12 sps:$4 sm:$0xff]  }
 0x1b4   :  { %3025 = vmatpush1.bf16.msra.mxu1 %v6496_v56  ;;  %v6528_v56 = vld [vmem:[#allocation7 + $0x16c] ss:$12 sps:$4 sm:$0xff]  }
 0x1c0   :  { %v5745_v4 = vpop.f32.mrb[4].mxu0 }
 0x1c1   :  { %v5767_v5 = vpop.f32.mrb[4].mxu1  ;;  %v5746_v6 = vpop.f32.mrb[5].mxu0 }
 0x1c2   :  { %v5747_v7 = vadd.f32 %v5746_v6, %v5745_v4  ;;  %v5768_v8 = vpop.f32.mrb[5].mxu1  ;;  %v5748_v9 = vpop.f32.mrb[6].mxu0 }
 0x1c3   :  { %v5769_v10 = vadd.f32 %v5768_v8, %v5767_v5  ;;  %v5770_v11 = vpop.f32.mrb[6].mxu1  ;;  %v5749_v12 = vpop.f32.mrb[7].mxu0  ;;  %v6518_v5 = vld [vmem:[#allocation7 + $0x13c] ss:$12 sps:$4 sm:$0xff]  }
 0x1c4   :  { %v2149_v13 = vadd.f32 %v5747_v7, %v2109_v57  ;;  %v5771_v14 = vpop.f32.mrb[7].mxu1  ;;  %v6503_v57 = vld [vmem:[#allocation7 + $0xf4] ss:$12 sps:$4 sm:$0xff]   ;;  %v6516_v11 = vld [vmem:[#allocation7 + $0x138] ss:$12 sps:$4 sm:$0xff]  }
 0x1c5   :  { %3026 = vmatprep.subr.bf16.mxu1 %v6503_v57  ;;  %v6529_v57 = vld [vmem:[#allocation7 + $0x170] ss:$12 sps:$4 sm:$0xff]  }
 0x1c6   :  { %v2189_v15 = vadd.f32 %v5769_v10, %v2149_v13  ;;  %3027 = vmatpush1.bf16.msra.mxu1 %v6501_v58  ;;  %v6526_v58 = vld [vmem:[#allocation7 + $0x168] ss:$12 sps:$4 sm:$0xff]  }
 0x1c7   :  { %3028 = vmatprep.subr.bf16.mxu1 %v6508_v59  ;;  %v6530_v59 = vld [vmem:[#allocation7 + $0xb0] ss:$12 sps:$4 sm:$0xff]  }
 0x1ca   :  { %3029 = vmatpush1.bf16.msra.mxu1 %v6506_v60  ;;  %v6533_v60 = vld [vmem:[#allocation8 + $0x4] ss:$12 sps:$4 sm:$0xff]  }
 0x1cb   :  { %3030 = vmatprep.subr.bf16.mxu1 %v6513_v61  ;;  %v6558_v61 = vld [vmem:[#allocation8 + $0xc8] ss:$12 sps:$4 sm:$0xff]  }
 0x1ce   :  { %3031 = vmatpush1.bf16.msra.mxu1 %v6511_v1 }
 0x1cf   :  { %3032 = vmatprep.subr.bf16.mxu1 %v6518_v5 }
 0x1d2   :  { %3033 = vmatpush1.bf16.msra.mxu1 %v6516_v11 }
 0x1d3   :  { %3034 = vmatprep.subr.bf16.mxu1 %v6523_v52  ;;  %v6580_v52 = vld [vmem:[#allocation8 + $0x138] ss:$12 sps:$4 sm:$0xff]  }
 0x1d6   :  { %3035 = vmatpush1.bf16.msra.mxu1 %v6521_v54  ;;  %v6588_v54 = vld [vmem:[#allocation8 + $0x158] ss:$12 sps:$4 sm:$0xff]  }
 0x1d7   :  { %3036 = vmatprep.subr.bf16.mxu1 %v6528_v56  ;;  %v6589_v56 = vld [vmem:[#allocation8 + $0x98] ss:$12 sps:$4 sm:$0xff]  }
 0x1da   :  { %3037 = vmatpush1.bf16.msra.mxu1 %v6526_v58  ;;  %v6593_v58 = vld [vmem:[#allocation8 + $0x170] ss:$12 sps:$4 sm:$0xff]  }
 0x1db   :  { %5971 = vmatprep.subr.bf16.mxu1 %v6558_v61  ;;  %v6597_v61 = vld [vmem:[#allocation8 + $0x184] ss:$12 sps:$4 sm:$0xff]  }
 0x1e0   :  { %v5789_v34 = vpop.f32.mrb[8].mxu0 }
 0x1e1   :  { %v5811_v35 = vpop.f32.mrb[8].mxu1  ;;  %v5790_v36 = vpop.f32.mrb[9].mxu0 }
 0x1e2   :  { %v5812_v38 = vpop.f32.mrb[9].mxu1  ;;  %v5791_v39 = vadd.f32 %v5790_v36, %v5789_v34  ;;  %v5792_v41 = vpop.f32.mrb[10].mxu0 }
 0x1e3   :  { %v5813_v40 = vadd.f32 %v5812_v38, %v5811_v35  ;;  %v5814_v42 = vpop.f32.mrb[10].mxu1  ;;  %v5793_v45 = vpop.f32.mrb[11].mxu0  ;;  %v6495_v41 = vld [vmem:[#allocation7 + $0x8] ss:$12 sps:$4 sm:$0xff]  }
 0x1e4   :  { %v5815_v46 = vpop.f32.mrb[11].mxu1  ;;  %v2229_v47 = vadd.f32 %v5791_v39, %v2189_v15  ;;  %v6504_v45 = vld [vmem:[#allocation7 + $0xf8] ss:$12 sps:$4 sm:$0xff]  }
 0x1e5   :  { %v6505_v46 = vld [vmem:[#allocation7 + $0x38] ss:$12 sps:$4 sm:$0xff]  }
 0x1e6   :  { %v2269_v48 = vadd.f32 %v5813_v40, %v2229_v47  ;;  %v6509_v47 = vld [vmem:[#allocation7 + $0x110] ss:$12 sps:$4 sm:$0xff]  }
 0x200   :  { %v5833_v62 = vpop.f32.mrb[12].mxu0 }
 0x201   :  { %v5855_v63 = vpop.f32.mrb[12].mxu1  ;;  %v5834_v0 = vpop.f32.mrb[13].mxu0 }
 0x202   :  { %v5835_v2 = vadd.f32 %v5834_v0, %v5833_v62  ;;  %v5856_v3 = vpop.f32.mrb[13].mxu1  ;;  %v5836_v4 = vpop.f32.mrb[14].mxu0  ;;  %v7392_v62 = vsub.s32 0, %v7286_v32  ;;  %v7398_v0 = vsub.s32 1, %v7286_v32 }
 0x203   :  { %v5857_v6 = vadd.f32 %v5856_v3, %v5855_v63  ;;  %v5858_v7 = vpop.f32.mrb[14].mxu1  ;;  %v5837_v8 = vpop.f32.mrb[15].mxu0  ;;  %v2532_v63 = vld [vmem:[%s7651_s30] sm:$0x3] }
 0x204   :  { %v2309_v9 = vadd.f32 %v5835_v2, %v2269_v48  ;;  %v5859_v10 = vpop.f32.mrb[15].mxu1  ;;  %v6514_v48 = vld [vmem:[#allocation7 + $0x128] ss:$12 sps:$4 sm:$0xff]   ;;  %v2537_v1 = vrot.slane %v2532_v63, %v7392_v62  ;;  %v2541_v2 = vrot.slane %v2532_v63, %v7398_v0  ;;  %v7037_v63 = vmov 0.0  }
 0x206   :  { %v2349_v12 = vadd.f32 %v5857_v6, %v2309_v9 }
 0x220   :  { %v5877_v13 = vpop.f32.mrb[16].mxu0 }
 0x221   :  { %v5899_v14 = vpop.f32.mrb[16].mxu1  ;;  %v5878_v15 = vpop.f32.mrb[17].mxu0 }
 0x222   :  { %v5879_v16 = vadd.f32 %v5878_v15, %v5877_v13  ;;  %v5900_v17 = vpop.f32.mrb[17].mxu1  ;;  %v5880_v18 = vpop.f32.mrb[18].mxu0  ;;  %v6559_v13 = vld [vmem:[#allocation8 + $0x8] ss:$12 sps:$4 sm:$0xff]  }
 0x223   :  { %v5901_v19 = vadd.f32 %v5900_v17, %v5899_v14  ;;  %v5902_v20 = vpop.f32.mrb[18].mxu1  ;;  %v5881_v21 = vpop.f32.mrb[19].mxu0  ;;  %v6536_v15 = vld [vmem:[#allocation8 + $0x1c] ss:$12 sps:$4 sm:$0xff]   ;;  %v6534_v17 = vld [vmem:[#allocation8 + $0x18] ss:$12 sps:$4 sm:$0xff]  }
 0x224   :  { %v2389_v23 = vadd.f32 %v5879_v16, %v2349_v12  ;;  %v5903_v24 = vpop.f32.mrb[19].mxu1  ;;  %v6531_v12 = vld [vmem:[#allocation8] ss:$12 sps:$4 sm:$0xff]   ;;  %v6568_v20 = vld [vmem:[#allocation8 + $0xf8] ss:$12 sps:$4 sm:$0xff]  }
 0x225   :  { %v6563_v16 = vld [vmem:[#allocation8 + $0xe0] ss:$12 sps:$4 sm:$0xff]   ;;  %v6537_v21 = vld [vmem:[#allocation8 + $0x30] ss:$12 sps:$4 sm:$0xff]  }
 0x226   :  { %v2429_v25 = vadd.f32 %v5901_v19, %v2389_v23  ;;  %v6564_v18 = vld [vmem:[#allocation8 + $0x20] ss:$12 sps:$4 sm:$0xff]   ;;  %v6569_v23 = vld [vmem:[#allocation8 + $0x38] ss:$12 sps:$4 sm:$0xff]  }
 0x227   :  { %v6539_v19 = vld [vmem:[#allocation8 + $0x34] ss:$12 sps:$4 sm:$0xff]   ;;  %v6542_v24 = vld [vmem:[#allocation8 + $0x4c] ss:$12 sps:$4 sm:$0xff]  }
 0x240   :  { %v5921_v26 = vpop.f32.mrb[20].mxu0 }
 0x241   :  { %v5943_v27 = vpop.f32.mrb[20].mxu1  ;;  %v5922_v28 = vpop.f32.mrb[21].mxu0 }
 0x242   :  { %v5944_v29 = vpop.f32.mrb[21].mxu1  ;;  %v5923_v30 = vadd.f32 %v5922_v28, %v5921_v26  ;;  %v5924_v33 = vpop.f32.mrb[22].mxu0  ;;  %v6540_v26 = vld [vmem:[#allocation8 + $0x48] ss:$12 sps:$4 sm:$0xff]   ;;  %v6545_v28 = vld [vmem:[#allocation8 + $0x64] ss:$12 sps:$4 sm:$0xff]  }
 0x243   :  { %v5945_v31 = vadd.f32 %v5944_v29, %v5943_v27  ;;  %v5946_v34 = vpop.f32.mrb[22].mxu1  ;;  %v5925_v35 = vpop.f32.mrb[23].mxu0  ;;  %v6574_v27 = vld [vmem:[#allocation8 + $0x50] ss:$12 sps:$4 sm:$0xff]   ;;  %v6578_v29 = vld [vmem:[#allocation8 + $0x128] ss:$12 sps:$4 sm:$0xff]  }
 0x244   :  { %v5947_v36 = vpop.f32.mrb[23].mxu1  ;;  %v2469_v38 = vadd.f32 %v5923_v30, %v2429_v25  ;;  %v6573_v25 = vld [vmem:[#allocation8 + $0x110] ss:$12 sps:$4 sm:$0xff]   ;;  %v6543_v30 = vld [vmem:[#allocation8 + $0x60] ss:$12 sps:$4 sm:$0xff]  }
 0x245   :  { %v6548_v33 = vld [vmem:[#allocation8 + $0x7c] ss:$12 sps:$4 sm:$0xff]   ;;  %v6583_v34 = vld [vmem:[#allocation8 + $0x140] ss:$12 sps:$4 sm:$0xff]   ;;  %v6546_v35 = vld [vmem:[#allocation8 + $0x78] ss:$12 sps:$4 sm:$0xff]  }
 0x246   :  { %v2509_v39 = vadd.f32 %v5945_v31, %v2469_v38  ;;  %v6579_v31 = vld [vmem:[#allocation8 + $0x68] ss:$12 sps:$4 sm:$0xff]   ;;  %v6584_v36 = vld [vmem:[#allocation8 + $0x80] ss:$12 sps:$4 sm:$0xff]  }
 0x247   :  { %v6551_v38 = vld [vmem:[#allocation8 + $0x94] ss:$12 sps:$4 sm:$0xff]  }
 0x248   :  { %v2514_v40 = vmax.f32 %v2509_v39, 0.0  ;;  %v6549_v39 = vld [vmem:[#allocation8 + $0x90] ss:$12 sps:$4 sm:$0xff]  }
 0x24a   :  { %v2515_v42 = vpack.c.bf16 %v2514_v40, %v2514_v40  ;;  %v6554_v40 = vld [vmem:[#allocation8 + $0xac] ss:$12 sps:$4 sm:$0xff]  }
 0x24c   :  { %2657 = vmatmul.mubr.bf16.vlgmr.msra.gmra.mrb[24].mxu0 %v2515_v42  ;;  %v6557_v42 = vld [vmem:[#allocation8 + $0xc4] ss:$12 sps:$4 sm:$0xff]  }
 0x24d   :  { %5950 = vmatpush3.bf16.msra.mxu0 %v6495_v41  ;;  %v6552_v41 = vld [vmem:[#allocation8 + $0xa8] ss:$12 sps:$4 sm:$0xff]  }
 0x24e   :  { %5951 = vmatprep.subr.bf16.mxu0 %v6499_v43  ;;  %v6555_v43 = vld [vmem:[#allocation8 + $0xc0] ss:$12 sps:$4 sm:$0xff]  }
 0x251   :  { %5952 = vmatpush3.bf16.msra.mxu0 %v6500_v44  ;;  %v6562_v44 = vld [vmem:[#allocation8 + $0xdc] ss:$12 sps:$4 sm:$0xff]  }
 0x252   :  { %5953 = vmatprep.subr.bf16.mxu0 %v6504_v45  ;;  %v6560_v45 = vld [vmem:[#allocation8 + $0xd8] ss:$12 sps:$4 sm:$0xff]  }
 0x255   :  { %5954 = vmatpush3.bf16.msra.mxu0 %v6505_v46  ;;  %v6567_v46 = vld [vmem:[#allocation8 + $0xf4] ss:$12 sps:$4 sm:$0xff]  }
 0x256   :  { %5955 = vmatprep.subr.bf16.mxu0 %v6509_v47  ;;  %v6565_v47 = vld [vmem:[#allocation8 + $0xf0] ss:$12 sps:$4 sm:$0xff]  }
 0x259   :  { %5956 = vmatpush3.bf16.msra.mxu0 %v6510_v37  ;;  %v6572_v37 = vld [vmem:[#allocation8 + $0x10c] ss:$12 sps:$4 sm:$0xff]  }
 0x25a   :  { %5957 = vmatprep.subr.bf16.mxu0 %v6514_v48  ;;  %v6570_v48 = vld [vmem:[#allocation8 + $0x108] ss:$12 sps:$4 sm:$0xff]  }
 0x25d   :  { %5958 = vmatpush3.bf16.msra.mxu0 %v6515_v49  ;;  %v6577_v49 = vld [vmem:[#allocation8 + $0x124] ss:$12 sps:$4 sm:$0xff]  }
 0x25e   :  { %5959 = vmatprep.subr.bf16.mxu0 %v6519_v50  ;;  %v6575_v50 = vld [vmem:[#allocation8 + $0x120] ss:$12 sps:$4 sm:$0xff]  }
 0x261   :  { %5960 = vmatpush3.bf16.msra.mxu0 %v6520_v51  ;;  %v6582_v51 = vld [vmem:[#allocation8 + $0x13c] ss:$12 sps:$4 sm:$0xff]  }
 0x262   :  { %5961 = vmatprep.subr.bf16.mxu0 %v6524_v53  ;;  %v6587_v53 = vld [vmem:[#allocation8 + $0x154] ss:$12 sps:$4 sm:$0xff]  }
 0x265   :  { %5962 = vmatpush3.bf16.msra.mxu0 %v6525_v55  ;;  %v6585_v55 = vld [vmem:[#allocation8 + $0x150] ss:$12 sps:$4 sm:$0xff]  }
 0x266   :  { %5963 = vmatprep.subr.bf16.mxu0 %v6529_v57  ;;  %v6592_v57 = vld [vmem:[#allocation8 + $0x16c] ss:$12 sps:$4 sm:$0xff]  }
 0x269   :  { %5964 = vmatpush3.bf16.msra.mxu0 %v6530_v59  ;;  %v6590_v59 = vld [vmem:[#allocation8 + $0x168] ss:$12 sps:$4 sm:$0xff]  }
 0x26a   :  { %3590 = vmatprep.subr.bf16.mxu0 %v6533_v60  ;;  %v6594_v60 = vld [vmem:[#allocation8 + $0xb0] ss:$12 sps:$4 sm:$0xff]  }
 0x31f   :  { %v2658_v3 = vpop.f32.mrb[24].mxu0 }
 0x320   :  { %v2659_v4 = vadd.f32 %v2658_v3, %v2537_v1  ;;  %v2660_v5 = vpop.f32.mrb[25].mxu0  ;;  %v7406_v1 = vld [vmem:[%s7611_s6] sm:$0x7] }
 0x321   :  { %v2661_v6 = vadd.f32 %v2660_v5, %v2541_v2  ;;  %v2662_v7 = vpop.f32.mrb[26].mxu0  ;;  %v2738_v2 = vrot.slane %v7406_v1, %v7392_v62  ;;  %v2742_v3 = vrot.slane %v7406_v1, %v7398_v0 }
 0x322   :  { %v2665_v8 = vmax.f32 %v2659_v4, 0.0  ;;  %v2663_v9 = vpop.f32.mrb[27].mxu0 }
 0x323   :  { %v2666_v10 = vmax.f32 %v2661_v6, 0.0 }
 0x324   :  { %v2667_v14 = vpack.c.bf16 %v2665_v8, %v2665_v8 }
 0x325   :  { %v2668_v11 = vpack.c.bf16 %v2666_v10, %v2666_v10 }
 0x327   :  { %3038 = vmatprep.mubr.bf16.mxu1 %v2668_v11  ;;  %3079 = vmatprep.mubr.bf16.mxu0 %v2668_v11 }
 0x328   :  { %3039 = vmatmul.mubr.bf16.vlgmr.msra.gmra.mrb[24].mxu1 %v2667_v14  ;;  %3080 = vmatmul.mubr.bf16.vlgmr.msra.gmra.mrb[28].mxu0 %v2667_v14 }
 0x329   :  { %3591 = vmatpush1.bf16.msra.mxu0 %v6531_v12  ;;  %5972 = vmatpush3.bf16.msra.mxu1 %v6559_v13 }
 0x32a   :  { %3592 = vmatprep.subr.bf16.mxu0 %v6536_v15  ;;  %5973 = vmatprep.subr.bf16.mxu1 %v6563_v16 }
 0x32d   :  { %3593 = vmatpush1.bf16.msra.mxu0 %v6534_v17  ;;  %5974 = vmatpush3.bf16.msra.mxu1 %v6564_v18  ;;  %v6595_v18 = vld [vmem:[#allocation8 + $0x180] ss:$12 sps:$4 sm:$0xff]  }
 0x32e   :  { %3594 = vmatprep.subr.bf16.mxu0 %v6539_v19  ;;  %5975 = vmatprep.subr.bf16.mxu1 %v6568_v20  ;;  %v6598_v19 = vld [vmem:[#allocation8 + $0x188] ss:$12 sps:$4 sm:$0xff]  }
 0x331   :  { %3595 = vmatpush1.bf16.msra.mxu0 %v6537_v21  ;;  %5976 = vmatpush3.bf16.msra.mxu1 %v6569_v23  ;;  %v6601_v21 = vld [vmem:[#allocation8 + $0x19c] ss:$12 sps:$4 sm:$0xff]   ;;  %v6599_v23 = vld [vmem:[#allocation8 + $0x198] ss:$12 sps:$4 sm:$0xff]  }
 0x332   :  { %3596 = vmatprep.subr.bf16.mxu0 %v6542_v24  ;;  %5977 = vmatprep.subr.bf16.mxu1 %v6573_v25  ;;  %v6602_v24 = vld [vmem:[#allocation8 + $0x1a0] ss:$12 sps:$4 sm:$0xff]  }
 0x333   :  { %v6605_v25 = vld [vmem:[#allocation8 + $0x1b4] ss:$12 sps:$4 sm:$0xff]  }
 0x335   :  { %3597 = vmatpush1.bf16.msra.mxu0 %v6540_v26  ;;  %5978 = vmatpush3.bf16.msra.mxu1 %v6574_v27  ;;  %v6603_v26 = vld [vmem:[#allocation8 + $0x1b0] ss:$12 sps:$4 sm:$0xff]   ;;  %v6606_v27 = vld [vmem:[#allocation8 + $0x1b8] ss:$12 sps:$4 sm:$0xff]  }
 0x336   :  { %3598 = vmatprep.subr.bf16.mxu0 %v6545_v28  ;;  %5979 = vmatprep.subr.bf16.mxu1 %v6578_v29  ;;  %v6609_v28 = vld [vmem:[#allocation8 + $0x1cc] ss:$12 sps:$4 sm:$0xff]   ;;  %v6607_v29 = vld [vmem:[#allocation8 + $0x1c8] ss:$12 sps:$4 sm:$0xff]  }
 0x339   :  { %3599 = vmatpush1.bf16.msra.mxu0 %v6543_v30  ;;  %5980 = vmatpush3.bf16.msra.mxu1 %v6579_v31  ;;  %v6610_v30 = vld [vmem:[#allocation8 + $0x1d0] ss:$12 sps:$4 sm:$0xff]  }
 0x33a   :  { %3600 = vmatprep.subr.bf16.mxu0 %v6548_v33  ;;  %5981 = vmatprep.subr.bf16.mxu1 %v6583_v34  ;;  %v6613_v31 = vld [vmem:[#allocation8 + $0x1e4] ss:$12 sps:$4 sm:$0xff]   ;;  %v6611_v33 = vld [vmem:[#allocation8 + $0x1e0] ss:$12 sps:$4 sm:$0xff]   ;;  %v6614_v34 = vld [vmem:[#allocation8 + $0x1e8] ss:$12 sps:$4 sm:$0xff]  }
 0x33d   :  { %3601 = vmatpush1.bf16.msra.mxu0 %v6546_v35  ;;  %5982 = vmatpush3.bf16.msra.mxu1 %v6584_v36  ;;  %v7419_v35 = vsub.s32 2, %v7286_v32  ;;  %v6617_v36 = vld [vmem:[#allocation8 + $0x1fc] ss:$12 sps:$4 sm:$0xff]   ;;  %v6622_v32 = vld [vmem:[#allocation8 + $0x218] ss:$12 sps:$4 sm:$0xff]  }
 0x33e   :  { %3602 = vmatprep.subr.bf16.mxu0 %v6551_v38  ;;  %5983 = vmatprep.subr.bf16.mxu1 %v6588_v54  ;;  %v6615_v38 = vld [vmem:[#allocation8 + $0x1f8] ss:$12 sps:$4 sm:$0xff]   ;;  %v6638_v54 = vld [vmem:[#allocation10 + $0x34] ss:$8 sps:$4 sm:$0xff]  }
 0x341   :  { %3603 = vmatpush1.bf16.msra.mxu0 %v6549_v39  ;;  %5984 = vmatpush3.bf16.msra.mxu1 %v6589_v56  ;;  %v6618_v39 = vld [vmem:[#allocation8 + $0x200] ss:$12 sps:$4 sm:$0xff]  }
 0x342   :  { %3604 = vmatprep.subr.bf16.mxu0 %v6554_v40  ;;  %5985 = vmatprep.subr.bf16.mxu1 %v6593_v58  ;;  %v2746_v40 = vrot.slane %v7406_v1, %v7419_v35  ;;  %v6641_v56 = vld [vmem:[#allocation10 + $0x44] ss:$8 sps:$4 sm:$0xff]   ;;  %v6644_v58 = vld [vmem:[#allocation10 + $0x54] ss:$8 sps:$4 sm:$0xff]  }
 0x343   :  { %v6650_v1 = vld [vmem:[#allocation10 + $0x74] ss:$8 sps:$4 sm:$0xff]  }
 0x345   :  { %3605 = vmatpush1.bf16.msra.mxu0 %v6552_v41  ;;  %5986 = vmatpush3.bf16.msra.mxu1 %v6594_v60  ;;  %v6621_v41 = vld [vmem:[#allocation8 + $0x214] ss:$12 sps:$4 sm:$0xff]   ;;  %v6647_v60 = vld [vmem:[#allocation10 + $0x64] ss:$8 sps:$4 sm:$0xff]  }
 0x346   :  { %3606 = vmatprep.subr.bf16.mxu0 %v6557_v42  ;;  %6082 = vmatprep.subr.bf16.mxu1 %v7037_v63  ;;  %v6619_v42 = vld [vmem:[#allocation8 + $0x210] ss:$12 sps:$4 sm:$0xff]  }
 0x349   :  { %3607 = vmatpush1.bf16.msra.mxu0 %v6555_v43 }
 0x34a   :  { %3608 = vmatprep.subr.bf16.mxu0 %v6562_v44  ;;  %v6625_v44 = vld [vmem:[#allocation8 + $0x22c] ss:$12 sps:$4 sm:$0xff]  }
 0x34d   :  { %3609 = vmatpush1.bf16.msra.mxu0 %v6560_v45  ;;  %v6623_v45 = vld [vmem:[#allocation8 + $0x228] ss:$12 sps:$4 sm:$0xff]  }
 0x34e   :  { %3610 = vmatprep.subr.bf16.mxu0 %v6567_v46  ;;  %v6626_v46 = vld [vmem:[#allocation8 + $0x230] ss:$12 sps:$4 sm:$0xff]  }
 0x351   :  { %3611 = vmatpush1.bf16.msra.mxu0 %v6565_v47 }
 0x352   :  { %3612 = vmatprep.subr.bf16.mxu0 %v6572_v37  ;;  %v6629_v37 = vld [vmem:[#allocation10 + $0x4] ss:$8 sps:$4 sm:$0xff]  }
 0x355   :  { %3613 = vmatpush1.bf16.msra.mxu0 %v6570_v48  ;;  %v6627_v48 = vld [vmem:[#allocation10] ss:$8 sps:$4 sm:$0xff]  }
 0x356   :  { %3614 = vmatprep.subr.bf16.mxu0 %v6577_v49 }
 0x359   :  { %3615 = vmatpush1.bf16.msra.mxu0 %v6575_v50  ;;  %v6632_v50 = vld [vmem:[#allocation10 + $0x14] ss:$8 sps:$4 sm:$0xff]  }
 0x35a   :  { %3616 = vmatprep.subr.bf16.mxu0 %v6582_v51  ;;  %v6630_v51 = vld [vmem:[#allocation10 + $0x10] ss:$8 sps:$4 sm:$0xff]  }
 0x35d   :  { %3617 = vmatpush1.bf16.msra.mxu0 %v6580_v52  ;;  %v6635_v52 = vld [vmem:[#allocation10 + $0x24] ss:$8 sps:$4 sm:$0xff]  }
 0x35e   :  { %3618 = vmatprep.subr.bf16.mxu0 %v6587_v53  ;;  %v6633_v53 = vld [vmem:[#allocation10 + $0x20] ss:$8 sps:$4 sm:$0xff]  }
 0x361   :  { %3619 = vmatpush1.bf16.msra.mxu0 %v6585_v55  ;;  %v6636_v55 = vld [vmem:[#allocation10 + $0x30] ss:$8 sps:$4 sm:$0xff]  }
 0x362   :  { %3620 = vmatprep.subr.bf16.mxu0 %v6592_v57  ;;  %v6639_v57 = vld [vmem:[#allocation10 + $0x40] ss:$8 sps:$4 sm:$0xff]  }
 0x365   :  { %3621 = vmatpush1.bf16.msra.mxu0 %v6590_v59  ;;  %v6642_v59 = vld [vmem:[#allocation10 + $0x50] ss:$8 sps:$4 sm:$0xff]  }
 0x366   :  { %3631 = vmatprep.subr.bf16.mxu0 %v6597_v61  ;;  %v6645_v61 = vld [vmem:[#allocation10 + $0x60] ss:$8 sps:$4 sm:$0xff]  }
 0x3fb   :  { %v3040_v4 = vpop.f32.mrb[24].mxu1  ;;  %v5965_v5 = vpop.f32.mrb[28].mxu0 }
 0x3fc   :  { %v3041_v6 = vadd.f32 %v3040_v4, %v2738_v2  ;;  %v3042_v7 = vpop.f32.mrb[25].mxu1  ;;  %v5966_v8 = vpop.f32.mrb[29].mxu0  ;;  %v6648_v2 = vld [vmem:[#allocation10 + $0x70] ss:$8 sps:$4 sm:$0xff]   ;;  %v6651_v4 = vld [vmem:[#allocation10 + $0x80] ss:$8 sps:$4 sm:$0xff]  }
 0x3fd   :  { %v3043_v9 = vadd.f32 %v3042_v7, %v2742_v3  ;;  %v5967_v10 = vadd.f32 %v5966_v8, %v5965_v5  ;;  %v3044_v11 = vpop.f32.mrb[26].mxu1  ;;  %v5968_v12 = vpop.f32.mrb[30].mxu0  ;;  %v6653_v3 = vld [vmem:[#allocation10 + $0x84] ss:$8 sps:$4 sm:$0xff]   ;;  %v6656_v5 = vld [vmem:[#allocation10 + $0x94] ss:$8 sps:$4 sm:$0xff]  }
 0x3fe   :  { %v3087_v13 = vmax.f32 %v3041_v6, 0.0  ;;  %v3045_v14 = vpop.f32.mrb[27].mxu1  ;;  %v5969_v15 = vpop.f32.mrb[31].mxu0  ;;  %v6654_v6 = vld [vmem:[#allocation10 + $0x90] ss:$8 sps:$4 sm:$0xff]  }
 0x3ff   :  { %v3088_v16 = vmax.f32 %v3043_v9, 0.0  ;;  %v3082_v43 = vadd.f32 %v5967_v10, %v2746_v40  ;;  %v6659_v7 = vld [vmem:[#allocation10 + $0xa4] ss:$8 sps:$4 sm:$0xff]   ;;  %v6657_v8 = vld [vmem:[#allocation10 + $0xa0] ss:$8 sps:$4 sm:$0xff]  }
 0x400   :  { %v3090_v20 = vpack.c.bf16 %v3087_v13, %v3087_v13  ;;  %v6662_v9 = vld [vmem:[#allocation10 + $0xb4] ss:$8 sps:$4 sm:$0xff]   ;;  %v6660_v10 = vld [vmem:[#allocation10 + $0xb0] ss:$8 sps:$4 sm:$0xff]   ;;  %v6665_v11 = vld [vmem:[#allocation10 + $0xc4] ss:$8 sps:$4 sm:$0xff]  }
 0x401   :  { %v3091_v17 = vpack.c.bf16 %v3088_v16, %v3088_v16  ;;  %v3089_v47 = vmax.f32 %v3082_v43, 0.0  ;;  %v6663_v12 = vld [vmem:[#allocation10 + $0xc0] ss:$8 sps:$4 sm:$0xff]   ;;  %v6668_v13 = vld [vmem:[#allocation10 + $0xd4] ss:$8 sps:$4 sm:$0xff]  }
 0x402   :  { %v6666_v14 = vld [vmem:[#allocation10 + $0xd0] ss:$8 sps:$4 sm:$0xff]   ;;  %v6671_v15 = vld [vmem:[#allocation10 + $0xe4] ss:$8 sps:$4 sm:$0xff]   ;;  %v6669_v16 = vld [vmem:[#allocation10 + $0xe0] ss:$8 sps:$4 sm:$0xff]  }
 0x403   :  { %3622 = vmatprep.mubr.bf16.mxu0 %v3091_v17  ;;  %3704 = vmatprep.mubr.bf16.mxu1 %v3091_v17  ;;  %v3092_v49 = vpack.c.bf16 %v3089_v47, %v3089_v47  ;;  %v6674_v17 = vld [vmem:[#allocation10 + $0xf4] ss:$8 sps:$4 sm:$0xff]   ;;  %v6725_v40 = vld [vmem:[#allocation11 + $0xc4] ss:$12 sps:$4 sm:$0xff]  }
 0x404   :  { %3623 = vmatmul.mubr.bf16.vlgmr.msra.gmra.mrb[32].mxu0 %v3090_v20  ;;  %3705 = vmatmul.mubr.bf16.vlgmr.msra.gmra.mrb[28].mxu1 %v3090_v20  ;;  %v6699_v20 = vld [vmem:[#allocation11] ss:$12 sps:$4 sm:$0xff]   ;;  %v6737_v47 = vld [vmem:[#allocation11 + $0x124] ss:$12 sps:$4 sm:$0xff]  }
 0x405   :  { %3632 = vmatpush1.bf16.msra.mxu0 %v6595_v18  ;;  %6083 = vmatpush3.bf16.msra.mxu1 %v6598_v19  ;;  %v6672_v18 = vld [vmem:[#allocation10 + $0xf0] ss:$8 sps:$4 sm:$0xff]   ;;  %v6677_v19 = vld [vmem:[#allocation10 + $0x104] ss:$8 sps:$4 sm:$0xff]   ;;  %v6731_v43 = vld [vmem:[#allocation11 + $0xf4] ss:$12 sps:$4 sm:$0xff]  }
 0x406   :  { %3633 = vmatprep.subr.bf16.mxu0 %v6601_v21  ;;  %6084 = vmatprep.subr.bf16.mxu1 %v7037_v63  ;;  %v6701_v21 = vld [vmem:[#allocation11 + $0x4] ss:$12 sps:$4 sm:$0xff]  }
 0x407   :  { %3663 = vmatprep.mubr.bf16.mxu0 %v7036_v22  ;;  %6098 = vmatprep.mubr.msk.bf16.mxu1 %vm7038_vm0, %v7037_v63 }
 0x409   :  { %3634 = vmatpush1.bf16.msra.mxu0 %v6599_v23  ;;  %6085 = vmatpush3.bf16.msra.mxu1 %v6602_v24  ;;  %v6704_v23 = vld [vmem:[#allocation11 + $0x1c] ss:$12 sps:$4 sm:$0xff]   ;;  %v6702_v24 = vld [vmem:[#allocation11 + $0x18] ss:$12 sps:$4 sm:$0xff]  }
 0x40a   :  { %3635 = vmatprep.subr.bf16.mxu0 %v6605_v25  ;;  %6086 = vmatprep.subr.bf16.mxu1 %v7037_v63  ;;  %v6707_v25 = vld [vmem:[#allocation11 + $0x34] ss:$12 sps:$4 sm:$0xff]  }
 0x40d   :  { %3636 = vmatpush1.bf16.msra.mxu0 %v6603_v26  ;;  %6087 = vmatpush3.bf16.msra.mxu1 %v6606_v27  ;;  %v6705_v26 = vld [vmem:[#allocation11 + $0x30] ss:$12 sps:$4 sm:$0xff]   ;;  %v6710_v27 = vld [vmem:[#allocation11 + $0x4c] ss:$12 sps:$4 sm:$0xff]  }
 0x40e   :  { %3637 = vmatprep.subr.bf16.mxu0 %v6609_v28  ;;  %6088 = vmatprep.subr.bf16.mxu1 %v7037_v63  ;;  %v6708_v28 = vld [vmem:[#allocation11 + $0x48] ss:$12 sps:$4 sm:$0xff]  }
 0x411   :  { %3638 = vmatpush1.bf16.msra.mxu0 %v6607_v29  ;;  %6089 = vmatpush3.bf16.msra.mxu1 %v6610_v30  ;;  %v6713_v29 = vld [vmem:[#allocation11 + $0x64] ss:$12 sps:$4 sm:$0xff]   ;;  %v6711_v30 = vld [vmem:[#allocation11 + $0x60] ss:$12 sps:$4 sm:$0xff]  }
 0x412   :  { %3639 = vmatprep.subr.bf16.mxu0 %v6613_v31  ;;  %6090 = vmatprep.subr.bf16.mxu1 %v7037_v63  ;;  %v6716_v31 = vld [vmem:[#allocation11 + $0x7c] ss:$12 sps:$4 sm:$0xff]  }
 0x415   :  { %3640 = vmatpush1.bf16.msra.mxu0 %v6611_v33  ;;  %6091 = vmatpush3.bf16.msra.mxu1 %v6614_v34  ;;  %v6714_v33 = vld [vmem:[#allocation11 + $0x78] ss:$12 sps:$4 sm:$0xff]   ;;  %v6719_v34 = vld [vmem:[#allocation11 + $0x94] ss:$12 sps:$4 sm:$0xff]  }
 0x416   :  { %3641 = vmatprep.subr.bf16.mxu0 %v6617_v36  ;;  %6092 = vmatprep.subr.bf16.mxu1 %v7037_v63  ;;  %v6717_v36 = vld [vmem:[#allocation11 + $0x90] ss:$12 sps:$4 sm:$0xff]  }
 0x419   :  { %3642 = vmatpush1.bf16.msra.mxu0 %v6615_v38  ;;  %6093 = vmatpush3.bf16.msra.mxu1 %v6618_v39  ;;  %v6722_v38 = vld [vmem:[#allocation11 + $0xac] ss:$12 sps:$4 sm:$0xff]   ;;  %v6720_v39 = vld [vmem:[#allocation11 + $0xa8] ss:$12 sps:$4 sm:$0xff]  }
 0x41a   :  { %3643 = vmatprep.subr.bf16.mxu0 %v6621_v41  ;;  %6094 = vmatprep.subr.bf16.mxu1 %v7037_v63  ;;  %v6723_v41 = vld [vmem:[#allocation11 + $0xc0] ss:$12 sps:$4 sm:$0xff]  }
 0x41d   :  { %3644 = vmatpush1.bf16.msra.mxu0 %v6619_v42  ;;  %6095 = vmatpush3.bf16.msra.mxu1 %v6622_v32  ;;  %v6728_v42 = vld [vmem:[#allocation11 + $0xdc] ss:$12 sps:$4 sm:$0xff]   ;;  %v6726_v32 = vld [vmem:[#allocation11 + $0xd8] ss:$12 sps:$4 sm:$0xff]  }
 0x41e   :  { %3645 = vmatprep.subr.bf16.mxu0 %v6625_v44  ;;  %6096 = vmatprep.subr.bf16.mxu1 %v7037_v63  ;;  %v6729_v44 = vld [vmem:[#allocation11 + $0xf0] ss:$12 sps:$4 sm:$0xff]  }
 0x421   :  { %3646 = vmatpush1.bf16.msra.mxu0 %v6623_v45  ;;  %6097 = vmatpush3.bf16.msra.mxu1 %v6626_v46  ;;  %v6734_v45 = vld [vmem:[#allocation11 + $0x10c] ss:$12 sps:$4 sm:$0xff]   ;;  %v6732_v46 = vld [vmem:[#allocation11 + $0x108] ss:$12 sps:$4 sm:$0xff]  }
 0x422   :  { %4058 = vmatprep.subr.bf16.mxu1 %v6629_v37  ;;  %4481 = vmatprep.subr.bf16.mxu0 %v6701_v21  ;;  %v6735_v37 = vld [vmem:[#allocation11 + $0x120] ss:$12 sps:$4 sm:$0xff]  }
 0x423   :  { %v6689_v21 = vld [vmem:[#allocation10 + $0x144] ss:$8 sps:$4 sm:$0xff]  }
 0x424   :  { %3664 = vmatmul.mubr.bf16.vlgmr.msra.gmra.mrb[32].mxu0 %v3092_v49  ;;  %6099 = vmatmul.mubr.bf16.vlgmr.msra.gmra.mrb[32].mxu1 %v3092_v49  ;;  %v6738_v49 = vld [vmem:[#allocation11 + $0x138] ss:$12 sps:$4 sm:$0xff]  }
 0x425   :  { %4059 = vmatpush1.bf16.msra.mxu1 %v6627_v48  ;;  %4482 = vmatpush1.bf16.msra.mxu0 %v6699_v20  ;;  %v6740_v48 = vld [vmem:[#allocation11 + $0x13c] ss:$12 sps:$4 sm:$0xff]   ;;  %v6684_v20 = vld [vmem:[#allocation10 + $0x130] ss:$8 sps:$4 sm:$0xff]  }
 0x426   :  { %4060 = vmatprep.subr.bf16.mxu1 %v6632_v50  ;;  %4483 = vmatprep.subr.bf16.mxu0 %v6704_v23  ;;  %v6687_v23 = vld [vmem:[#allocation10 + $0x140] ss:$8 sps:$4 sm:$0xff]  }
 0x429   :  { %4061 = vmatpush1.bf16.msra.mxu1 %v6630_v51  ;;  %4484 = vmatpush1.bf16.msra.mxu0 %v6702_v24  ;;  %v6692_v24 = vld [vmem:[#allocation10 + $0x154] ss:$8 sps:$4 sm:$0xff]  }
 0x42a   :  { %4062 = vmatprep.subr.bf16.mxu1 %v6635_v52  ;;  %4485 = vmatprep.subr.bf16.mxu0 %v6707_v25  ;;  %v6690_v25 = vld [vmem:[#allocation10 + $0x150] ss:$8 sps:$4 sm:$0xff]  }
 0x42d   :  { %4063 = vmatpush1.bf16.msra.mxu1 %v6633_v53  ;;  %4486 = vmatpush1.bf16.msra.mxu0 %v6705_v26  ;;  %v6695_v26 = vld [vmem:[#allocation10 + $0x164] ss:$8 sps:$4 sm:$0xff]  }
 0x42e   :  { %4064 = vmatprep.subr.bf16.mxu1 %v6638_v54  ;;  %4487 = vmatprep.subr.bf16.mxu0 %v6710_v27  ;;  %v6698_v27 = vld [vmem:[#allocation10 + $0x174] ss:$8 sps:$4 sm:$0xff]  }
 0x431   :  { %4065 = vmatpush1.bf16.msra.mxu1 %v6636_v55  ;;  %4488 = vmatpush1.bf16.msra.mxu0 %v6708_v28  ;;  %v3189_v55 = vld [vmem:[%s7613_s8] sm:$0x7]  ;;  %v6696_v28 = vld [vmem:[#allocation10 + $0x170] ss:$8 sps:$4 sm:$0xff]  }
 0x432   :  { %4066 = vmatprep.subr.bf16.mxu1 %v6641_v56  ;;  %4489 = vmatprep.subr.bf16.mxu0 %v6713_v29  ;;  %v3202_v56 = vrot.slane %v3189_v55, %v7419_v35 }
 0x435   :  { %4067 = vmatpush1.bf16.msra.mxu1 %v6639_v57  ;;  %4490 = vmatpush1.bf16.msra.mxu0 %v6711_v30  ;;  %v3194_v57 = vrot.slane %v3189_v55, %v7392_v62 }
 0x436   :  { %4068 = vmatprep.subr.bf16.mxu1 %v6644_v58  ;;  %4491 = vmatprep.subr.bf16.mxu0 %v6716_v31  ;;  %v3198_v58 = vrot.slane %v3189_v55, %v7398_v0  ;;  %v6743_v31 = vld [vmem:[#allocation11 + $0x154] ss:$12 sps:$4 sm:$0xff]  }
 0x439   :  { %4069 = vmatpush1.bf16.msra.mxu1 %v6642_v59  ;;  %4492 = vmatpush1.bf16.msra.mxu0 %v6714_v33  ;;  %v6741_v33 = vld [vmem:[#allocation11 + $0x150] ss:$12 sps:$4 sm:$0xff]  }
 0x43a   :  { %4070 = vmatprep.subr.bf16.mxu1 %v6647_v60  ;;  %4493 = vmatprep.subr.bf16.mxu0 %v6719_v34  ;;  %v6746_v34 = vld [vmem:[#allocation11 + $0x16c] ss:$12 sps:$4 sm:$0xff]  }
 0x43d   :  { %4071 = vmatpush1.bf16.msra.mxu1 %v6645_v61  ;;  %4494 = vmatpush1.bf16.msra.mxu0 %v6717_v36  ;;  %v6744_v36 = vld [vmem:[#allocation11 + $0x168] ss:$12 sps:$4 sm:$0xff]  }
 0x43e   :  { %4072 = vmatprep.subr.bf16.mxu1 %v6650_v1  ;;  %4495 = vmatprep.subr.bf16.mxu0 %v6722_v38  ;;  %v6747_v38 = vld [vmem:[#allocation11 + $0xc8] ss:$12 sps:$4 sm:$0xff]  }
 0x441   :  { %4073 = vmatpush1.bf16.msra.mxu1 %v6648_v2  ;;  %4496 = vmatpush1.bf16.msra.mxu0 %v6720_v39  ;;  %v6763_v39 = vld [vmem:[%s7618_s13 + $0x40] sm:$0xff]  }
 0x442   :  { %4074 = vmatprep.subr.bf16.mxu1 %v6653_v3  ;;  %4497 = vmatprep.subr.bf16.mxu0 %v6725_v40  ;;  %v6764_v40 = vld [vmem:[%s7618_s13] sm:$0xff]  }
 0x445   :  { %4075 = vmatpush1.bf16.msra.mxu1 %v6651_v4  ;;  %4498 = vmatpush1.bf16.msra.mxu0 %v6723_v41  ;;  %v6765_v41 = vld [vmem:[%s7618_s13 + $0x48] sm:$0xff]  }
 0x446   :  { %4076 = vmatprep.subr.bf16.mxu1 %v6656_v5  ;;  %4499 = vmatprep.subr.bf16.mxu0 %v6728_v42  ;;  %v6766_v42 = vld [vmem:[%s7618_s13 + $0x8] sm:$0xff]  }
 0x449   :  { %4077 = vmatpush1.bf16.msra.mxu1 %v6654_v6  ;;  %4500 = vmatpush1.bf16.msra.mxu0 %v6726_v32  ;;  %v6767_v32 = vld [vmem:[%s7618_s13 + $0x50] sm:$0xff]  }
 0x44a   :  { %4078 = vmatprep.subr.bf16.mxu1 %v6659_v7  ;;  %4501 = vmatprep.subr.bf16.mxu0 %v6731_v43  ;;  %v6768_v43 = vld [vmem:[%s7618_s13 + $0x10] sm:$0xff]  }
 0x44d   :  { %4079 = vmatpush1.bf16.msra.mxu1 %v6657_v8  ;;  %4502 = vmatpush1.bf16.msra.mxu0 %v6729_v44  ;;  %v6769_v44 = vld [vmem:[%s7618_s13 + $0x58] sm:$0xff]  }
 0x44e   :  { %4080 = vmatprep.subr.bf16.mxu1 %v6662_v9  ;;  %4503 = vmatprep.subr.bf16.mxu0 %v6734_v45  ;;  %v6770_v45 = vld [vmem:[%s7618_s13 + $0x18] sm:$0xff]  }
 0x451   :  { %4081 = vmatpush1.bf16.msra.mxu1 %v6660_v10  ;;  %4504 = vmatpush1.bf16.msra.mxu0 %v6732_v46  ;;  %v6771_v46 = vld [vmem:[%s7618_s13 + $0x60] sm:$0xff]  }
 0x452   :  { %4082 = vmatprep.subr.bf16.mxu1 %v6665_v11  ;;  %4505 = vmatprep.subr.bf16.mxu0 %v6737_v47  ;;  %v6772_v47 = vld [vmem:[%s7618_s13 + $0x20] sm:$0xff]  }
 0x455   :  { %4083 = vmatpush1.bf16.msra.mxu1 %v6663_v12  ;;  %4506 = vmatpush1.bf16.msra.mxu0 %v6735_v37  ;;  %v6773_v37 = vld [vmem:[%s7618_s13 + $0x68] sm:$0xff]  }
 0x456   :  { %4084 = vmatprep.subr.bf16.mxu1 %v6668_v13  ;;  %4507 = vmatprep.subr.bf16.mxu0 %v6740_v48  ;;  %v6675_v13 = vld [vmem:[#allocation10 + $0x100] ss:$8 sps:$4 sm:$0xff]  }
 0x457   :  { %v6774_v48 = vld [vmem:[%s7618_s13 + $0x28] sm:$0xff]  }
 0x459   :  { %4085 = vmatpush1.bf16.msra.mxu1 %v6666_v14  ;;  %4508 = vmatpush1.bf16.msra.mxu0 %v6738_v49  ;;  %v3806_v49 = vld [vmem:[%s7615_s10] sm:$0x3] }
 0x45a   :  { %4086 = vmatprep.subr.bf16.mxu1 %v6671_v15  ;;  %v6680_v15 = vld [vmem:[#allocation10 + $0x114] ss:$8 sps:$4 sm:$0xff]   ;;  %4509 = vmatprep.subr.bf16.mxu0 %v6743_v31 }
 0x45d   :  { %4087 = vmatpush1.bf16.msra.mxu1 %v6669_v16  ;;  %v6678_v16 = vld [vmem:[#allocation10 + $0x110] ss:$8 sps:$4 sm:$0xff]   ;;  %4510 = vmatpush1.bf16.msra.mxu0 %v6741_v33 }
 0x45e   :  { %4088 = vmatprep.subr.bf16.mxu1 %v6674_v17  ;;  %v6683_v17 = vld [vmem:[#allocation10 + $0x124] ss:$8 sps:$4 sm:$0xff]   ;;  %4511 = vmatprep.subr.bf16.mxu0 %v6746_v34 }
 0x461   :  { %4089 = vmatpush1.bf16.msra.mxu1 %v6672_v18  ;;  %v6681_v18 = vld [vmem:[#allocation10 + $0x120] ss:$8 sps:$4 sm:$0xff]   ;;  %4512 = vmatpush1.bf16.msra.mxu0 %v6744_v36 }
 0x462   :  { %4099 = vmatprep.subr.bf16.mxu1 %v6677_v19  ;;  %v6686_v19 = vld [vmem:[#allocation10 + $0x134] ss:$8 sps:$4 sm:$0xff]   ;;  %6002 = vmatprep.subr.bf16.mxu0 %v6747_v38 }
 0x4d7   :  { %v5987_v50 = vpop.f32.mrb[28].mxu1 }
 0x4d8   :  { %v5988_v51 = vpop.f32.mrb[29].mxu1 }
 0x4d9   :  { %v5989_v52 = vadd.f32 %v5988_v51, %v5987_v50  ;;  %v5990_v53 = vpop.f32.mrb[30].mxu1  ;;  %v3811_v50 = vrot.slane %v3806_v49, %v7392_v62  ;;  %v3815_v51 = vrot.slane %v3806_v49, %v7398_v0  ;;  %v6787_v49 = vld [vmem:[%s7620_s15] sm:$0xff]  }
 0x4da   :  { %v5991_v54 = vpop.f32.mrb[31].mxu1 }
 0x4db   :  { %v3707_v59 = vadd.f32 %v5989_v52, %v3202_v56 }
 0x4f7   :  { %v3665_v60 = vpop.f32.mrb[32].mxu0  ;;  %v3746_v61 = vpop.f32.mrb[32].mxu1 }
 0x4f8   :  { %v6182_v1 = vadd.f32 %v3665_v60, %v3194_v57  ;;  %v3747_v2 = vadd.f32 %v3746_v61, %v3707_v59  ;;  %v3667_v3 = vpop.f32.mrb[33].mxu0  ;;  %v6100_v4 = vpop.f32.mrb[33].mxu1  ;;  %v6748_v61 = vld [vmem:[#allocation11 + $0x8] ss:$12 sps:$4 sm:$0xff]  }
 0x4f9   :  { %v6183_v5 = vadd.f32 %v3667_v3, %v3198_v58  ;;  %v3669_v6 = vpop.f32.mrb[34].mxu0  ;;  %v3749_v7 = vpop.f32.mrb[34].mxu1  ;;  %v6750_v3 = vld [vmem:[#allocation11 + $0x20] ss:$12 sps:$4 sm:$0xff]   ;;  %v6751_v4 = vld [vmem:[#allocation11 + $0xf8] ss:$12 sps:$4 sm:$0xff]  }
 0x4fa   :  { %v3752_v8 = vmax.f32 %v6182_v1, 0.0  ;;  %v3670_v9 = vpop.f32.mrb[35].mxu0  ;;  %v6101_v10 = vpop.f32.mrb[35].mxu1  ;;  %v3754_v29 = vmax.f32 %v3747_v2, 0.0  ;;  %v6749_v2 = vld [vmem:[#allocation11 + $0xe0] ss:$12 sps:$4 sm:$0xff]  }
 0x4fb   :  { %v3753_v11 = vmax.f32 %v6183_v5, 0.0  ;;  %v6752_v5 = vld [vmem:[#allocation11 + $0x38] ss:$12 sps:$4 sm:$0xff]   ;;  %v6753_v6 = vld [vmem:[#allocation11 + $0x110] ss:$12 sps:$4 sm:$0xff]  }
 0x4fc   :  { %v3755_v14 = vpack.c.bf16 %v3752_v8, %v3752_v8  ;;  %v3757_v30 = vpack.c.bf16 %v3754_v29, %v3754_v29  ;;  %v6754_v7 = vld [vmem:[#allocation11 + $0x50] ss:$12 sps:$4 sm:$0xff]   ;;  %v6755_v8 = vld [vmem:[#allocation11 + $0x128] ss:$12 sps:$4 sm:$0xff]   ;;  %v6757_v10 = vld [vmem:[#allocation11 + $0x140] ss:$12 sps:$4 sm:$0xff]  }
 0x4fd   :  { %v3756_v12 = vpack.c.bf16 %v3753_v11, %v3753_v11  ;;  %v6756_v9 = vld [vmem:[#allocation11 + $0x68] ss:$12 sps:$4 sm:$0xff]   ;;  %v6758_v11 = vld [vmem:[#allocation11 + $0x80] ss:$12 sps:$4 sm:$0xff]  }
 0x4ff   :  { %4090 = vmatprep.mubr.bf16.mxu1 %v3756_v12  ;;  %v6759_v12 = vld [vmem:[#allocation11 + $0x158] ss:$12 sps:$4 sm:$0xff]  }
 0x500   :  { %4091 = vmatmul.mubr.bf16.vlgmr.msra.gmra.mrb[36].mxu1 %v3755_v14  ;;  %v6761_v14 = vld [vmem:[#allocation11 + $0x170] ss:$12 sps:$4 sm:$0xff]  }
 0x501   :  { %4100 = vmatpush1.bf16.msra.mxu1 %v6675_v13  ;;  %4131 = vmatprep.mubr.bf16.mxu1 %v7036_v22  ;;  %v6693_v22 = vld [vmem:[#allocation10 + $0x160] ss:$8 sps:$4 sm:$0xff]   ;;  %v6760_v13 = vld [vmem:[#allocation11 + $0x98] ss:$12 sps:$4 sm:$0xff]  }
 0x502   :  { %4101 = vmatprep.subr.bf16.mxu1 %v6680_v15  ;;  %v6762_v15 = vld [vmem:[#allocation11 + $0xb0] ss:$12 sps:$4 sm:$0xff]  }
 0x505   :  { %4102 = vmatpush1.bf16.msra.mxu1 %v6678_v16  ;;  %v6775_v16 = vld [vmem:[%s7618_s13 + $0x70] sm:$0xff]  }
 0x506   :  { %4103 = vmatprep.subr.bf16.mxu1 %v6683_v17  ;;  %v6776_v17 = vld [vmem:[%s7618_s13 + $0x30] sm:$0xff]  }
 0x509   :  { %4104 = vmatpush1.bf16.msra.mxu1 %v6681_v18  ;;  %v6777_v18 = vld [vmem:[%s7618_s13 + $0x78] sm:$0xff]  }
 0x50a   :  { %4105 = vmatprep.subr.bf16.mxu1 %v6686_v19  ;;  %v6778_v19 = vld [vmem:[%s7618_s13 + $0x38] sm:$0xff]  }
 0x50d   :  { %4106 = vmatpush1.bf16.msra.mxu1 %v6684_v20  ;;  %v6779_v20 = vld [vmem:[%s7618_s13 + $0x80] sm:$0xff]  }
 0x50e   :  { %4107 = vmatprep.subr.bf16.mxu1 %v6689_v21  ;;  %v6780_v21 = vld [vmem:[%s7618_s13 + $0x88] sm:$0xff]  }
 0x511   :  { %4108 = vmatpush1.bf16.msra.mxu1 %v6687_v23  ;;  %v6781_v23 = vld [vmem:[%s7618_s13 + $0x90] sm:$0xff]  }
 0x512   :  { %4109 = vmatprep.subr.bf16.mxu1 %v6692_v24  ;;  %v6782_v24 = vld [vmem:[%s7618_s13 + $0x98] sm:$0xff]  }
 0x515   :  { %4110 = vmatpush1.bf16.msra.mxu1 %v6690_v25  ;;  %v6783_v25 = vld [vmem:[%s7618_s13 + $0xa0] sm:$0xff]  }
 0x516   :  { %4111 = vmatprep.subr.bf16.mxu1 %v6695_v26  ;;  %v6784_v26 = vld [vmem:[%s7618_s13 + $0xa8] sm:$0xff]  }
 0x519   :  { %4112 = vmatpush1.bf16.msra.mxu1 %v6693_v22  ;;  %v6785_v22 = vld [vmem:[%s7618_s13 + $0xb0] sm:$0xff]  }
 0x51a   :  { %4113 = vmatprep.subr.bf16.mxu1 %v6698_v27  ;;  %v6786_v27 = vld [vmem:[%s7618_s13 + $0xb8] sm:$0xff]  }
 0x51d   :  { %4114 = vmatpush1.bf16.msra.mxu1 %v6696_v28  ;;  %v4208_v28 = vld [vmem:[%s7617_s12] sm:$0x7] }
 0x51e   :  { %6024 = vmatprep.subr.bf16.mxu1 %v6763_v39  ;;  %v4213_v29 = vrot.slane %v4208_v28, %v7392_v62  ;;  %v4221_v62 = vrot.slane %v4208_v28, %v7419_v35  ;;  %v6788_v35 = vld [vmem:[%s7620_s15 + $0x8] sm:$0xff]  }
 0x520   :  { %4132 = vmatmul.mubr.bf16.vlgmr.msra.gmra.mrb[36].mxu1 %v3757_v30  ;;  %v4217_v30 = vrot.slane %v4208_v28, %v7398_v0 }
 0x521   :  { %6025 = vmatpush3.bf16.msra.mxu1 %v6764_v40 }
 0x522   :  { %6026 = vmatprep.subr.bf16.mxu1 %v6765_v41 }
 0x525   :  { %6027 = vmatpush3.bf16.msra.mxu1 %v6766_v42 }
 0x526   :  { %6028 = vmatprep.subr.bf16.mxu1 %v6767_v32 }
 0x529   :  { %6029 = vmatpush3.bf16.msra.mxu1 %v6768_v43 }
 0x52a   :  { %6030 = vmatprep.subr.bf16.mxu1 %v6769_v44 }
 0x52d   :  { %6031 = vmatpush3.bf16.msra.mxu1 %v6770_v45 }
 0x52e   :  { %6032 = vmatprep.subr.bf16.mxu1 %v6771_v46 }
 0x531   :  { %6033 = vmatpush3.bf16.msra.mxu1 %v6772_v47 }
 0x532   :  { %6034 = vmatprep.subr.bf16.mxu1 %v6773_v37 }
 0x535   :  { %6035 = vmatpush3.bf16.msra.mxu1 %v6774_v48 }
 0x536   :  { %6036 = vmatprep.subr.bf16.mxu1 %v6775_v16  ;;  %v6802_v16 = vld [vmem:[#allocation13 + $0x38] sm:$0xff]  }
 0x539   :  { %6037 = vmatpush3.bf16.msra.mxu1 %v6776_v17  ;;  %v6803_v17 = vld [vmem:[#allocation14] sm:$0xff]  }
 0x53a   :  { %6038 = vmatprep.subr.bf16.mxu1 %v6777_v18  ;;  %v6804_v18 = vld [vmem:[#allocation14 + $0x8] sm:$0xff]  }
 0x53d   :  { %6039 = vmatpush3.bf16.msra.mxu1 %v6778_v19  ;;  %v6805_v19 = vld [vmem:[#allocation14 + $0x10] sm:$0xff]  }
 0x53e   :  { %6122 = vmatprep.subr.bf16.mxu1 %v7037_v63 }
 0x5f3   :  { %v4133_v52 = vpop.f32.mrb[36].mxu1 }
 0x5f4   :  { %v6184_v53 = vadd.f32 %v4133_v52, %v3811_v50  ;;  %v4135_v54 = vpop.f32.mrb[37].mxu1  ;;  %v6789_v50 = vld [vmem:[%s7620_s15 + $0x10] sm:$0xff]   ;;  %v6791_v52 = vld [vmem:[%s7620_s15 + $0x20] sm:$0xff]  }
 0x5f5   :  { %v6185_v55 = vadd.f32 %v4135_v54, %v3815_v51  ;;  %v4137_v56 = vpop.f32.mrb[38].mxu1  ;;  %v6790_v51 = vld [vmem:[%s7620_s15 + $0x18] sm:$0xff]   ;;  %v6793_v54 = vld [vmem:[%s7620_s15 + $0x30] sm:$0xff]  }
 0x5f6   :  { %v4140_v57 = vmax.f32 %v6184_v53, 0.0  ;;  %v4138_v58 = vpop.f32.mrb[39].mxu1  ;;  %v6792_v53 = vld [vmem:[%s7620_s15 + $0x28] sm:$0xff]   ;;  %v6795_v56 = vld [vmem:[#allocation13] sm:$0xff]  }
 0x5f7   :  { %v4141_v59 = vmax.f32 %v6185_v55, 0.0  ;;  %v6794_v55 = vld [vmem:[%s7620_s15 + $0x38] sm:$0xff]   ;;  %v6797_v58 = vld [vmem:[#allocation13 + $0x10] sm:$0xff]  }
 0x5f8   :  { %v4142_v1 = vpack.c.bf16 %v4140_v57, %v4140_v57  ;;  %v6796_v57 = vld [vmem:[#allocation13 + $0x8] sm:$0xff]  }
 0x5f9   :  { %v4143_v60 = vpack.c.bf16 %v4141_v59, %v4141_v59  ;;  %v6798_v59 = vld [vmem:[#allocation13 + $0x18] sm:$0xff]  }
 0x5fb   :  { %4513 = vmatprep.mubr.bf16.mxu0 %v4143_v60 }
 0x5fc   :  { %4514 = vmatmul.mubr.bf16.vlgmr.msra.gmra.mrb[36].mxu0 %v4142_v1 }
 0x5fd   :  { %6003 = vmatpush3.bf16.msra.mxu0 %v6748_v61  ;;  %4554 = vmatprep.mubr.bf16.mxu0 %v4143_v60  ;;  %v6799_v60 = vld [vmem:[#allocation13 + $0x20] sm:$0xff]   ;;  %v6800_v61 = vld [vmem:[#allocation13 + $0x28] sm:$0xff]  }
 0x5fe   :  { %6004 = vmatprep.subr.bf16.mxu0 %v6749_v2 }
 0x601   :  { %6005 = vmatpush3.bf16.msra.mxu0 %v6750_v3 }
 0x602   :  { %6006 = vmatprep.subr.bf16.mxu0 %v6751_v4 }
 0x605   :  { %6007 = vmatpush3.bf16.msra.mxu0 %v6752_v5 }
 0x606   :  { %6008 = vmatprep.subr.bf16.mxu0 %v6753_v6  ;;  %v5633_v6 = vld [vmem:[%s7619_s14] ss:$0 sm:$0xff] }
 0x609   :  { %6009 = vmatpush3.bf16.msra.mxu0 %v6754_v7 }
 0x60a   :  { %6010 = vmatprep.subr.bf16.mxu0 %v6755_v8 }
 0x60d   :  { %6011 = vmatpush3.bf16.msra.mxu0 %v6756_v9 }
 0x60e   :  { %6012 = vmatprep.subr.bf16.mxu0 %v6757_v10 }
 0x611   :  { %6013 = vmatpush3.bf16.msra.mxu0 %v6758_v11 }
 0x612   :  { %6014 = vmatprep.subr.bf16.mxu0 %v6759_v12 }
 0x615   :  { %6015 = vmatpush3.bf16.msra.mxu0 %v6760_v13 }
 0x616   :  { %6016 = vmatprep.subr.bf16.mxu0 %v6761_v14 }
 0x619   :  { %6017 = vmatpush3.bf16.msra.mxu0 %v6762_v15  ;;  %v6801_v15 = vld [vmem:[#allocation13 + $0x30] sm:$0xff]  }
 0x61a   :  { %6102 = vmatprep.subr.bf16.mxu0 %v7037_v63 }
 0x61c   :  { %4555 = vmatmul.mubr.bf16.vlgmr.msra.gmra.mrb[40].mxu0 %v4142_v1 }
 0x61d   :  { %6118 = vmatprep.mubr.msk.bf16.mxu0 %vm7038_vm0, %v7037_v63  ;;  %6103 = vmatpush3.bf16.msra.mxu0 %v6779_v20  ;;  %v6806_v20 = vld [vmem:[#allocation14 + $0x18] sm:$0xff]  }
 0x61e   :  { %6104 = vmatprep.subr.bf16.mxu0 %v7037_v63 }
 0x621   :  { %6105 = vmatpush3.bf16.msra.mxu0 %v6780_v21  ;;  %v6807_v21 = vld [vmem:[#allocation14 + $0x20] sm:$0xff]  }
 0x622   :  { %6106 = vmatprep.subr.bf16.mxu0 %v7037_v63 }
 0x625   :  { %6107 = vmatpush3.bf16.msra.mxu0 %v6781_v23  ;;  %v6808_v23 = vld [vmem:[#allocation14 + $0x28] sm:$0xff]  }
 0x626   :  { %6108 = vmatprep.subr.bf16.mxu0 %v7037_v63 }
 0x629   :  { %6109 = vmatpush3.bf16.msra.mxu0 %v6782_v24  ;;  %v5658_v24 = vld [vmem:[%s7621_s16] ss:$0 sm:$0xff] }
 0x62a   :  { %6110 = vmatprep.subr.bf16.mxu0 %v7037_v63 }
 0x62d   :  { %6111 = vmatpush3.bf16.msra.mxu0 %v6783_v25 }
 0x62e   :  { %6112 = vmatprep.subr.bf16.mxu0 %v7037_v63 }
 0x631   :  { %6113 = vmatpush3.bf16.msra.mxu0 %v6784_v26 }
 0x632   :  { %6114 = vmatprep.subr.bf16.mxu0 %v7037_v63 }
 0x635   :  { %6115 = vmatpush3.bf16.msra.mxu0 %v6785_v22 }
 0x636   :  { %6116 = vmatprep.subr.bf16.mxu0 %v7037_v63 }
 0x639   :  { %6117 = vmatpush3.bf16.msra.mxu0 %v6786_v27 }
 0x63a   :  { %6142 = vmatprep.subr.bf16.mxu0 %v7037_v63 }
 0x6cf   :  { %v4515_v31 = vpop.f32.mrb[36].mxu0 }
 0x6d0   :  { %v4516_v33 = vadd.f32 %v4515_v31, %v4213_v29  ;;  %v4517_v34 = vpop.f32.mrb[37].mxu0  ;;  %v6809_v31 = vld [vmem:[#allocation14 + $0x30] sm:$0xff]  }
 0x6d1   :  { %v4518_v36 = vadd.f32 %v4517_v34, %v4217_v30  ;;  %v4519_v38 = vpop.f32.mrb[38].mxu0  ;;  %v5667_v34 = vld [vmem:[%s7623_s18] ss:$0 sm:$0xff] }
 0x6d2   :  { %v4562_v39 = vmax.f32 %v4516_v33, 0.0  ;;  %v4520_v40 = vpop.f32.mrb[39].mxu0  ;;  %v6810_v33 = vld [vmem:[#allocation14 + $0x38] sm:$0xff]  }
 0x6d3   :  { %v4563_v41 = vmax.f32 %v4518_v36, 0.0 }
 0x6d4   :  { %v4565_v32 = vpack.c.bf16 %v4562_v39, %v4562_v39 }
 0x6d5   :  { %v4566_v42 = vpack.c.bf16 %v4563_v41, %v4563_v41 }
 0x6d7   :  { %4799 = vmatprep.mubr.bf16.mxu1 %v4566_v42 }
 0x6d8   :  { %4800 = vmatmul.mubr.bf16.vlgmr.msra.gmra.mrb[40].mxu1 %v4565_v32 }
 0x6d9   :  { %6138 = vmatprep.mubr.msk.bf16.mxu1 %vm7038_vm0, %v7037_v63  ;;  %6123 = vmatpush3.bf16.msra.mxu1 %v6787_v49 }
 0x6da   :  { %6124 = vmatprep.subr.bf16.mxu1 %v7037_v63 }
 0x6dd   :  { %6125 = vmatpush3.bf16.msra.mxu1 %v6788_v35 }
 0x6de   :  { %6126 = vmatprep.subr.bf16.mxu1 %v7037_v63 }
 0x6e1   :  { %6127 = vmatpush3.bf16.msra.mxu1 %v6789_v50 }
 0x6e2   :  { %6128 = vmatprep.subr.bf16.mxu1 %v7037_v63 }
 0x6e5   :  { %6129 = vmatpush3.bf16.msra.mxu1 %v6790_v51 }
 0x6e6   :  { %6130 = vmatprep.subr.bf16.mxu1 %v7037_v63 }
 0x6e9   :  { %6131 = vmatpush3.bf16.msra.mxu1 %v6791_v52 }
 0x6ea   :  { %6132 = vmatprep.subr.bf16.mxu1 %v7037_v63 }
 0x6ed   :  { %6133 = vmatpush3.bf16.msra.mxu1 %v6792_v53 }
 0x6ee   :  { %6134 = vmatprep.subr.bf16.mxu1 %v7037_v63 }
 0x6ef   :  { %v6018_v43 = vpop.f32.mrb[40].mxu0 }
 0x6f0   :  { %v6019_v44 = vpop.f32.mrb[41].mxu0 }
 0x6f1   :  { %v6020_v0 = vadd.f32 %v6019_v44, %v6018_v43  ;;  %v6021_v45 = vpop.f32.mrb[42].mxu0  ;;  %6135 = vmatpush3.bf16.msra.mxu1 %v6793_v54  ;;  %v5676_v43 = vld [vmem:[%s7652_s2] ss:$0 sm:$0xff] }
 0x6f2   :  { %v6022_v46 = vpop.f32.mrb[43].mxu0  ;;  %6136 = vmatprep.subr.bf16.mxu1 %v7037_v63 }
 0x6f3   :  { %v4557_v47 = vadd.f32 %v6020_v0, %v4221_v62 }
 0x6f5   :  { %v4564_v37 = vmax.f32 %v4557_v47, 0.0  ;;  %6137 = vmatpush3.bf16.msra.mxu1 %v6794_v55 }
 0x6f6   :  { %6162 = vmatprep.subr.bf16.mxu1 %v7037_v63 }
 0x6f7   :  { %v4567_v48 = vpack.c.bf16 %v4564_v37, %v4564_v37 }
 0x6f9   :  { %6119 = vmatmul.mubr.bf16.vlgmr.msra.gmra.mrb[44].mxu0 %v4567_v48 }
 0x6fa   :  { %6158 = vmatprep.mubr.msk.bf16.mxu0 %vm7038_vm0, %v7037_v63  ;;  %6143 = vmatpush3.bf16.msra.mxu0 %v6795_v56 }
 0x6fb   :  { %6144 = vmatprep.subr.bf16.mxu0 %v7037_v63 }
 0x6fe   :  { %6145 = vmatpush3.bf16.msra.mxu0 %v6796_v57 }
 0x6ff   :  { %6146 = vmatprep.subr.bf16.mxu0 %v7037_v63 }
 0x702   :  { %6147 = vmatpush3.bf16.msra.mxu0 %v6797_v58 }
 0x703   :  { %6148 = vmatprep.subr.bf16.mxu0 %v7037_v63 }
 0x706   :  { %6149 = vmatpush3.bf16.msra.mxu0 %v6798_v59 }
 0x707   :  { %6150 = vmatprep.subr.bf16.mxu0 %v7037_v63 }
 0x70a   :  { %6151 = vmatpush3.bf16.msra.mxu0 %v6799_v60 }
 0x70b   :  { %6152 = vmatprep.subr.bf16.mxu0 %v7037_v63 }
 0x70e   :  { %6153 = vmatpush3.bf16.msra.mxu0 %v6800_v61 }
 0x70f   :  { %6154 = vmatprep.subr.bf16.mxu0 %v7037_v63 }
 0x712   :  { %6155 = vmatpush3.bf16.msra.mxu0 %v6801_v15 }
 0x713   :  { %6156 = vmatprep.subr.bf16.mxu0 %v7037_v63 }
 0x716   :  { %6157 = vmatpush3.bf16.msra.mxu0 %v6802_v16 }
 0x7ab   :  { %v6040_v1 = vpop.f32.mrb[40].mxu1 }
 0x7ac   :  { %v6041_v2 = vpop.f32.mrb[41].mxu1 }
 0x7ad   :  { %v6042_v3 = vadd.f32 %v6041_v2, %v6040_v1  ;;  %v6043_v4 = vpop.f32.mrb[42].mxu1 }
 0x7ae   :  { %v6044_v5 = vpop.f32.mrb[43].mxu1 }
 0x7af   :  { %v4802_v7 = vadd.f32 %v6042_v3, %v5633_v6 }
 0x7cc   :  { %v4841_v8 = vpop.f32.mrb[44].mxu0 }
 0x7cd   :  { %v4842_v9 = vadd.f32 %v4841_v8, %v4802_v7  ;;  %v6120_v10 = vpop.f32.mrb[45].mxu0 }
 0x7ce   :  { %v4844_v11 = vpop.f32.mrb[46].mxu0 }
 0x7cf   :  { %v4847_v12 = vmax.f32 %v4842_v9, 0.0  ;;  %v6121_v13 = vpop.f32.mrb[47].mxu0 }
 0x7d1   :  { %v4848_v14 = vpack.c.bf16 %v4847_v12, %v4847_v12 }
 0x7d3   :  { %6139 = vmatmul.mubr.bf16.vlgmr.msra.gmra.mrb[44].mxu1 %v4848_v14 }
 0x7d4   :  { %6178 = vmatprep.mubr.msk.bf16.mxu1 %vm7038_vm0, %v7037_v63  ;;  %6163 = vmatpush3.bf16.msra.mxu1 %v6803_v17 }
 0x7d5   :  { %6164 = vmatprep.subr.bf16.mxu1 %v7037_v63 }
 0x7d8   :  { %6165 = vmatpush3.bf16.msra.mxu1 %v6804_v18 }
 0x7d9   :  { %6166 = vmatprep.subr.bf16.mxu1 %v7037_v63 }
 0x7dc   :  { %6167 = vmatpush3.bf16.msra.mxu1 %v6805_v19 }
 0x7dd   :  { %6168 = vmatprep.subr.bf16.mxu1 %v7037_v63 }
 0x7e0   :  { %6169 = vmatpush3.bf16.msra.mxu1 %v6806_v20 }
 0x7e1   :  { %6170 = vmatprep.subr.bf16.mxu1 %v7037_v63 }
 0x7e4   :  { %6171 = vmatpush3.bf16.msra.mxu1 %v6807_v21 }
 0x7e5   :  { %6172 = vmatprep.subr.bf16.mxu1 %v7037_v63 }
 0x7e8   :  { %6173 = vmatpush3.bf16.msra.mxu1 %v6808_v23 }
 0x7e9   :  { %6174 = vmatprep.subr.bf16.mxu1 %v7037_v63 }
 0x7ec   :  { %6175 = vmatpush3.bf16.msra.mxu1 %v6809_v31 }
 0x7ed   :  { %6176 = vmatprep.subr.bf16.mxu1 %v7037_v63 }
 0x7f0   :  { %6177 = vmatpush3.bf16.msra.mxu1 %v6810_v33 }
 0x8a6   :  { %v4954_v25 = vpop.f32.mrb[44].mxu1 }
 0x8a7   :  { %v4955_v26 = vadd.f32 %v5658_v24, %v4954_v25  ;;  %v6140_v22 = vpop.f32.mrb[45].mxu1 }
 0x8a8   :  { %v4957_v27 = vpop.f32.mrb[46].mxu1 }
 0x8a9   :  { %v4960_v28 = vmax.f32 %v4955_v26, 0.0  ;;  %v6141_v29 = vpop.f32.mrb[47].mxu1 }
 0x8ab   :  { %v4961_v30 = vpack.c.bf16 %v4960_v28, %v4960_v28 }
 0x8ad   :  { %6159 = vmatmul.mubr.bf16.vlgmr.msra.gmra.mrb[48].mxu0 %v4961_v30 }
 0x980   :  { %v5067_v36 = vpop.f32.mrb[48].mxu0 }
 0x981   :  { %v5068_v38 = vadd.f32 %v5667_v34, %v5067_v36  ;;  %v6160_v39 = vpop.f32.mrb[49].mxu0 }
 0x982   :  { %v5070_v40 = vpop.f32.mrb[50].mxu0 }
 0x983   :  { %v5073_v41 = vmax.f32 %v5068_v38, 0.0  ;;  %v6161_v42 = vpop.f32.mrb[51].mxu0 }
 0x985   :  { %v5074_v32 = vpack.c.bf16 %v5073_v41, %v5073_v41 }
 0x987   :  { %6179 = vmatmul.mubr.bf16.vlgmr.msra.gmra.mrb[48].mxu1 %v5074_v32 }
 0xa5a   :  { %v5180_v62 = vpop.f32.mrb[48].mxu1 }
 0xa5b   :  { %v5181_v63 = vadd.f32 %v5676_v43, %v5180_v62  ;;  %v6180_v44 = vpop.f32.mrb[49].mxu1 }
 0xa5c   :  { %v5183_v0 = vpop.f32.mrb[50].mxu1 }
 0xa5d   :  { %5186 = vst [vmem:[#allocation16] sm:$0xff] %v5181_v63  ;;  %v6181_v45 = vpop.f32.mrb[51].mxu1 }
 0xa5e   :  { %5191 = vsyncadd [#allocation4], 96  ;;  %s7039_s18 = smov [#allocation16]  }
 0xa5f   :  { %s5192_s6 = sshll.u32 %s7039_s18, 4  ;;  %s5193_s6 = int_to_ptr.vmem [resolvable:$true] %s5192_s6 }
 0xa60   :  { %s6987_s4 = scalar_lea.vmem %s5193_s6, 32  ;;  %s6991_s8 = scalar_lea.vmem %s5193_s6, 128 }
 0xa61   :  { %p6988_p8 = scmp.ne.s32.totalorder %s5193_s6, %s6987_s4  ;;  %p6992_p9 = scmp.lt.s32.totalorder %s5193_s6, %s5193_s6 }
 0xa62   :  { %p6993_p10 = scmp.lt.s32.totalorder %s6991_s8, %s6987_s4 }
 0xa64   :  { %p6994_p11 = por %p6993_p10, %p6992_p9 }
 0xa66   :  { %p6995_p12 = pnand %p6994_p11, %p6988_p8 }
 0xa68   :  { %6998 = shalt.err (!%p6995_p12)
}
 0xa69   :  { %s7653_s12 = sld [smem:[#allocation30_spill]] }
 0xa6f   :  { %s6999_s13 = scalar_lea.hbm %s7653_s12, 32 }
 0xa70   :  { %p7000_p13 = scmp.ne.s32.totalorder %s7653_s12, %s6999_s13  ;;  %p7003_p0 = scmp.lt.u32.totalorder %s6999_s13, %s7653_s12 }
 0xa72   :  { %p7005_p1 = pnand %p7003_p0, %p7000_p13 }
 0xa74   :  { %7008 = shalt.err (!%p7005_p1)
}
 0xa75   :  { %s7040_s17 = smov 32   ;;  %s7041_s21 = smov 2  }
 0xa76   :  { %5198 = dma.vmem_to_hbm [thread:$0]  %s5193_s6, 32, %s7653_s12, [#allocation4], %s7040_s17, %s7040_s17, %s7041_s21  }
 0xa77   :  { %7019 = dma.done.wait [#allocation4], 128  }
 0xa78   :  { %7020 = vsyncadd [#allocation4], 4294967168 }
 0xa79   :  { %5202 = vsyncpa [#allocation3], 1 }
 0xa7a   :  { %5203 = vsyncpa [#allocation6], 1 }
 0xa7b   :  { %5204 = vsyncpa [#allocation9], 1 }
 0xa7c   :  { %5205 = vsyncpa [#allocation12], 1 }
 0xa7d   :  { %5206 = vsyncpa [#allocation15], 1 }
 0xa7e   :  { %5207 = vsyncpa [#allocation4], 1 }

</bundles_post_ra>
